<compile_context>
chip_gen: v7x
topology: tpu7x:2x2x1
jax: 0.10.0
libtpu: 0.0.40
codegen_flags: <defaults>
</compile_context>

<pallas_src>
from functools import partial

import jax
import jax.numpy as jnp
from jax.experimental import pallas as pl
from jax.experimental.pallas import tpu as pltpu

EMBED_DIM = 32
NHEAD = 8
HEAD_DIM = EMBED_DIM // NHEAD
FFN_DIM = 2048            # nn.TransformerEncoderLayer default dim_feedforward
NUM_LAYERS = 3
VOCAB = 26
VOCAB_PAD = 32            # pad the table to a multiple of 8 rows for aligned VMEM/MXU use
LN_EPS = 1e-5


# --------------------------- embedding kernel (VMEM-resident table) ---------------------------

def _embedding_kernel(tok_ref, tbl_ref, o_ref):
    # tok_ref: (M, 1) int32, tbl_ref: (VOCAB_PAD, E), o_ref: (M, E)
    tok = tok_ref[...]                                                   # (M, 1)
    m = tok.shape[0]
    ids = jax.lax.broadcasted_iota(jnp.int32, (m, VOCAB_PAD), 1)         # (M, VOCAB_PAD)
    onehot = (ids == tok).astype(jnp.float32)                            # built in VMEM only
    o_ref[...] = jnp.dot(onehot, tbl_ref[...],
                         preferred_element_type=jnp.float32).astype(o_ref.dtype)


def embed(tokens_flat, table):
    """tokens_flat: (M,) int32, table: (VOCAB_PAD, E) -> (M, E) float32."""
    M = tokens_flat.shape[0]
    return pl.pallas_call(
        _embedding_kernel,
        out_shape=jax.ShapeDtypeStruct((M, EMBED_DIM), jnp.float32),
    )(tokens_flat.reshape(M, 1).astype(jnp.int32), table)


# --------------------------- fused encoder-layer kernel ---------------------------

def _encoder_layer_kernel(x_ref, wqkv_ref, bqkv_ref, wo_ref, bo_ref,
                          g1_ref, be1_ref, w1_ref, b1_ref, w2_ref, b2_ref,
                          g2_ref, be2_ref, o_ref, *, scale):
    x = x_ref[0]                                                         # (S, E)

    # ---- QKV projection: one MXU matmul ----
    qkv = jnp.dot(x, wqkv_ref[...],
                  preferred_element_type=jnp.float32) + bqkv_ref[...]    # (S, 3E)
    q_all = qkv[:, :EMBED_DIM] * scale                                   # scale Q once
    k_all = qkv[:, EMBED_DIM:2 * EMBED_DIM]
    v_all = qkv[:, 2 * EMBED_DIM:]
    wo = wo_ref[...]                                                     # (E, E)

    # ---- per-head attention, out-projection fused as matmul-accumulate ----
    attn = bo_ref[...]                                                   # (1, E) -> broadcasts
    for h in range(NHEAD):
        lo = h * HEAD_DIM
        hi = lo + HEAD_DIM
        qh = q_all[:, lo:hi]                                             # (S, Dh)
        kh = k_all[:, lo:hi]                                             # (S, Dh)
        vh = v_all[:, lo:hi]                                             # (S, Dh)
        s = jax.lax.dot_general(qh, kh, (((1,), (1,)), ((), ())),
                                preferred_element_type=jnp.float32)      # (S, S)
        s = s - jnp.max(s, axis=-1, keepdims=True)
        p = jnp.exp(s)
        p = p * pl.reciprocal(jnp.sum(p, axis=-1, keepdims=True), approx=True)
        oh = jnp.dot(p, vh, preferred_element_type=jnp.float32)          # (S, Dh)
        # concat over heads + out_proj == sum_h (oh @ Wo[h*Dh:(h+1)*Dh, :])
        attn = attn + jnp.dot(oh, wo[lo:hi, :], preferred_element_type=jnp.float32)

    # ---- residual + LayerNorm1 ----
    y = x + attn
    mean = jnp.mean(y, axis=-1, keepdims=True)
    c = y - mean
    var = jnp.mean(c * c, axis=-1, keepdims=True)
    x1 = c * jax.lax.rsqrt(var + LN_EPS) * g1_ref[...] + be1_ref[...]    # (S, E)

    # ---- FFN (hidden stays in VMEM/vregs) ----
    hdn = jnp.dot(x1, w1_ref[...], preferred_element_type=jnp.float32) + b1_ref[...]
    hdn = jnp.maximum(hdn, 0.0)                                          # (S, F)
    ff = jnp.dot(hdn, w2_ref[...], preferred_element_type=jnp.float32) + b2_ref[...]

    # ---- residual + LayerNorm2 ----
    y2 = x1 + ff
    mean2 = jnp.mean(y2, axis=-1, keepdims=True)
    c2 = y2 - mean2
    var2 = jnp.mean(c2 * c2, axis=-1, keepdims=True)
    o_ref[0] = (c2 * jax.lax.rsqrt(var2 + LN_EPS) * g2_ref[...] + be2_ref[...]).astype(o_ref.dtype)


def encoder_layer(x, p):
    """x: (N, S, E) -> (N, S, E), one fused pallas_call, grid over batch N."""
    N, S, E = x.shape

    def full(shp):
        return pl.BlockSpec(shp, lambda n, _s=shp: (0,) * len(_s))

    return pl.pallas_call(
        partial(_encoder_layer_kernel, scale=1.0 / (HEAD_DIM ** 0.5)),
        grid=(N,),
        in_specs=[
            pl.BlockSpec((1, S, E), lambda n: (n, 0, 0)),   # x
            full((E, 3 * E)), full((1, 3 * E)),             # wqkv, bqkv
            full((E, E)), full((1, E)),                     # wo, bo
            full((1, E)), full((1, E)),                     # ln1 gamma, beta
            full((E, FFN_DIM)), full((1, FFN_DIM)),         # w1, b1
            full((FFN_DIM, E)), full((1, E)),               # w2, b2
            full((1, E)), full((1, E)),                     # ln2 gamma, beta
        ],
        out_specs=pl.BlockSpec((1, S, E), lambda n: (n, 0, 0)),
        out_shape=jax.ShapeDtypeStruct((N, S, E), jnp.float32),
        compiler_params=pltpu.CompilerParams(
            dimension_semantics=("parallel",),
            vmem_limit_bytes=64 * 1024 * 1024,
        ),
    )(x, p["wqkv"], p["bqkv"], p["wo"], p["bo"],
      p["ln1_g"], p["ln1_b"], p["w1"], p["b1"], p["w2"], p["b2"],
      p["ln2_g"], p["ln2_b"])


# --------------------------------- model wrapper ---------------------------------

def protein_transformer(v, params):
    """v: (S, N) int tokens -> (S, N, E)  (PyTorch batch_first=False layout)."""
    S, N = v.shape
    # batch-major flatten so the embedding output reshapes straight to (N, S, E)
    tok = v.T.reshape(N * S)
    x = embed(tok, params["embedding"]).reshape(N, S, EMBED_DIM)
    for lp in params["layers"]:
        x = encoder_layer(x, lp)
    return x.transpose(1, 0, 2)          # back to (S, N, E)


# -------------------------------- parameter handling --------------------------------

def init_params_torch_layout(key):
    """Random params in PyTorch tensor layouts (as nn.TransformerEncoderLayer stores them)."""
    keys = jax.random.split(key, 1 + NUM_LAYERS)
    emb = jax.random.normal(keys[0], (VOCAB, EMBED_DIM), jnp.float32)
    emb = emb.at[0].set(0.0)             # padding_idx=0 -> zero row
    layers = []
    s = 0.05
    for i in range(NUM_LAYERS):
        ks = jax.random.split(keys[1 + i], 4)
        layers.append(dict(
            in_proj_w=jax.random.normal(ks[0], (3 * EMBED_DIM, EMBED_DIM), jnp.float32) * s,
            in_proj_b=jnp.zeros((3 * EMBED_DIM,), jnp.float32),
            out_proj_w=jax.random.normal(ks[1], (EMBED_DIM, EMBED_DIM), jnp.float32) * s,
            out_proj_b=jnp.zeros((EMBED_DIM,), jnp.float32),
            lin1_w=jax.random.normal(ks[2], (FFN_DIM, EMBED_DIM), jnp.float32) * s,
            lin1_b=jnp.zeros((FFN_DIM,), jnp.float32),
            lin2_w=jax.random.normal(ks[3], (EMBED_DIM, FFN_DIM), jnp.float32) * s,
            lin2_b=jnp.zeros((EMBED_DIM,), jnp.float32),
            ln1_w=jnp.ones((EMBED_DIM,), jnp.float32),
            ln1_b=jnp.zeros((EMBED_DIM,), jnp.float32),
            ln2_w=jnp.ones((EMBED_DIM,), jnp.float32),
            ln2_b=jnp.zeros((EMBED_DIM,), jnp.float32),
        ))
    return dict(embedding=emb, layers=layers)


def prepare_params(torch_params):
    """One-time conversion to kernel layout: pre-transposed weights, 2-D biases, padded table."""
    emb_pad = jnp.zeros((VOCAB_PAD, EMBED_DIM), jnp.float32)
    emb_pad = emb_pad.at[:VOCAB].set(torch_params["embedding"])
    layers = []
    for lp in torch_params["layers"]:
        layers.append(dict(
            wqkv=lp["in_proj_w"].T,                     # (E, 3E)
            bqkv=lp["in_proj_b"].reshape(1, -1),
            wo=lp["out_proj_w"].T,                      # (E, E)
            bo=lp["out_proj_b"].reshape(1, -1),
            w1=lp["lin1_w"].T,                          # (E, F)
            b1=lp["lin1_b"].reshape(1, -1),
            w2=lp["lin2_w"].T,                          # (F, E)
            b2=lp["lin2_b"].reshape(1, -1),
            ln1_g=lp["ln1_w"].reshape(1, -1),
            ln1_b=lp["ln1_b"].reshape(1, -1),
            ln2_g=lp["ln2_w"].reshape(1, -1),
            ln2_b=lp["ln2_b"].reshape(1, -1),
        ))
    return dict(embedding=emb_pad, layers=layers)


if __name__ == "__main__":
    key = jax.random.PRNGKey(0)
    pkey, dkey = jax.random.split(key)
    params = prepare_params(init_params_torch_layout(pkey))

    S, N = 8, 2                                        # small seq=8, batch=2
    v = jax.random.randint(dkey, (S, N), 0, VOCAB, dtype=jnp.int32)

    fwd = jax.jit(protein_transformer)
    out = jax.block_until_ready(fwd(v, params))

    assert out.shape == (S, N, EMBED_DIM), out.shape
    assert bool(jnp.all(jnp.isfinite(out)))
    print("KERNEL_OK")
</pallas_src>

<mosaic_0001>
module attributes {stable_mosaic.version = 11 : i64} {
  func.func @_encoder_layer_kernel(%arg0: i32, %arg1: memref<1x8x32xf32, #tpu.memory_space<vmem>>, %arg2: memref<32x96xf32, #tpu.memory_space<vmem>>, %arg3: memref<1x96xf32, #tpu.memory_space<vmem>>, %arg4: memref<32x32xf32, #tpu.memory_space<vmem>>, %arg5: memref<1x32xf32, #tpu.memory_space<vmem>>, %arg6: memref<1x32xf32, #tpu.memory_space<vmem>>, %arg7: memref<1x32xf32, #tpu.memory_space<vmem>>, %arg8: memref<32x2048xf32, #tpu.memory_space<vmem>>, %arg9: memref<1x2048xf32, #tpu.memory_space<vmem>>, %arg10: memref<2048x32xf32, #tpu.memory_space<vmem>>, %arg11: memref<1x32xf32, #tpu.memory_space<vmem>>, %arg12: memref<1x32xf32, #tpu.memory_space<vmem>>, %arg13: memref<1x32xf32, #tpu.memory_space<vmem>>, %arg14: memref<1x8x32xf32, #tpu.memory_space<vmem>>) attributes {dimension_semantics = [#tpu.dimension_semantics<parallel>], iteration_bounds = array<i64: 2>, scalar_prefetch = 0 : i64, scratch_operands = 0 : i64, tpu.core_type = #tpu.core_type<tc>, window_params = [{transform_indices = @transform_0, window_bounds = array<i64: 1, 8, 32>}, {pipeline_mode = #tpu.pipeline_mode<synchronous>, transform_indices = @transform_1, window_bounds = array<i64: 32, 96>}, {pipeline_mode = #tpu.pipeline_mode<synchronous>, transform_indices = @transform_2, window_bounds = array<i64: 1, 96>}, {pipeline_mode = #tpu.pipeline_mode<synchronous>, transform_indices = @transform_3, window_bounds = array<i64: 32, 32>}, {pipeline_mode = #tpu.pipeline_mode<synchronous>, transform_indices = @transform_4, window_bounds = array<i64: 1, 32>}, {pipeline_mode = #tpu.pipeline_mode<synchronous>, transform_indices = @transform_5, window_bounds = array<i64: 1, 32>}, {pipeline_mode = #tpu.pipeline_mode<synchronous>, transform_indices = @transform_6, window_bounds = array<i64: 1, 32>}, {pipeline_mode = #tpu.pipeline_mode<synchronous>, transform_indices = @transform_7, window_bounds = array<i64: 32, 2048>}, {pipeline_mode = #tpu.pipeline_mode<synchronous>, transform_indices = @transform_8, window_bounds = array<i64: 1, 2048>}, {pipeline_mode = #tpu.pipeline_mode<synchronous>, transform_indices = @transform_9, window_bounds = array<i64: 2048, 32>}, {pipeline_mode = #tpu.pipeline_mode<synchronous>, transform_indices = @transform_10, window_bounds = array<i64: 1, 32>}, {pipeline_mode = #tpu.pipeline_mode<synchronous>, transform_indices = @transform_11, window_bounds = array<i64: 1, 32>}, {pipeline_mode = #tpu.pipeline_mode<synchronous>, transform_indices = @transform_12, window_bounds = array<i64: 1, 32>}, {transform_indices = @transform_13, window_bounds = array<i64: 1, 8, 32>}]} {
    %c0 = arith.constant 0 : index
    %c0_0 = arith.constant 0 : index
    %c0_1 = arith.constant 0 : index
    %0 = vector.load %arg1[%c0, %c0_0, %c0_1] : memref<1x8x32xf32, #tpu.memory_space<vmem>>, vector<1x8x32xf32>
    %1 = vector.shape_cast %0 : vector<1x8x32xf32> to vector<8x32xf32>
    %c0_2 = arith.constant 0 : index
    %c0_3 = arith.constant 0 : index
    %2 = vector.load %arg2[%c0_2, %c0_3] : memref<32x96xf32, #tpu.memory_space<vmem>>, vector<32x96xf32>
    %cst = arith.constant dense<0.000000e+00> : vector<8x96xf32>
    %3 = tpu.matmul %1, %2, %cst {dimension_numbers = #tpu.dot_dimension_numbers<[1], [0], [0], [1], [0, 0, 1, 1], [], []>} : vector<8x32xf32>, vector<32x96xf32>, vector<8x96xf32> -> vector<8x96xf32>
    %c0_4 = arith.constant 0 : index
    %c0_5 = arith.constant 0 : index
    %4 = vector.load %arg3[%c0_4, %c0_5] : memref<1x96xf32, #tpu.memory_space<vmem>>, vector<1x96xf32>
    %5 = vector.broadcast %4 : vector<1x96xf32> to vector<8x96xf32>
    %6 = arith.addf %3, %5 : vector<8x96xf32>
    %7 = vector.extract_strided_slice %6 {offsets = [0, 0], sizes = [8, 32], strides = [1, 1]} : vector<8x96xf32> to vector<8x32xf32>
    %cst_6 = arith.constant 5.000000e-01 : f32
    %8 = vector.broadcast %cst_6 : f32 to vector<8x32xf32>
    %9 = arith.mulf %7, %8 : vector<8x32xf32>
    %10 = vector.extract_strided_slice %6 {offsets = [0, 32], sizes = [8, 32], strides = [1, 1]} : vector<8x96xf32> to vector<8x32xf32>
    %11 = vector.extract_strided_slice %6 {offsets = [0, 64], sizes = [8, 32], strides = [1, 1]} : vector<8x96xf32> to vector<8x32xf32>
    %c0_7 = arith.constant 0 : index
    %c0_8 = arith.constant 0 : index
    %12 = vector.load %arg4[%c0_7, %c0_8] : memref<32x32xf32, #tpu.memory_space<vmem>>, vector<32x32xf32>
    %c0_9 = arith.constant 0 : index
    %c0_10 = arith.constant 0 : index
    %13 = vector.load %arg5[%c0_9, %c0_10] : memref<1x32xf32, #tpu.memory_space<vmem>>, vector<1x32xf32>
    %14 = vector.extract_strided_slice %9 {offsets = [0, 0], sizes = [8, 4], strides = [1, 1]} : vector<8x32xf32> to vector<8x4xf32>
    %15 = vector.extract_strided_slice %10 {offsets = [0, 0], sizes = [8, 4], strides = [1, 1]} : vector<8x32xf32> to vector<8x4xf32>
    %16 = vector.extract_strided_slice %11 {offsets = [0, 0], sizes = [8, 4], strides = [1, 1]} : vector<8x32xf32> to vector<8x4xf32>
    %cst_11 = arith.constant dense<0.000000e+00> : vector<8x8xf32>
    %17 = tpu.matmul %14, %15, %cst_11 {dimension_numbers = #tpu.dot_dimension_numbers<[1], [1], [0], [0], [0, 0, 1, 0], [], []>} : vector<8x4xf32>, vector<8x4xf32>, vector<8x8xf32> -> vector<8x8xf32>
    %cst_12 = arith.constant dense<0xFF800000> : vector<8xf32>
    %18 = vector.multi_reduction <maximumf>, %17, %cst_12 [1] : vector<8x8xf32> to vector<8xf32>
    %19 = vector.shape_cast %18 : vector<8xf32> to vector<8x1xf32>
    %20 = vector.broadcast %19 : vector<8x1xf32> to vector<8x8xf32>
    %21 = arith.subf %17, %20 : vector<8x8xf32>
    %22 = math.exp %21 : vector<8x8xf32>
    %cst_13 = arith.constant dense<0.000000e+00> : vector<8xf32>
    %23 = vector.multi_reduction <add>, %22, %cst_13 [1] : vector<8x8xf32> to vector<8xf32>
    %24 = vector.shape_cast %23 : vector<8xf32> to vector<8x1xf32>
    %25 = tpu.reciprocal %24 {approx = true} : vector<8x1xf32> -> vector<8x1xf32>
    %26 = vector.broadcast %25 : vector<8x1xf32> to vector<8x8xf32>
    %27 = arith.mulf %22, %26 : vector<8x8xf32>
    %cst_14 = arith.constant dense<0.000000e+00> : vector<8x4xf32>
    %28 = tpu.matmul %27, %16, %cst_14 {dimension_numbers = #tpu.dot_dimension_numbers<[1], [0], [0], [1], [0, 0, 1, 1], [], []>} : vector<8x8xf32>, vector<8x4xf32>, vector<8x4xf32> -> vector<8x4xf32>
    %29 = vector.extract_strided_slice %12 {offsets = [0, 0], sizes = [4, 32], strides = [1, 1]} : vector<32x32xf32> to vector<4x32xf32>
    %cst_15 = arith.constant dense<0.000000e+00> : vector<8x32xf32>
    %30 = tpu.matmul %28, %29, %cst_15 {dimension_numbers = #tpu.dot_dimension_numbers<[1], [0], [0], [1], [0, 0, 1, 1], [], []>} : vector<8x4xf32>, vector<4x32xf32>, vector<8x32xf32> -> vector<8x32xf32>
    %31 = vector.broadcast %13 : vector<1x32xf32> to vector<8x32xf32>
    %32 = arith.addf %31, %30 : vector<8x32xf32>
    %33 = vector.extract_strided_slice %9 {offsets = [0, 4], sizes = [8, 4], strides = [1, 1]} : vector<8x32xf32> to vector<8x4xf32>
    %34 = vector.extract_strided_slice %10 {offsets = [0, 4], sizes = [8, 4], strides = [1, 1]} : vector<8x32xf32> to vector<8x4xf32>
    %35 = vector.extract_strided_slice %11 {offsets = [0, 4], sizes = [8, 4], strides = [1, 1]} : vector<8x32xf32> to vector<8x4xf32>
    %cst_16 = arith.constant dense<0.000000e+00> : vector<8x8xf32>
    %36 = tpu.matmul %33, %34, %cst_16 {dimension_numbers = #tpu.dot_dimension_numbers<[1], [1], [0], [0], [0, 0, 1, 0], [], []>} : vector<8x4xf32>, vector<8x4xf32>, vector<8x8xf32> -> vector<8x8xf32>
    %cst_17 = arith.constant dense<0xFF800000> : vector<8xf32>
    %37 = vector.multi_reduction <maximumf>, %36, %cst_17 [1] : vector<8x8xf32> to vector<8xf32>
    %38 = vector.shape_cast %37 : vector<8xf32> to vector<8x1xf32>
    %39 = vector.broadcast %38 : vector<8x1xf32> to vector<8x8xf32>
    %40 = arith.subf %36, %39 : vector<8x8xf32>
    %41 = math.exp %40 : vector<8x8xf32>
    %cst_18 = arith.constant dense<0.000000e+00> : vector<8xf32>
    %42 = vector.multi_reduction <add>, %41, %cst_18 [1] : vector<8x8xf32> to vector<8xf32>
    %43 = vector.shape_cast %42 : vector<8xf32> to vector<8x1xf32>
    %44 = tpu.reciprocal %43 {approx = true} : vector<8x1xf32> -> vector<8x1xf32>
    %45 = vector.broadcast %44 : vector<8x1xf32> to vector<8x8xf32>
    %46 = arith.mulf %41, %45 : vector<8x8xf32>
    %cst_19 = arith.constant dense<0.000000e+00> : vector<8x4xf32>
    %47 = tpu.matmul %46, %35, %cst_19 {dimension_numbers = #tpu.dot_dimension_numbers<[1], [0], [0], [1], [0, 0, 1, 1], [], []>} : vector<8x8xf32>, vector<8x4xf32>, vector<8x4xf32> -> vector<8x4xf32>
    %48 = vector.extract_strided_slice %12 {offsets = [4, 0], sizes = [4, 32], strides = [1, 1]} : vector<32x32xf32> to vector<4x32xf32>
    %cst_20 = arith.constant dense<0.000000e+00> : vector<8x32xf32>
    %49 = tpu.matmul %47, %48, %cst_20 {dimension_numbers = #tpu.dot_dimension_numbers<[1], [0], [0], [1], [0, 0, 1, 1], [], []>} : vector<8x4xf32>, vector<4x32xf32>, vector<8x32xf32> -> vector<8x32xf32>
    %50 = arith.addf %32, %49 : vector<8x32xf32>
    %51 = vector.extract_strided_slice %9 {offsets = [0, 8], sizes = [8, 4], strides = [1, 1]} : vector<8x32xf32> to vector<8x4xf32>
    %52 = vector.extract_strided_slice %10 {offsets = [0, 8], sizes = [8, 4], strides = [1, 1]} : vector<8x32xf32> to vector<8x4xf32>
    %53 = vector.extract_strided_slice %11 {offsets = [0, 8], sizes = [8, 4], strides = [1, 1]} : vector<8x32xf32> to vector<8x4xf32>
    %cst_21 = arith.constant dense<0.000000e+00> : vector<8x8xf32>
    %54 = tpu.matmul %51, %52, %cst_21 {dimension_numbers = #tpu.dot_dimension_numbers<[1], [1], [0], [0], [0, 0, 1, 0], [], []>} : vector<8x4xf32>, vector<8x4xf32>, vector<8x8xf32> -> vector<8x8xf32>
    %cst_22 = arith.constant dense<0xFF800000> : vector<8xf32>
    %55 = vector.multi_reduction <maximumf>, %54, %cst_22 [1] : vector<8x8xf32> to vector<8xf32>
    %56 = vector.shape_cast %55 : vector<8xf32> to vector<8x1xf32>
    %57 = vector.broadcast %56 : vector<8x1xf32> to vector<8x8xf32>
    %58 = arith.subf %54, %57 : vector<8x8xf32>
    %59 = math.exp %58 : vector<8x8xf32>
    %cst_23 = arith.constant dense<0.000000e+00> : vector<8xf32>
    %60 = vector.multi_reduction <add>, %59, %cst_23 [1] : vector<8x8xf32> to vector<8xf32>
    %61 = vector.shape_cast %60 : vector<8xf32> to vector<8x1xf32>
    %62 = tpu.reciprocal %61 {approx = true} : vector<8x1xf32> -> vector<8x1xf32>
    %63 = vector.broadcast %62 : vector<8x1xf32> to vector<8x8xf32>
    %64 = arith.mulf %59, %63 : vector<8x8xf32>
    %cst_24 = arith.constant dense<0.000000e+00> : vector<8x4xf32>
    %65 = tpu.matmul %64, %53, %cst_24 {dimension_numbers = #tpu.dot_dimension_numbers<[1], [0], [0], [1], [0, 0, 1, 1], [], []>} : vector<8x8xf32>, vector<8x4xf32>, vector<8x4xf32> -> vector<8x4xf32>
    %66 = vector.extract_strided_slice %12 {offsets = [8, 0], sizes = [4, 32], strides = [1, 1]} : vector<32x32xf32> to vector<4x32xf32>
    %cst_25 = arith.constant dense<0.000000e+00> : vector<8x32xf32>
    %67 = tpu.matmul %65, %66, %cst_25 {dimension_numbers = #tpu.dot_dimension_numbers<[1], [0], [0], [1], [0, 0, 1, 1], [], []>} : vector<8x4xf32>, vector<4x32xf32>, vector<8x32xf32> -> vector<8x32xf32>
    %68 = arith.addf %50, %67 : vector<8x32xf32>
    %69 = vector.extract_strided_slice %9 {offsets = [0, 12], sizes = [8, 4], strides = [1, 1]} : vector<8x32xf32> to vector<8x4xf32>
    %70 = vector.extract_strided_slice %10 {offsets = [0, 12], sizes = [8, 4], strides = [1, 1]} : vector<8x32xf32> to vector<8x4xf32>
    %71 = vector.extract_strided_slice %11 {offsets = [0, 12], sizes = [8, 4], strides = [1, 1]} : vector<8x32xf32> to vector<8x4xf32>
    %cst_26 = arith.constant dense<0.000000e+00> : vector<8x8xf32>
    %72 = tpu.matmul %69, %70, %cst_26 {dimension_numbers = #tpu.dot_dimension_numbers<[1], [1], [0], [0], [0, 0, 1, 0], [], []>} : vector<8x4xf32>, vector<8x4xf32>, vector<8x8xf32> -> vector<8x8xf32>
    %cst_27 = arith.constant dense<0xFF800000> : vector<8xf32>
    %73 = vector.multi_reduction <maximumf>, %72, %cst_27 [1] : vector<8x8xf32> to vector<8xf32>
    %74 = vector.shape_cast %73 : vector<8xf32> to vector<8x1xf32>
    %75 = vector.broadcast %74 : vector<8x1xf32> to vector<8x8xf32>
    %76 = arith.subf %72, %75 : vector<8x8xf32>
    %77 = math.exp %76 : vector<8x8xf32>
    %cst_28 = arith.constant dense<0.000000e+00> : vector<8xf32>
    %78 = vector.multi_reduction <add>, %77, %cst_28 [1] : vector<8x8xf32> to vector<8xf32>
    %79 = vector.shape_cast %78 : vector<8xf32> to vector<8x1xf32>
    %80 = tpu.reciprocal %79 {approx = true} : vector<8x1xf32> -> vector<8x1xf32>
    %81 = vector.broadcast %80 : vector<8x1xf32> to vector<8x8xf32>
    %82 = arith.mulf %77, %81 : vector<8x8xf32>
    %cst_29 = arith.constant dense<0.000000e+00> : vector<8x4xf32>
    %83 = tpu.matmul %82, %71, %cst_29 {dimension_numbers = #tpu.dot_dimension_numbers<[1], [0], [0], [1], [0, 0, 1, 1], [], []>} : vector<8x8xf32>, vector<8x4xf32>, vector<8x4xf32> -> vector<8x4xf32>
    %84 = vector.extract_strided_slice %12 {offsets = [12, 0], sizes = [4, 32], strides = [1, 1]} : vector<32x32xf32> to vector<4x32xf32>
    %cst_30 = arith.constant dense<0.000000e+00> : vector<8x32xf32>
    %85 = tpu.matmul %83, %84, %cst_30 {dimension_numbers = #tpu.dot_dimension_numbers<[1], [0], [0], [1], [0, 0, 1, 1], [], []>} : vector<8x4xf32>, vector<4x32xf32>, vector<8x32xf32> -> vector<8x32xf32>
    %86 = arith.addf %68, %85 : vector<8x32xf32>
    %87 = vector.extract_strided_slice %9 {offsets = [0, 16], sizes = [8, 4], strides = [1, 1]} : vector<8x32xf32> to vector<8x4xf32>
    %88 = vector.extract_strided_slice %10 {offsets = [0, 16], sizes = [8, 4], strides = [1, 1]} : vector<8x32xf32> to vector<8x4xf32>
    %89 = vector.extract_strided_slice %11 {offsets = [0, 16], sizes = [8, 4], strides = [1, 1]} : vector<8x32xf32> to vector<8x4xf32>
    %cst_31 = arith.constant dense<0.000000e+00> : vector<8x8xf32>
    %90 = tpu.matmul %87, %88, %cst_31 {dimension_numbers = #tpu.dot_dimension_numbers<[1], [1], [0], [0], [0, 0, 1, 0], [], []>} : vector<8x4xf32>, vector<8x4xf32>, vector<8x8xf32> -> vector<8x8xf32>
    %cst_32 = arith.constant dense<0xFF800000> : vector<8xf32>
    %91 = vector.multi_reduction <maximumf>, %90, %cst_32 [1] : vector<8x8xf32> to vector<8xf32>
    %92 = vector.shape_cast %91 : vector<8xf32> to vector<8x1xf32>
    %93 = vector.broadcast %92 : vector<8x1xf32> to vector<8x8xf32>
    %94 = arith.subf %90, %93 : vector<8x8xf32>
    %95 = math.exp %94 : vector<8x8xf32>
    %cst_33 = arith.constant dense<0.000000e+00> : vector<8xf32>
    %96 = vector.multi_reduction <add>, %95, %cst_33 [1] : vector<8x8xf32> to vector<8xf32>
    %97 = vector.shape_cast %96 : vector<8xf32> to vector<8x1xf32>
    %98 = tpu.reciprocal %97 {approx = true} : vector<8x1xf32> -> vector<8x1xf32>
    %99 = vector.broadcast %98 : vector<8x1xf32> to vector<8x8xf32>
    %100 = arith.mulf %95, %99 : vector<8x8xf32>
    %cst_34 = arith.constant dense<0.000000e+00> : vector<8x4xf32>
    %101 = tpu.matmul %100, %89, %cst_34 {dimension_numbers = #tpu.dot_dimension_numbers<[1], [0], [0], [1], [0, 0, 1, 1], [], []>} : vector<8x8xf32>, vector<8x4xf32>, vector<8x4xf32> -> vector<8x4xf32>
    %102 = vector.extract_strided_slice %12 {offsets = [16, 0], sizes = [4, 32], strides = [1, 1]} : vector<32x32xf32> to vector<4x32xf32>
    %cst_35 = arith.constant dense<0.000000e+00> : vector<8x32xf32>
    %103 = tpu.matmul %101, %102, %cst_35 {dimension_numbers = #tpu.dot_dimension_numbers<[1], [0], [0], [1], [0, 0, 1, 1], [], []>} : vector<8x4xf32>, vector<4x32xf32>, vector<8x32xf32> -> vector<8x32xf32>
    %104 = arith.addf %86, %103 : vector<8x32xf32>
    %105 = vector.extract_strided_slice %9 {offsets = [0, 20], sizes = [8, 4], strides = [1, 1]} : vector<8x32xf32> to vector<8x4xf32>
    %106 = vector.extract_strided_slice %10 {offsets = [0, 20], sizes = [8, 4], strides = [1, 1]} : vector<8x32xf32> to vector<8x4xf32>
    %107 = vector.extract_strided_slice %11 {offsets = [0, 20], sizes = [8, 4], strides = [1, 1]} : vector<8x32xf32> to vector<8x4xf32>
    %cst_36 = arith.constant dense<0.000000e+00> : vector<8x8xf32>
    %108 = tpu.matmul %105, %106, %cst_36 {dimension_numbers = #tpu.dot_dimension_numbers<[1], [1], [0], [0], [0, 0, 1, 0], [], []>} : vector<8x4xf32>, vector<8x4xf32>, vector<8x8xf32> -> vector<8x8xf32>
    %cst_37 = arith.constant dense<0xFF800000> : vector<8xf32>
    %109 = vector.multi_reduction <maximumf>, %108, %cst_37 [1] : vector<8x8xf32> to vector<8xf32>
    %110 = vector.shape_cast %109 : vector<8xf32> to vector<8x1xf32>
    %111 = vector.broadcast %110 : vector<8x1xf32> to vector<8x8xf32>
    %112 = arith.subf %108, %111 : vector<8x8xf32>
    %113 = math.exp %112 : vector<8x8xf32>
    %cst_38 = arith.constant dense<0.000000e+00> : vector<8xf32>
    %114 = vector.multi_reduction <add>, %113, %cst_38 [1] : vector<8x8xf32> to vector<8xf32>
    %115 = vector.shape_cast %114 : vector<8xf32> to vector<8x1xf32>
    %116 = tpu.reciprocal %115 {approx = true} : vector<8x1xf32> -> vector<8x1xf32>
    %117 = vector.broadcast %116 : vector<8x1xf32> to vector<8x8xf32>
    %118 = arith.mulf %113, %117 : vector<8x8xf32>
    %cst_39 = arith.constant dense<0.000000e+00> : vector<8x4xf32>
    %119 = tpu.matmul %118, %107, %cst_39 {dimension_numbers = #tpu.dot_dimension_numbers<[1], [0], [0], [1], [0, 0, 1, 1], [], []>} : vector<8x8xf32>, vector<8x4xf32>, vector<8x4xf32> -> vector<8x4xf32>
    %120 = vector.extract_strided_slice %12 {offsets = [20, 0], sizes = [4, 32], strides = [1, 1]} : vector<32x32xf32> to vector<4x32xf32>
    %cst_40 = arith.constant dense<0.000000e+00> : vector<8x32xf32>
    %121 = tpu.matmul %119, %120, %cst_40 {dimension_numbers = #tpu.dot_dimension_numbers<[1], [0], [0], [1], [0, 0, 1, 1], [], []>} : vector<8x4xf32>, vector<4x32xf32>, vector<8x32xf32> -> vector<8x32xf32>
    %122 = arith.addf %104, %121 : vector<8x32xf32>
    %123 = vector.extract_strided_slice %9 {offsets = [0, 24], sizes = [8, 4], strides = [1, 1]} : vector<8x32xf32> to vector<8x4xf32>
    %124 = vector.extract_strided_slice %10 {offsets = [0, 24], sizes = [8, 4], strides = [1, 1]} : vector<8x32xf32> to vector<8x4xf32>
    %125 = vector.extract_strided_slice %11 {offsets = [0, 24], sizes = [8, 4], strides = [1, 1]} : vector<8x32xf32> to vector<8x4xf32>
    %cst_41 = arith.constant dense<0.000000e+00> : vector<8x8xf32>
    %126 = tpu.matmul %123, %124, %cst_41 {dimension_numbers = #tpu.dot_dimension_numbers<[1], [1], [0], [0], [0, 0, 1, 0], [], []>} : vector<8x4xf32>, vector<8x4xf32>, vector<8x8xf32> -> vector<8x8xf32>
    %cst_42 = arith.constant dense<0xFF800000> : vector<8xf32>
    %127 = vector.multi_reduction <maximumf>, %126, %cst_42 [1] : vector<8x8xf32> to vector<8xf32>
    %128 = vector.shape_cast %127 : vector<8xf32> to vector<8x1xf32>
    %129 = vector.broadcast %128 : vector<8x1xf32> to vector<8x8xf32>
    %130 = arith.subf %126, %129 : vector<8x8xf32>
    %131 = math.exp %130 : vector<8x8xf32>
    %cst_43 = arith.constant dense<0.000000e+00> : vector<8xf32>
    %132 = vector.multi_reduction <add>, %131, %cst_43 [1] : vector<8x8xf32> to vector<8xf32>
    %133 = vector.shape_cast %132 : vector<8xf32> to vector<8x1xf32>
    %134 = tpu.reciprocal %133 {approx = true} : vector<8x1xf32> -> vector<8x1xf32>
    %135 = vector.broadcast %134 : vector<8x1xf32> to vector<8x8xf32>
    %136 = arith.mulf %131, %135 : vector<8x8xf32>
    %cst_44 = arith.constant dense<0.000000e+00> : vector<8x4xf32>
    %137 = tpu.matmul %136, %125, %cst_44 {dimension_numbers = #tpu.dot_dimension_numbers<[1], [0], [0], [1], [0, 0, 1, 1], [], []>} : vector<8x8xf32>, vector<8x4xf32>, vector<8x4xf32> -> vector<8x4xf32>
    %138 = vector.extract_strided_slice %12 {offsets = [24, 0], sizes = [4, 32], strides = [1, 1]} : vector<32x32xf32> to vector<4x32xf32>
    %cst_45 = arith.constant dense<0.000000e+00> : vector<8x32xf32>
    %139 = tpu.matmul %137, %138, %cst_45 {dimension_numbers = #tpu.dot_dimension_numbers<[1], [0], [0], [1], [0, 0, 1, 1], [], []>} : vector<8x4xf32>, vector<4x32xf32>, vector<8x32xf32> -> vector<8x32xf32>
    %140 = arith.addf %122, %139 : vector<8x32xf32>
    %141 = vector.extract_strided_slice %9 {offsets = [0, 28], sizes = [8, 4], strides = [1, 1]} : vector<8x32xf32> to vector<8x4xf32>
    %142 = vector.extract_strided_slice %10 {offsets = [0, 28], sizes = [8, 4], strides = [1, 1]} : vector<8x32xf32> to vector<8x4xf32>
    %143 = vector.extract_strided_slice %11 {offsets = [0, 28], sizes = [8, 4], strides = [1, 1]} : vector<8x32xf32> to vector<8x4xf32>
    %cst_46 = arith.constant dense<0.000000e+00> : vector<8x8xf32>
    %144 = tpu.matmul %141, %142, %cst_46 {dimension_numbers = #tpu.dot_dimension_numbers<[1], [1], [0], [0], [0, 0, 1, 0], [], []>} : vector<8x4xf32>, vector<8x4xf32>, vector<8x8xf32> -> vector<8x8xf32>
    %cst_47 = arith.constant dense<0xFF800000> : vector<8xf32>
    %145 = vector.multi_reduction <maximumf>, %144, %cst_47 [1] : vector<8x8xf32> to vector<8xf32>
    %146 = vector.shape_cast %145 : vector<8xf32> to vector<8x1xf32>
    %147 = vector.broadcast %146 : vector<8x1xf32> to vector<8x8xf32>
    %148 = arith.subf %144, %147 : vector<8x8xf32>
    %149 = math.exp %148 : vector<8x8xf32>
    %cst_48 = arith.constant dense<0.000000e+00> : vector<8xf32>
    %150 = vector.multi_reduction <add>, %149, %cst_48 [1] : vector<8x8xf32> to vector<8xf32>
    %151 = vector.shape_cast %150 : vector<8xf32> to vector<8x1xf32>
    %152 = tpu.reciprocal %151 {approx = true} : vector<8x1xf32> -> vector<8x1xf32>
    %153 = vector.broadcast %152 : vector<8x1xf32> to vector<8x8xf32>
    %154 = arith.mulf %149, %153 : vector<8x8xf32>
    %cst_49 = arith.constant dense<0.000000e+00> : vector<8x4xf32>
    %155 = tpu.matmul %154, %143, %cst_49 {dimension_numbers = #tpu.dot_dimension_numbers<[1], [0], [0], [1], [0, 0, 1, 1], [], []>} : vector<8x8xf32>, vector<8x4xf32>, vector<8x4xf32> -> vector<8x4xf32>
    %156 = vector.extract_strided_slice %12 {offsets = [28, 0], sizes = [4, 32], strides = [1, 1]} : vector<32x32xf32> to vector<4x32xf32>
    %cst_50 = arith.constant dense<0.000000e+00> : vector<8x32xf32>
    %157 = tpu.matmul %155, %156, %cst_50 {dimension_numbers = #tpu.dot_dimension_numbers<[1], [0], [0], [1], [0, 0, 1, 1], [], []>} : vector<8x4xf32>, vector<4x32xf32>, vector<8x32xf32> -> vector<8x32xf32>
    %158 = arith.addf %140, %157 : vector<8x32xf32>
    %159 = arith.addf %1, %158 : vector<8x32xf32>
    %cst_51 = arith.constant dense<0.000000e+00> : vector<8xf32>
    %160 = vector.multi_reduction <add>, %159, %cst_51 [1] : vector<8x32xf32> to vector<8xf32>
    %161 = vector.shape_cast %160 : vector<8xf32> to vector<8x1xf32>
    %cst_52 = arith.constant 3.200000e+01 : f32
    %162 = vector.broadcast %cst_52 : f32 to vector<8x1xf32>
    %163 = arith.divf %161, %162 : vector<8x1xf32>
    %164 = vector.broadcast %163 : vector<8x1xf32> to vector<8x32xf32>
    %165 = arith.subf %159, %164 : vector<8x32xf32>
    %166 = arith.mulf %165, %165 : vector<8x32xf32>
    %cst_53 = arith.constant dense<0.000000e+00> : vector<8xf32>
    %167 = vector.multi_reduction <add>, %166, %cst_53 [1] : vector<8x32xf32> to vector<8xf32>
    %168 = vector.shape_cast %167 : vector<8xf32> to vector<8x1xf32>
    %cst_54 = arith.constant 3.200000e+01 : f32
    %169 = vector.broadcast %cst_54 : f32 to vector<8x1xf32>
    %170 = arith.divf %168, %169 : vector<8x1xf32>
    %cst_55 = arith.constant 9.99999974E-6 : f32
    %171 = vector.broadcast %cst_55 : f32 to vector<8x1xf32>
    %172 = arith.addf %170, %171 : vector<8x1xf32>
    %173 = math.rsqrt %172 : vector<8x1xf32>
    %174 = vector.broadcast %173 : vector<8x1xf32> to vector<8x32xf32>
    %175 = arith.mulf %165, %174 : vector<8x32xf32>
    %c0_56 = arith.constant 0 : index
    %c0_57 = arith.constant 0 : index
    %176 = vector.load %arg6[%c0_56, %c0_57] : memref<1x32xf32, #tpu.memory_space<vmem>>, vector<1x32xf32>
    %177 = vector.broadcast %176 : vector<1x32xf32> to vector<8x32xf32>
    %178 = arith.mulf %175, %177 : vector<8x32xf32>
    %c0_58 = arith.constant 0 : index
    %c0_59 = arith.constant 0 : index
    %179 = vector.load %arg7[%c0_58, %c0_59] : memref<1x32xf32, #tpu.memory_space<vmem>>, vector<1x32xf32>
    %180 = vector.broadcast %179 : vector<1x32xf32> to vector<8x32xf32>
    %181 = arith.addf %178, %180 : vector<8x32xf32>
    %c0_60 = arith.constant 0 : index
    %c0_61 = arith.constant 0 : index
    %182 = vector.load %arg8[%c0_60, %c0_61] : memref<32x2048xf32, #tpu.memory_space<vmem>>, vector<32x2048xf32>
    %cst_62 = arith.constant dense<0.000000e+00> : vector<8x2048xf32>
    %183 = tpu.matmul %181, %182, %cst_62 {dimension_numbers = #tpu.dot_dimension_numbers<[1], [0], [0], [1], [0, 0, 1, 1], [], []>} : vector<8x32xf32>, vector<32x2048xf32>, vector<8x2048xf32> -> vector<8x2048xf32>
    %c0_63 = arith.constant 0 : index
    %c0_64 = arith.constant 0 : index
    %184 = vector.load %arg9[%c0_63, %c0_64] : memref<1x2048xf32, #tpu.memory_space<vmem>>, vector<1x2048xf32>
    %185 = vector.broadcast %184 : vector<1x2048xf32> to vector<8x2048xf32>
    %186 = arith.addf %183, %185 : vector<8x2048xf32>
    %cst_65 = arith.constant 0.000000e+00 : f32
    %187 = vector.broadcast %cst_65 : f32 to vector<8x2048xf32>
    %188 = arith.maximumf %186, %187 : vector<8x2048xf32>
    %c0_66 = arith.constant 0 : index
    %c0_67 = arith.constant 0 : index
    %189 = vector.load %arg10[%c0_66, %c0_67] : memref<2048x32xf32, #tpu.memory_space<vmem>>, vector<2048x32xf32>
    %cst_68 = arith.constant dense<0.000000e+00> : vector<8x32xf32>
    %190 = tpu.matmul %188, %189, %cst_68 {dimension_numbers = #tpu.dot_dimension_numbers<[1], [0], [0], [1], [0, 0, 1, 1], [], []>} : vector<8x2048xf32>, vector<2048x32xf32>, vector<8x32xf32> -> vector<8x32xf32>
    %c0_69 = arith.constant 0 : index
    %c0_70 = arith.constant 0 : index
    %191 = vector.load %arg11[%c0_69, %c0_70] : memref<1x32xf32, #tpu.memory_space<vmem>>, vector<1x32xf32>
    %192 = vector.broadcast %191 : vector<1x32xf32> to vector<8x32xf32>
    %193 = arith.addf %190, %192 : vector<8x32xf32>
    %194 = arith.addf %181, %193 : vector<8x32xf32>
    %cst_71 = arith.constant dense<0.000000e+00> : vector<8xf32>
    %195 = vector.multi_reduction <add>, %194, %cst_71 [1] : vector<8x32xf32> to vector<8xf32>
    %196 = vector.shape_cast %195 : vector<8xf32> to vector<8x1xf32>
    %cst_72 = arith.constant 3.200000e+01 : f32
    %197 = vector.broadcast %cst_72 : f32 to vector<8x1xf32>
    %198 = arith.divf %196, %197 : vector<8x1xf32>
    %199 = vector.broadcast %198 : vector<8x1xf32> to vector<8x32xf32>
    %200 = arith.subf %194, %199 : vector<8x32xf32>
    %201 = arith.mulf %200, %200 : vector<8x32xf32>
    %cst_73 = arith.constant dense<0.000000e+00> : vector<8xf32>
    %202 = vector.multi_reduction <add>, %201, %cst_73 [1] : vector<8x32xf32> to vector<8xf32>
    %203 = vector.shape_cast %202 : vector<8xf32> to vector<8x1xf32>
    %cst_74 = arith.constant 3.200000e+01 : f32
    %204 = vector.broadcast %cst_74 : f32 to vector<8x1xf32>
    %205 = arith.divf %203, %204 : vector<8x1xf32>
    %cst_75 = arith.constant 9.99999974E-6 : f32
    %206 = vector.broadcast %cst_75 : f32 to vector<8x1xf32>
    %207 = arith.addf %205, %206 : vector<8x1xf32>
    %208 = math.rsqrt %207 : vector<8x1xf32>
    %209 = vector.broadcast %208 : vector<8x1xf32> to vector<8x32xf32>
    %210 = arith.mulf %200, %209 : vector<8x32xf32>
    %c0_76 = arith.constant 0 : index
    %c0_77 = arith.constant 0 : index
    %211 = vector.load %arg12[%c0_76, %c0_77] : memref<1x32xf32, #tpu.memory_space<vmem>>, vector<1x32xf32>
    %212 = vector.broadcast %211 : vector<1x32xf32> to vector<8x32xf32>
    %213 = arith.mulf %210, %212 : vector<8x32xf32>
    %c0_78 = arith.constant 0 : index
    %c0_79 = arith.constant 0 : index
    %214 = vector.load %arg13[%c0_78, %c0_79] : memref<1x32xf32, #tpu.memory_space<vmem>>, vector<1x32xf32>
    %215 = vector.broadcast %214 : vector<1x32xf32> to vector<8x32xf32>
    %216 = arith.addf %213, %215 : vector<8x32xf32>
    %c0_80 = arith.constant 0 : index
    %c0_81 = arith.constant 0 : index
    %c0_82 = arith.constant 0 : index
    %217 = vector.load %arg14[%c0_80, %c0_81, %c0_82] : memref<1x8x32xf32, #tpu.memory_space<vmem>>, vector<1x8x32xf32>
    %218 = vector.shape_cast %217 : vector<1x8x32xf32> to vector<8x32xf32>
    %219 = vector.shape_cast %216 : vector<8x32xf32> to vector<1x8x32xf32>
    tpu.vector_store %arg14[%c0_80, %c0_81, %c0_82], %219 {strides = array<i32>} : memref<1x8x32xf32, #tpu.memory_space<vmem>>, vector<1x8x32xf32>,
    return
  }
  func.func @transform_0(%arg0: i32) -> (i32, i32, i32) {
    %c0_i32 = arith.constant 0 : i32
    %c0_i32_0 = arith.constant 0 : i32
    %c0_i32_1 = arith.constant 0 : i32
    return %arg0, %c0_i32, %c0_i32_0 : i32, i32, i32
  }
  func.func @transform_1(%arg0: i32) -> (i32, i32) {
    %c0_i32 = arith.constant 0 : i32
    %c0_i32_0 = arith.constant 0 : i32
    %c0_i32_1 = arith.constant 0 : i32
    return %c0_i32, %c0_i32_0 : i32, i32
  }
  func.func @transform_2(%arg0: i32) -> (i32, i32) {
    %c0_i32 = arith.constant 0 : i32
    %c0_i32_0 = arith.constant 0 : i32
    %c0_i32_1 = arith.constant 0 : i32
    return %c0_i32, %c0_i32_0 : i32, i32
  }
  func.func @transform_3(%arg0: i32) -> (i32, i32) {
    %c0_i32 = arith.constant 0 : i32
    %c0_i32_0 = arith.constant 0 : i32
    %c0_i32_1 = arith.constant 0 : i32
    return %c0_i32, %c0_i32_0 : i32, i32
  }
  func.func @transform_4(%arg0: i32) -> (i32, i32) {
    %c0_i32 = arith.constant 0 : i32
    %c0_i32_0 = arith.constant 0 : i32
    %c0_i32_1 = arith.constant 0 : i32
    return %c0_i32, %c0_i32_0 : i32, i32
  }
  func.func @transform_5(%arg0: i32) -> (i32, i32) {
    %c0_i32 = arith.constant 0 : i32
    %c0_i32_0 = arith.constant 0 : i32
    %c0_i32_1 = arith.constant 0 : i32
    return %c0_i32, %c0_i32_0 : i32, i32
  }
  func.func @transform_6(%arg0: i32) -> (i32, i32) {
    %c0_i32 = arith.constant 0 : i32
    %c0_i32_0 = arith.constant 0 : i32
    %c0_i32_1 = arith.constant 0 : i32
    return %c0_i32, %c0_i32_0 : i32, i32
  }
  func.func @transform_7(%arg0: i32) -> (i32, i32) {
    %c0_i32 = arith.constant 0 : i32
    %c0_i32_0 = arith.constant 0 : i32
    %c0_i32_1 = arith.constant 0 : i32
    return %c0_i32, %c0_i32_0 : i32, i32
  }
  func.func @transform_8(%arg0: i32) -> (i32, i32) {
    %c0_i32 = arith.constant 0 : i32
    %c0_i32_0 = arith.constant 0 : i32
    %c0_i32_1 = arith.constant 0 : i32
    return %c0_i32, %c0_i32_0 : i32, i32
  }
  func.func @transform_9(%arg0: i32) -> (i32, i32) {
    %c0_i32 = arith.constant 0 : i32
    %c0_i32_0 = arith.constant 0 : i32
    %c0_i32_1 = arith.constant 0 : i32
    return %c0_i32, %c0_i32_0 : i32, i32
  }
  func.func @transform_10(%arg0: i32) -> (i32, i32) {
    %c0_i32 = arith.constant 0 : i32
    %c0_i32_0 = arith.constant 0 : i32
    %c0_i32_1 = arith.constant 0 : i32
    return %c0_i32, %c0_i32_0 : i32, i32
  }
  func.func @transform_11(%arg0: i32) -> (i32, i32) {
    %c0_i32 = arith.constant 0 : i32
    %c0_i32_0 = arith.constant 0 : i32
    %c0_i32_1 = arith.constant 0 : i32
    return %c0_i32, %c0_i32_0 : i32, i32
  }
  func.func @transform_12(%arg0: i32) -> (i32, i32) {
    %c0_i32 = arith.constant 0 : i32
    %c0_i32_0 = arith.constant 0 : i32
    %c0_i32_1 = arith.constant 0 : i32
    return %c0_i32, %c0_i32_0 : i32, i32
  }
  func.func @transform_13(%arg0: i32) -> (i32, i32, i32) {
    %c0_i32 = arith.constant 0 : i32
    %c0_i32_0 = arith.constant 0 : i32
    %c0_i32_1 = arith.constant 0 : i32
    return %arg0, %c0_i32, %c0_i32_0 : i32, i32, i32
  }
}

module attributes {stable_mosaic.version = 11 : i64} {
  func.func @_embedding_kernel(%arg0: memref<16x1xi32, #tpu.memory_space<vmem>>, %arg1: memref<32x32xf32, #tpu.memory_space<vmem>>, %arg2: memref<16x32xf32, #tpu.memory_space<vmem>>) attributes {dimension_semantics = [], scalar_prefetch = 0 : i64, scratch_operands = 0 : i64, tpu.core_type = #tpu.core_type<tc>} {
    %c0 = arith.constant 0 : index
    %c0_0 = arith.constant 0 : index
    %0 = vector.load %arg0[%c0, %c0_0] : memref<16x1xi32, #tpu.memory_space<vmem>>, vector<16x1xi32>
    %1 = tpu.iota {dimensions = array<i32: 1>} : vector<16x32xi32>
    %2 = vector.broadcast %0 : vector<16x1xi32> to vector<16x32xi32>
    %3 = arith.cmpi eq, %1, %2 : vector<16x32xi32>
    %4 = arith.extui %3 : vector<16x32xi1> to vector<16x32xi32>
    %5 = arith.sitofp %4 : vector<16x32xi32> to vector<16x32xf32>
    %c0_1 = arith.constant 0 : index
    %c0_2 = arith.constant 0 : index
    %6 = vector.load %arg1[%c0_1, %c0_2] : memref<32x32xf32, #tpu.memory_space<vmem>>, vector<32x32xf32>
    %cst = arith.constant dense<0.000000e+00> : vector<16x32xf32>
    %7 = tpu.matmul %5, %6, %cst {dimension_numbers = #tpu.dot_dimension_numbers<[1], [0], [0], [1], [0, 0, 1, 1], [], []>} : vector<16x32xf32>, vector<32x32xf32>, vector<16x32xf32> -> vector<16x32xf32>
    %c0_3 = arith.constant 0 : index
    %c0_4 = arith.constant 0 : index
    %8 = vector.load %arg2[%c0_3, %c0_4] : memref<16x32xf32, #tpu.memory_space<vmem>>, vector<16x32xf32>
    tpu.vector_store %arg2[%c0_3, %c0_4], %7 {strides = array<i32>} : memref<16x32xf32, #tpu.memory_space<vmem>>, vector<16x32xf32>,
    return
  }
}

</mosaic_0001>

<bundles_post_ra>
// kernel: protein_transformer.4
= control target key start
LH: loop header
LB: loop body
LE: loop exit
PB: predicated region body
PF: predicated region fallthrough
CT: control target
= control target key end

     0   :  { %7 = vsyncpa [#allocation3], 0  ;;  %s288_s0 = inlined_call_operand.vmem [shape: s32[16,1], index: 0, kind: input, shape index: {}]   ;;  %s289_s1 = inlined_call_operand.hbm [shape: f32[32,32], index: 1, kind: input, shape index: {}]   ;;  %s290_s2 = inlined_call_operand.hbm [shape: f32[16,32], index: 2, kind: output, shape index: {}]  }
   0x1   :  { %8 = vsyncpa [#allocation4], 0  ;;  %s231_s9 = smov [#allocation2]   ;;  %s183_s13 = scalar_lea.hbm %s289_s1, 512 }
   0x2   :  { %s16_s10 = sshll.u32 %s231_s9, 4  ;;  %p184_p0 = scmp.ne.s32.totalorder %s289_s1, %s183_s13  ;;  %s17_s10 = int_to_ptr.vmem [resolvable:$true] %s16_s10 }
   0x3   :  { %p187_p1 = scmp.lt.u32.totalorder %s183_s13, %s289_s1 }
   0x5   :  { %p189_p2 = pnand %p187_p1, %p184_p0 }
   0x7   :  { %192 = shalt.err (!%p189_p2)
}
   0x8   :  { %s193_s18 = scalar_lea.vmem %s17_s10, 512  ;;  %p198_p4 = scmp.lt.s32.totalorder %s17_s10, %s17_s10 }
   0x9   :  { %p194_p3 = scmp.ne.s32.totalorder %s17_s10, %s193_s18  ;;  %p199_p5 = scmp.lt.s32.totalorder %s193_s18, %s193_s18 }
   0xb   :  { %p200_p6 = por %p199_p5, %p198_p4 }
   0xd   :  { %p201_p7 = pnand %p200_p6, %p194_p3 }
   0xf   :  { %204 = shalt.err (!%p201_p7)
}
  0x10   :  { %s232_s19 = smov 128   ;;  %s233_s20 = smov 8  }
  0x11   :  { %22 = dma.hbm_to_vmem [thread:$0]  %s289_s1, 512, %s17_s10, [#allocation3], %s232_s19, %s232_s19, %s233_s20  }
  0x12   :  { %227 = dma.done.wait [#allocation3], 512  }
  0x13   :  { %228 = vsyncadd [#allocation3], 4294966784  ;;  %v234_v0 = vmov 0   ;;  %v26_v1 = vld [vmem:[%s288_s0] sm:$0xff]  ;;  %v43_v3 = vld [vmem:[#allocation2 + $0x8] sm:$0xff]  ;;  %v28_v9 = vlaneseq  ;;  %vm46_vm0 = vcmask 261120  }
  0x14   :  { %182 = vset.pattern.permute.xlu0 %v234_v0  ;;  %v42_v2 = vld [vmem:[#allocation2] sm:$0xff]  ;;  %v44_v4 = vld [vmem:[#allocation2 + $0x10] sm:$0xff]  ;;  %v45_v5 = vld [vmem:[#allocation2 + $0x18] sm:$0xff]  ;;  %v235_v12 = vmov 0.0  }
  0x15   :  { %31 = vperm.xlu0 %182, %v26_v1   ;;  %v27_v6 = vld [vmem:[%s288_s0 + $0x8] sm:$0xff]  ;;  %v168_v7 = vpack.c.bf16 %v43_v3, %v42_v2  ;;  %v172_v8 = vpack.c.bf16 %v45_v5, %v44_v4  ;;  %v29_v10 = vand.u32 127, %v28_v9  ;;  %s236_s0 = smov [#allocation5]  }
  0x16   :  { %s135_s1 = sshll.u32 %s236_s0, 4  ;;  %s136_s1 = int_to_ptr.vmem [resolvable:$true] %s135_s1 }
  0x17   :  { %169 = vmatprep.subr.bf16.mxu0 %v168_v7  ;;  %s205_s27 = scalar_lea.vmem %s136_s1, 256  ;;  %p210_p9 = scmp.lt.s32.totalorder %s136_s1, %s136_s1 }
  0x18   :  { %171 = vmatpush3.bf16.msra.mxu0 %v168_v7  ;;  %p206_p8 = scmp.ne.s32.totalorder %s136_s1, %s205_s27  ;;  %p211_p10 = scmp.lt.s32.totalorder %s205_s27, %s205_s27 }
  0x19   :  { %34 = vperm.xlu0 %182, %v27_v6   ;;  %173 = vmatprep.subr.bf16.mxu0 %v172_v8 }
  0x1a   :  { %p212_p11 = por %p211_p10, %p210_p9 }
  0x1c   :  { %175 = vmatpush3.bf16.msra.mxu0 %v172_v8  ;;  %p213_p12 = pnand %p212_p11, %p206_p8 }
  0x94   :  { %v32_v11 = vpop.permute.xlu0 %31 }
  0x95   :  { %vm36_vm1 = vcmp.eq.s32.totalorder %v29_v10, %v32_v11 }
  0x96   :  { %v147_v13 = vsel %vm36_vm1, 1.0, %v235_v12 }
  0x97   :  { %165 = vmatprep.mubr.msk.f32.mxu0 %vm46_vm0, %v147_v13 }
  0x98   :  { %v35_v14 = vpop.permute.xlu0 %34 }
  0x99   :  { %vm37_vm2 = vcmp.eq.s32.totalorder %v29_v10, %v35_v14 }
  0x9a   :  { %v148_v15 = vsel %vm37_vm2, 1.0, %v235_v12 }
  0x9b   :  { %166 = vmatmul.mubr.msk.f32.vlgmr.msra.gmra.mrb[0].mxu0 %vm46_vm0, %v148_v15 }
 0x16e   :  { %v167_v16 = vpop.f32.mrb[0].mxu0 }
 0x16f   :  { %129 = vst.msk [vmem:[#allocation5 + $0x8] sm:$0xff] %vm46_vm0, %v167_v16  ;;  %v119_v17 = vpop.f32.mrb[1].mxu0 }
 0x170   :  { %128 = vst.msk [vmem:[#allocation5] sm:$0xff] %vm46_vm0, %v119_v17 }
 0x171   :  { %216 = shalt.err (!%p213_p12)
}
 0x172   :  { %s217_s30 = scalar_lea.hbm %s290_s2, 256 }
 0x173   :  { %p218_p13 = scmp.ne.s32.totalorder %s290_s2, %s217_s30  ;;  %p221_p0 = scmp.lt.u32.totalorder %s217_s30, %s290_s2 }
 0x175   :  { %p223_p1 = pnand %p221_p0, %p218_p13 }
 0x177   :  { %226 = shalt.err (!%p223_p1)
}
 0x178   :  { %141 = dma.vmem_to_hbm [thread:$0]  %s136_s1, 256, %s290_s2, [#allocation4], %s232_s19, %s232_s19, %s233_s20  }
 0x179   :  { %229 = dma.done.wait [#allocation4], 256  }
 0x17a   :  { %230 = vsyncadd [#allocation4], 4294967040 }
 0x17b   :  { %145 = vsyncpa [#allocation3], 1 }
 0x17c   :  { %146 = vsyncpa [#allocation4], 1 }

// kernel: protein_transformer.5
= control target key start
LH: loop header
LB: loop body
LE: loop exit
PB: predicated region body
PF: predicated region fallthrough
CT: control target
= control target key end

     0   :  { %s6893_s0 = inlined_call_operand.hbm [shape: f32[2,8,32], index: 0, kind: input, shape index: {}]   ;;  %s6894_s1 = inlined_call_operand.hbm [shape: f32[32,96], index: 1, kind: input, shape index: {}]   ;;  %s6895_s2 = inlined_call_operand.hbm [shape: f32[1,96], index: 2, kind: input, shape index: {}]   ;;  %s6896_s3 = inlined_call_operand.hbm [shape: f32[32,32], index: 3, kind: input, shape index: {}]   ;;  %s6897_s4 = inlined_call_operand.hbm [shape: f32[1,32], index: 4, kind: input, shape index: {}]   ;;  %s6898_s5 = inlined_call_operand.hbm [shape: f32[1,32], index: 5, kind: input, shape index: {}]   ;;  %s6899_s6 = inlined_call_operand.hbm [shape: f32[1,32], index: 6, kind: input, shape index: {}]   ;;  %s6900_s7 = inlined_call_operand.hbm [shape: f32[32,2048], index: 7, kind: input, shape index: {}]   ;;  %s6901_s8 = inlined_call_operand.hbm [shape: f32[1,2048], index: 8, kind: input, shape index: {}]   ;;  %s6902_s9 = inlined_call_operand.hbm [shape: f32[2048,32], index: 9, kind: input, shape index: {}]   ;;  %s6903_s10 = inlined_call_operand.hbm [shape: f32[1,32], index: 10, kind: input, shape index: {}]   ;;  %s6904_s11 = inlined_call_operand.hbm [shape: f32[1,32], index: 11, kind: input, shape index: {}]   ;;  %s6905_s12 = inlined_call_operand.hbm [shape: f32[1,32], index: 12, kind: input, shape index: {}]   ;;  %s6906_s13 = inlined_call_operand.hbm [shape: f32[2,8,32], index: 13, kind: output, shape index: {}]  }
   0x1   :  { %6917 = sst [smem:[#allocation35_spill]] %s6893_s0 }
   0x2   :  { %6918 = sst [smem:[#allocation36_spill]] %s6894_s1 }
   0x3   :  { %6919 = sst [smem:[#allocation37_spill]] %s6895_s2 }
   0x4   :  { %6920 = sst [smem:[#allocation38_spill]] %s6906_s13 }
   0x5   :  { %18 = vsyncpa [#allocation3], 0 }
   0x6   :  { %20 = vsyncpa [#allocation3 + $0x1], 0 }
   0x7   :  { %21 = vsyncpa [#allocation6], 0 }
   0x8   :  { %22 = vsyncpa [#allocation9], 0 }
   0x9   :  { %23 = vsyncpa [#allocation12], 0 }
   0xa   :  { %24 = vsyncpa [#allocation15], 0 }
   0xb   :  { %25 = vsyncpa [#allocation18], 0 }
   0xc   :  { %26 = vsyncpa [#allocation21], 0 }
   0xd   :  { %27 = vsyncpa [#allocation4], 0 }
   0xe   :  { %29 = vsyncpa [#allocation4 + $0x1], 0  ;;  %s6154_s25 = smov 0   ;;  %s6156_s26 = smov 0  }
   0xf   :  { %s6158_s27 = smov 0   ;;  %s6160_s28 = smov 0  }
  0x10 LB: > { %6921 = sst [smem:[#allocation32_spill]] %s6027_s25  ;;  %s6041_s29 = smov [#allocation5]   ;;  %s6039_s28 = sphi %s6160_s28, %s6962_s28   ;;  %s6035_s27 = sphi %s6158_s27, %s6961_s27   ;;  %s6031_s26 = sphi %s6156_s26, %s6960_s26   ;;  %s6027_s25 = sphi %s6154_s25, %s6959_s25  }
  0x11   : > { %s356_s30 = sshll.u32 %s6041_s29, 4  ;;  %s6175_s14 = sadd.s32 4294967295, %s6039_s28   ;;  %s6180_s30 = int_to_ptr.vmem [resolvable:$true] %s356_s30 }
  0x12   : > { %6922 = sst [smem:[#allocation33_spill]] %s6175_s14  ;;  %p4470_p0 = scmp.ge.s32.totalorder %s6039_s28, 1 }
  0x13   : > { %p6913_p1 = scmp.eq.s32.totalorder %s6175_s14, 0  ;;  %p344_p2 = scmp.lt.s32.totalorder %s6039_s28, 3 }
  0x14   : > { %s6042_s16 = smov [#allocation8]   ;;  %s6043_s19 = smov [#allocation11]  }
  0x15   : > { %p6182_p3 = pnand %p4470_p0, %p344_p2  ;;  %s380_s17 = sshll.u32 %s6042_s16, 4  ;;  %s6195_s17 = int_to_ptr.vmem [resolvable:$true] %s380_s17 }
  0x16   : > { %s405_s20 = sshll.u32 %s6043_s19, 4  ;;  %s6926_s1 = sld [smem:[#allocation36_spill]]  ;;  %s6197_s20 = int_to_ptr.vmem [resolvable:$true] %s405_s20 }
  0x17   : > { %s6923_s15 = scalar_select %p6182_p3, 1, 0 }
  0x18   : > { %p5403_p5 = pneg %p6182_p3 }
  0x19   : > { %6924 = sst [smem:[#allocation34_spill]] %s6923_s15 }
  0x1a   : > { %p6191_p6 = pnand %p5403_p5, %p6913_p1 }
  0x1c   : > { %s5583_s23 = scalar_lea.hbm %s6926_s1, 512  ;;  %p6207_p8 = pneg %p6191_p6 }
  0x1d   : > { %p5584_p7 = scmp.ne.s32.totalorder %s6926_s1, %s5583_s23  ;;  %p5590_p11 = scmp.lt.u32.totalorder %s5583_s23, %s6926_s1 }
  0x1f   : > { %p5586_p9 = pnand %p6207_p8, %p5584_p7 }
  0x21   : > { %p5587_p10 = pneg %p5586_p9 }
  0x23   : > { %p5592_p12 = pnand %p5590_p11, %p5587_p10 }
  0x25   : > { %5595 = shalt.err (!%p5592_p12)
}
  0x26   : > { %s5596_s21 = scalar_lea.vmem %s6180_s30, 512  ;;  %p5604_p5 = scmp.lt.s32.totalorder %s6180_s30, %s6180_s30 }
  0x27   : > { %p5597_p13 = scmp.ne.s32.totalorder %s6180_s30, %s5596_s21  ;;  %p5605_p4 = scmp.lt.s32.totalorder %s5596_s21, %s5596_s21 }
  0x29   : > { %p5599_p0 = pnand %p5597_p13, %p6207_p8  ;;  %p5606_p7 = por %p5605_p4, %p5604_p5 }
  0x2b   : > { %p5600_p2 = pneg %p5599_p0 }
  0x2d   : > { %p5607_p9 = pnand %p5606_p7, %p5600_p2 }
  0x2f   : > { %5610 = shalt.err (!%p5607_p9)
}
  0x30   : > { %s6044_s22 = smov 128   ;;  %s6915_s13 = smov 8  }
  0x31   : > { %5406 = dma.hbm_to_vmem [thread:$0]  (!%p6191_p6), %s6926_s1, 512, %s6180_s30, [#allocation6], %s6044_s22, %s6044_s22, %s6915_s13  }
  0x32   : > { %s5611_s21 = scalar_lea.hbm %s6896_s3, 512 }
  0x33   : > { %p5612_p4 = scmp.ne.s32.totalorder %s6896_s3, %s5611_s21  ;;  %p5618_p12 = scmp.lt.u32.totalorder %s5611_s21, %s6896_s3 }
  0x35   : > { %p5614_p10 = pnand %p5612_p4, %p6207_p8 }
  0x37   : > { %p5615_p11 = pneg %p5614_p10 }
  0x39   : > { %p5620_p13 = pnand %p5618_p12, %p5615_p11 }
  0x3b   : > { %5623 = shalt.err (!%p5620_p13)
}
  0x3c   : > { %s5624_s30 = scalar_lea.vmem %s6195_s17, 512  ;;  %p5632_p7 = scmp.lt.s32.totalorder %s6195_s17, %s6195_s17 }
  0x3d   : > { %p5625_p0 = scmp.ne.s32.totalorder %s6195_s17, %s5624_s30  ;;  %p5633_p9 = scmp.lt.s32.totalorder %s5624_s30, %s5624_s30 }
  0x3f   : > { %p5627_p2 = pnand %p5625_p0, %p6207_p8  ;;  %p5634_p4 = por %p5633_p9, %p5632_p7 }
  0x41   : > { %p5628_p5 = pneg %p5627_p2 }
  0x43   : > { %p5635_p10 = pnand %p5634_p4, %p5628_p5 }
  0x45   : > { %5638 = shalt.err (!%p5635_p10)
}
  0x46   : > { %5412 = dma.hbm_to_vmem [thread:$0]  (!%p6191_p6), %s6896_s3, 512, %s6195_s17, [#allocation9], %s6044_s22, %s6044_s22, %s6915_s13  }
  0x47   : > { %s5639_s23 = scalar_lea.hbm %s6898_s5, 16 }
  0x48   : > { %p5640_p11 = scmp.ne.s32.totalorder %s6898_s5, %s5639_s23  ;;  %p5646_p0 = scmp.lt.u32.totalorder %s5639_s23, %s6898_s5 }
  0x4a   : > { %p5642_p12 = pnand %p5640_p11, %p6207_p8 }
  0x4c   : > { %p5643_p13 = pneg %p5642_p12 }
  0x4e   : > { %p5648_p2 = pnand %p5646_p0, %p5643_p13 }
  0x50   : > { %5651 = shalt.err (!%p5648_p2)
}
  0x51   : > { %s5652_s17 = scalar_lea.vmem %s6197_s20, 16  ;;  %s5659_s30 = scalar_lea.vmem %s6197_s20, 32 }
  0x52   : > { %p5653_p5 = scmp.ne.s32.totalorder %s6197_s20, %s5652_s17  ;;  %p5660_p4 = scmp.lt.s32.totalorder %s6197_s20, %s6197_s20 }
  0x53   : > { %p5661_p10 = scmp.lt.s32.totalorder %s5659_s30, %s5652_s17 }
  0x54   : > { %p5655_p7 = pnand %p5653_p5, %p6207_p8 }
  0x55   : > { %p5662_p11 = por %p5661_p10, %p5660_p4 }
  0x56   : > { %p5656_p9 = pneg %p5655_p7 }
  0x58   : > { %p5663_p12 = pnand %p5662_p11, %p5656_p9 }
  0x5a   : > { %5666 = shalt.err (!%p5663_p12)
}
  0x5b   : > { %5418 = dma.hbm_to_vmem [thread:$0]  (!%p6191_p6), %s6898_s5, 16, %s6197_s20, [#allocation12]  }
  0x5c   : > { %s6046_s14 = smov [#allocation14]   ;;  %s5667_s29 = scalar_lea.hbm %s6900_s7, 8192 }
  0x5d   : > { %s426_s15 = sshll.u32 %s6046_s14, 4  ;;  %p5668_p13 = scmp.ne.s32.totalorder %s6900_s7, %s5667_s29  ;;  %s427_s15 = int_to_ptr.vmem [resolvable:$true] %s426_s15 }
  0x5e   : > { %p5674_p5 = scmp.lt.u32.totalorder %s5667_s29, %s6900_s7 }
  0x5f   : > { %p5670_p0 = pnand %p5668_p13, %p6207_p8 }
  0x61   : > { %p5671_p2 = pneg %p5670_p0 }
  0x63   : > { %p5676_p7 = pnand %p5674_p5, %p5671_p2 }
  0x65   : > { %5679 = shalt.err (!%p5676_p7)
}
  0x66   : > { %s5680_s20 = scalar_lea.vmem %s427_s15, 8192  ;;  %p5688_p11 = scmp.lt.s32.totalorder %s427_s15, %s427_s15 }
  0x67   : > { %p5681_p9 = scmp.ne.s32.totalorder %s427_s15, %s5680_s20  ;;  %p5689_p12 = scmp.lt.s32.totalorder %s5680_s20, %s5680_s20 }
  0x69   : > { %p5683_p4 = pnand %p5681_p9, %p6207_p8  ;;  %p5690_p1 = por %p5689_p12, %p5688_p11 }
  0x6b   : > { %p5684_p10 = pneg %p5683_p4 }
  0x6d   : > { %p5691_p3 = pnand %p5690_p1, %p5684_p10 }
  0x6f   : > { %5694 = shalt.err (!%p5691_p3)
}
  0x70   : > { %s6047_s0 = smov 2048   ;;  %s6048_s23 = smov [#allocation17]  }
  0x71   : > { %5424 = dma.hbm_to_vmem [thread:$0]  (!%p6191_p6), %s6900_s7, 8192, %s427_s15, [#allocation15], %s6047_s0, %s6047_s0, %s6044_s22  }
  0x72   : > { %s450_s24 = sshll.u32 %s6048_s23, 4  ;;  %s6049_s29 = smov [#allocation20]   ;;  %s451_s24 = int_to_ptr.vmem [resolvable:$true] %s450_s24 }
  0x73   : > { %s475_s19 = sshll.u32 %s6049_s29, 4  ;;  %s5695_s30 = scalar_lea.hbm %s6902_s9, 32768  ;;  %s476_s19 = int_to_ptr.vmem [resolvable:$true] %s475_s19 }
  0x74   : > { %p5696_p1 = scmp.ne.s32.totalorder %s6902_s9, %s5695_s30  ;;  %p5702_p0 = scmp.lt.u32.totalorder %s5695_s30, %s6902_s9 }
  0x76   : > { %p5698_p3 = pnand %p5696_p1, %p6207_p8 }
  0x78   : > { %p5699_p13 = pneg %p5698_p3 }
  0x7a   : > { %p5704_p2 = pnand %p5702_p0, %p5699_p13 }
  0x7c   : > { %5707 = shalt.err (!%p5704_p2)
}
  0x7d   : > { %s5708_s15 = scalar_lea.vmem %s451_s24, 32768  ;;  %p5716_p4 = scmp.lt.s32.totalorder %s451_s24, %s451_s24 }
  0x7e   : > { %p5709_p5 = scmp.ne.s32.totalorder %s451_s24, %s5708_s15  ;;  %p5717_p10 = scmp.lt.s32.totalorder %s5708_s15, %s5708_s15 }
  0x80   : > { %p5711_p7 = pnand %p5709_p5, %p6207_p8  ;;  %p5718_p11 = por %p5717_p10, %p5716_p4 }
  0x82   : > { %p5712_p9 = pneg %p5711_p7 }
  0x84   : > { %p5719_p12 = pnand %p5718_p11, %p5712_p9 }
  0x86   : > { %5722 = shalt.err (!%p5719_p12)
}
  0x87   : > { %s6928_s13 = smov 8   ;;  %s5723_s29 = scalar_lea.hbm %s6904_s11, 16 }
  0x88   : > { %5430 = dma.hbm_to_vmem [thread:$0]  (!%p6191_p6), %s6902_s9, 32768, %s451_s24, [#allocation18], %s6044_s22, %s6044_s22, %s6928_s13  }
  0x89   : > { %p5724_p1 = scmp.ne.s32.totalorder %s6904_s11, %s5723_s29  ;;  %p5730_p0 = scmp.lt.u32.totalorder %s5723_s29, %s6904_s11 }
  0x8b   : > { %p5726_p3 = pnand %p5724_p1, %p6207_p8 }
  0x8d   : > { %p5727_p13 = pneg %p5726_p3 }
  0x8f   : > { %p5732_p2 = pnand %p5730_p0, %p5727_p13 }
  0x91   : > { %5735 = shalt.err (!%p5732_p2)
}
  0x92   : > { %s5736_s25 = scalar_lea.vmem %s476_s19, 16  ;;  %s5743_s22 = scalar_lea.vmem %s476_s19, 32 }
  0x93   : > { %p5737_p5 = scmp.ne.s32.totalorder %s476_s19, %s5736_s25  ;;  %p5744_p4 = scmp.lt.s32.totalorder %s476_s19, %s476_s19 }
  0x94   : > { %p5745_p10 = scmp.lt.s32.totalorder %s5743_s22, %s5736_s25 }
  0x95   : > { %p5739_p7 = pnand %p5737_p5, %p6207_p8 }
  0x96   : > { %p5746_p11 = por %p5745_p10, %p5744_p4 }
  0x97   : > { %p5740_p9 = pneg %p5739_p7 }
  0x99   : > { %p5747_p12 = pnand %p5746_p11, %p5740_p9 }
  0x9b   : > { %5750 = shalt.err (!%p5747_p12)
}
  0x9c   : > { %5436 = dma.hbm_to_vmem [thread:$0]  (!%p6191_p6), %s6904_s11, 16, %s476_s19, [#allocation21]  }
  0x9d   : > { %s6050_s13 = smov [#allocation7]   ;;  %s6051_s0 = smov [#allocation10]  }
  0x9e   : > { %s370_s1 = sshll.u32 %s6050_s13, 4  ;;  %s394_s14 = sshll.u32 %s6051_s0, 4  ;;  %s371_s1 = int_to_ptr.vmem [resolvable:$true] %s370_s1  ;;  %s395_s14 = int_to_ptr.vmem [resolvable:$true] %s394_s14 }
  0x9f   : > { %s6929_s2 = sld [smem:[#allocation37_spill]] }
  0xa5   : > { %s5751_s21 = scalar_lea.hbm %s6929_s2, 16 }
  0xa6   : > { %p5752_p1 = scmp.ne.s32.totalorder %s6929_s2, %s5751_s21  ;;  %p5758_p0 = scmp.lt.u32.totalorder %s5751_s21, %s6929_s2 }
  0xa8   : > { %p5754_p3 = pnand %p5752_p1, %p6207_p8 }
  0xaa   : > { %p5755_p13 = pneg %p5754_p3 }
  0xac   : > { %p5760_p2 = pnand %p5758_p0, %p5755_p13 }
  0xae   : > { %5763 = shalt.err (!%p5760_p2)
}
  0xaf   : > { %s5764_s19 = scalar_lea.vmem %s371_s1, 16  ;;  %s5771_s22 = scalar_lea.vmem %s371_s1, 32 }
  0xb0   : > { %p5765_p5 = scmp.ne.s32.totalorder %s371_s1, %s5764_s19  ;;  %p5772_p4 = scmp.lt.s32.totalorder %s371_s1, %s371_s1 }
  0xb1   : > { %p5773_p10 = scmp.lt.s32.totalorder %s5771_s22, %s5764_s19 }
  0xb2   : > { %p5767_p7 = pnand %p5765_p5, %p6207_p8 }
  0xb3   : > { %p5774_p11 = por %p5773_p10, %p5772_p4 }
  0xb4   : > { %p5768_p9 = pneg %p5767_p7 }
  0xb6   : > { %p5775_p12 = pnand %p5774_p11, %p5768_p9 }
  0xb8   : > { %5778 = shalt.err (!%p5775_p12)
}
  0xb9   : > { %5409 = dma.hbm_to_vmem [thread:$0]  (!%p6191_p6), %s6929_s2, 16, %s371_s1, [#allocation6]  }
  0xba   : > { %s5779_s23 = scalar_lea.hbm %s6897_s4, 16 }
  0xbb   : > { %p5780_p1 = scmp.ne.s32.totalorder %s6897_s4, %s5779_s23  ;;  %p5786_p0 = scmp.lt.u32.totalorder %s5779_s23, %s6897_s4 }
  0xbd   : > { %p5782_p3 = pnand %p5780_p1, %p6207_p8 }
  0xbf   : > { %p5783_p13 = pneg %p5782_p3 }
  0xc1   : > { %p5788_p2 = pnand %p5786_p0, %p5783_p13 }
  0xc3   : > { %5791 = shalt.err (!%p5788_p2)
}
  0xc4   : > { %s5792_s20 = scalar_lea.vmem %s395_s14, 16  ;;  %s5799_s1 = scalar_lea.vmem %s395_s14, 32 }
  0xc5   : > { %p5793_p5 = scmp.ne.s32.totalorder %s395_s14, %s5792_s20  ;;  %p5800_p4 = scmp.lt.s32.totalorder %s395_s14, %s395_s14 }
  0xc6   : > { %p5801_p10 = scmp.lt.s32.totalorder %s5799_s1, %s5792_s20 }
  0xc7   : > { %p5795_p7 = pnand %p5793_p5, %p6207_p8 }
  0xc8   : > { %p5802_p11 = por %p5801_p10, %p5800_p4 }
  0xc9   : > { %p5796_p9 = pneg %p5795_p7 }
  0xcb   : > { %p5803_p12 = pnand %p5802_p11, %p5796_p9 }
  0xcd   : > { %5806 = shalt.err (!%p5803_p12)
}
  0xce   : > { %5415 = dma.hbm_to_vmem [thread:$0]  (!%p6191_p6), %s6897_s4, 16, %s395_s14, [#allocation9]  }
  0xcf   : > { %s6052_s22 = smov [#allocation13]   ;;  %s6053_s15 = smov [#allocation16]  }
  0xd0   : > { %s416_s24 = sshll.u32 %s6052_s22, 4  ;;  %s440_s13 = sshll.u32 %s6053_s15, 4  ;;  %s417_s24 = int_to_ptr.vmem [resolvable:$true] %s416_s24  ;;  %s441_s13 = int_to_ptr.vmem [resolvable:$true] %s440_s13 }
  0xd1   : > { %s5807_s29 = scalar_lea.hbm %s6899_s6, 16 }
  0xd2   : > { %p5808_p1 = scmp.ne.s32.totalorder %s6899_s6, %s5807_s29  ;;  %p5814_p0 = scmp.lt.u32.totalorder %s5807_s29, %s6899_s6 }
  0xd4   : > { %p5810_p3 = pnand %p5808_p1, %p6207_p8 }
  0xd6   : > { %p5811_p13 = pneg %p5810_p3 }
  0xd8   : > { %p5816_p2 = pnand %p5814_p0, %p5811_p13 }
  0xda   : > { %5819 = shalt.err (!%p5816_p2)
}
  0xdb   : > { %s5820_s14 = scalar_lea.vmem %s417_s24, 16  ;;  %s5827_s1 = scalar_lea.vmem %s417_s24, 32 }
  0xdc   : > { %p5821_p5 = scmp.ne.s32.totalorder %s417_s24, %s5820_s14  ;;  %p5828_p4 = scmp.lt.s32.totalorder %s417_s24, %s417_s24 }
  0xdd   : > { %p5829_p10 = scmp.lt.s32.totalorder %s5827_s1, %s5820_s14 }
  0xde   : > { %p5823_p7 = pnand %p5821_p5, %p6207_p8 }
  0xdf   : > { %p5830_p11 = por %p5829_p10, %p5828_p4 }
  0xe0   : > { %p5824_p9 = pneg %p5823_p7 }
  0xe2   : > { %p5831_p12 = pnand %p5830_p11, %p5824_p9 }
  0xe4   : > { %5834 = shalt.err (!%p5831_p12)
}
  0xe5   : > { %5421 = dma.hbm_to_vmem [thread:$0]  (!%p6191_p6), %s6899_s6, 16, %s417_s24, [#allocation12]  }
  0xe6   : > { %s5835_s0 = scalar_lea.hbm %s6901_s8, 256 }
  0xe7   : > { %p5836_p1 = scmp.ne.s32.totalorder %s6901_s8, %s5835_s0  ;;  %p5842_p0 = scmp.lt.u32.totalorder %s5835_s0, %s6901_s8 }
  0xe9   : > { %p5838_p3 = pnand %p5836_p1, %p6207_p8 }
  0xeb   : > { %p5839_p13 = pneg %p5838_p3 }
  0xed   : > { %p5844_p2 = pnand %p5842_p0, %p5839_p13 }
  0xef   : > { %5847 = shalt.err (!%p5844_p2)
}
  0xf0   : > { %s5848_s30 = scalar_lea.vmem %s441_s13, 256  ;;  %p5856_p4 = scmp.lt.s32.totalorder %s441_s13, %s441_s13 }
  0xf1   : > { %p5849_p5 = scmp.ne.s32.totalorder %s441_s13, %s5848_s30  ;;  %p5857_p10 = scmp.lt.s32.totalorder %s5848_s30, %s5848_s30 }
  0xf3   : > { %p5851_p7 = pnand %p5849_p5, %p6207_p8  ;;  %p5858_p11 = por %p5857_p10, %p5856_p4 }
  0xf5   : > { %p5852_p9 = pneg %p5851_p7 }
  0xf7   : > { %p5859_p12 = pnand %p5858_p11, %p5852_p9 }
  0xf9   : > { %5862 = shalt.err (!%p5859_p12)
}
  0xfa   : > { %5427 = dma.hbm_to_vmem [thread:$0]  (!%p6191_p6), %s6901_s8, 256, %s441_s13, [#allocation15]  }
  0xfb   : > { %s6054_s14 = smov [#allocation19]   ;;  %s6055_s25 = smov [#allocation22]  }
  0xfc   : > { %s464_s1 = sshll.u32 %s6054_s14, 4  ;;  %s486_s19 = sshll.u32 %s6055_s25, 4  ;;  %s465_s1 = int_to_ptr.vmem [resolvable:$true] %s464_s1  ;;  %s487_s19 = int_to_ptr.vmem [resolvable:$true] %s486_s19 }
  0xfd   : > { %s5863_s0 = scalar_lea.hbm %s6903_s10, 16 }
  0xfe   : > { %p5864_p1 = scmp.ne.s32.totalorder %s6903_s10, %s5863_s0  ;;  %p5870_p0 = scmp.lt.u32.totalorder %s5863_s0, %s6903_s10 }
 0x100   : > { %p5866_p3 = pnand %p5864_p1, %p6207_p8 }
 0x102   : > { %p5867_p13 = pneg %p5866_p3 }
 0x104   : > { %p5872_p2 = pnand %p5870_p0, %p5867_p13 }
 0x106   : > { %5875 = shalt.err (!%p5872_p2)
}
 0x107   : > { %s5876_s13 = scalar_lea.vmem %s465_s1, 16  ;;  %s5883_s30 = scalar_lea.vmem %s465_s1, 32 }
 0x108   : > { %p5877_p5 = scmp.ne.s32.totalorder %s465_s1, %s5876_s13  ;;  %p5884_p4 = scmp.lt.s32.totalorder %s465_s1, %s465_s1 }
 0x109   : > { %p5885_p10 = scmp.lt.s32.totalorder %s5883_s30, %s5876_s13 }
 0x10a   : > { %p5879_p7 = pnand %p5877_p5, %p6207_p8 }
 0x10b   : > { %p5886_p11 = por %p5885_p10, %p5884_p4 }
 0x10c   : > { %p5880_p9 = pneg %p5879_p7 }
 0x10e   : > { %p5887_p12 = pnand %p5886_p11, %p5880_p9 }
 0x110   : > { %5890 = shalt.err (!%p5887_p12)
}
 0x111   : > { %5433 = dma.hbm_to_vmem [thread:$0]  (!%p6191_p6), %s6903_s10, 16, %s465_s1, [#allocation18]  }
 0x112   : > { %s5891_s22 = scalar_lea.hbm %s6905_s12, 16 }
 0x113   : > { %p5892_p1 = scmp.ne.s32.totalorder %s6905_s12, %s5891_s22  ;;  %p5898_p0 = scmp.lt.u32.totalorder %s5891_s22, %s6905_s12 }
 0x115   : > { %p5894_p3 = pnand %p5892_p1, %p6207_p8 }
 0x117   : > { %p5895_p13 = pneg %p5894_p3 }
 0x119   : > { %p5900_p2 = pnand %p5898_p0, %p5895_p13 }
 0x11b   : > { %5903 = shalt.err (!%p5900_p2)
}
 0x11c   : > { %s5904_s21 = scalar_lea.vmem %s487_s19, 16  ;;  %s5911_s1 = scalar_lea.vmem %s487_s19, 32 }
 0x11d   : > { %p5905_p5 = scmp.ne.s32.totalorder %s487_s19, %s5904_s21  ;;  %p5912_p4 = scmp.lt.s32.totalorder %s487_s19, %s487_s19 }
 0x11e   : > { %p5913_p10 = scmp.lt.s32.totalorder %s5911_s1, %s5904_s21 }
 0x11f   : > { %p5907_p7 = pnand %p5905_p5, %p6207_p8 }
 0x120   : > { %p5914_p11 = por %p5913_p10, %p5912_p4 }
 0x121   : > { %p5908_p9 = pneg %p5907_p7 }
 0x123   : > { %p5915_p12 = pnand %p5914_p11, %p5908_p9 }
 0x125   : > { %5918 = shalt.err (!%p5915_p12)
}
 0x126   : > { %s6930_s16 = sld [smem:[#allocation32_spill]]  ;;  %s6931_s30 = sld [smem:[#allocation33_spill]] }
 0x127   : > { %5439 = dma.hbm_to_vmem [thread:$0]  (!%p6191_p6), %s6905_s12, 16, %s487_s19, [#allocation21]  }
 0x128   : > { %s4469_s24 = sadd.s32 4294967294, %s6039_s28   ;;  %s6449_s18 = sadd.s32 1, %s6039_s28  }
 0x129   : > { %s42_s20 = sadd.s32 1, %s6035_s27  ;;  %s39_s14 = ssub.s32 %s6039_s28, %s6449_s18 }
 0x12a   : > { %p49_p8 = scmp.ne.s32.totalorder %s6035_s27, %s6031_s26  ;;  %p40_p1 = scmp.eq.s32.totalorder %s39_s14, 0 }
 0x12b   : > { %p50_p3 = scmp.eq.s32.totalorder %s6039_s28, 0  ;;  %p337_p9 = scmp.eq.s32.totalorder %s4469_s24, 1 }
 0x12c   : > { %p55_p13 = scmp.ne.s32.totalorder %s6031_s26, %s6930_s16  ;;  %p331_p0 = scmp.eq.s32.totalorder %s6931_s30, 1 }
 0x12d   : > { %s6461_s25 = scalar_select %p40_p1, %s6035_s27, %s42_s20  }
 0x12e   : > { %p51_p2 = por %p50_p3, %p49_p8  ;;  %p6932_p5 = scmp.eq.s32.totalorder %s6931_s30, 0 }
 0x12f   : > { %p6469_p6 = por %p331_p0, %p49_p8  ;;  %p5460_p4 = scmp.lt.s32.totalorder %s6039_s28, 2 }
 0x130   : > { %p6465_p7 = por %p6932_p5, %p55_p13  ;;  %s497_s15 = sand.u32 1, %s6035_s27  }
 0x131   : > { %s6934_s19 = scalar_select %p6469_p6, 1, 0 }
 0x132   : > { %p6475_p10 = por %p337_p9, %p55_p13  ;;  %s4484_s23 = sshll.u32 %s497_s15, 3 }
 0x133   : > { %s4485_s29 = sshll.u32 %s6039_s28, 7  ;;  %s6936_s17 = sld [smem:[#allocation35_spill]] }
 0x134   : > { %s6935_s0 = scalar_select %p6475_p10, 1, 0 }
 0x135   : > { %s501_s16 = scalar_lea.vmem [#allocation2], %s4484_s23  ;;  %p6485_p11 = pnand %p5460_p4, %p51_p2 }
 0x136   : > { %s508_s30 = sshll.u32 %s501_s16, 4  ;;  %s498_s20 = scalar_lea.sflag [#allocation3], %s497_s15  ;;  %s6489_s30 = int_to_ptr.vmem [resolvable:$true] %s508_s30 }
 0x137   : > { %p5921_p8 = pneg %p6485_p11 }
 0x139   : > { %s6483_s13 = scalar_lea.hbm %s6936_s17, %s4485_s29  ;;  %s5924_s21 = scalar_lea.hbm %s6936_s17, 256 }
 0x13a   : > { %s5919_s14 = scalar_lea.hbm %s6483_s13, 128  ;;  %p5925_p13 = scmp.lt.u32.totalorder %s6483_s13, %s6936_s17 }
 0x13b   : > { %p5920_p12 = scmp.ne.s32.totalorder %s6483_s13, %s5919_s14  ;;  %p5926_p0 = scmp.lt.u32.totalorder %s5924_s21, %s5919_s14 }
 0x13c   : > { %p5928_p5 = scmp.lt.u32.totalorder %s5919_s14, %s6483_s13 }
 0x13d   : > { %p5922_p1 = pnand %p5921_p8, %p5920_p12  ;;  %p5927_p2 = por %p5926_p0, %p5925_p13 }
 0x13f   : > { %p5923_p3 = pneg %p5922_p1  ;;  %p5929_p9 = por %p5928_p5, %p5927_p2 }
 0x141   : > { %p5930_p4 = pnand %p5929_p9, %p5923_p3 }
 0x143   : > { %5933 = shalt.err (!%p5930_p4)
}
 0x144   : > { %s5934_s15 = scalar_lea.vmem %s6489_s30, 128  ;;  %s6056_s29 = smov [#allocation2]  }
 0x145   : > { %p5935_p12 = scmp.ne.s32.totalorder %s6489_s30, %s5934_s15  ;;  %s5939_s23 = sshll.u32 %s6056_s29, 4  ;;  %s5940_s23 = int_to_ptr.vmem [resolvable:$false] %s5939_s23 }
 0x146   : > { %s5941_s1 = scalar_lea.vmem %s5940_s23, 256  ;;  %p5942_p6 = scmp.lt.s32.totalorder %s6489_s30, %s5940_s23 }
 0x147   : > { %p5937_p1 = pnand %p5935_p12, %p5921_p8  ;;  %p5943_p13 = scmp.lt.s32.totalorder %s5941_s1, %s5934_s15 }
 0x149   : > { %p5938_p10 = pneg %p5937_p1  ;;  %p5944_p0 = por %p5943_p13, %p5942_p6 }
 0x14b   : > { %p5945_p2 = pnand %p5944_p0, %p5938_p10 }
 0x14d   : > { %5948 = shalt.err (!%p5945_p2)
}
 0x14e   : > { %5443 = dma.hbm_to_vmem [thread:$0]  (!%p6485_p11), %s6483_s13, 128, %s6489_s30, %s498_s20  }
 0x14f   : > { %s6938_s14 = sld [smem:[#allocation34_spill]] }
 0x155   : > { %p6939_p3 = scmp.ne.s32.totalorder %s6938_s14, 0 }
 0x156   : > { %s6519_s21 = sand.u32 (!%p6939_p3), 1, %s6031_s26  }
 0x157   : > { %517 = sbr.rel (%p6939_p3) target bundleno = 6558 (0x199e), region = 72  ;;  %s4487_s16 = sshll.u32 (!%p6939_p3), %s6519_s21, 3 }
 0x158   : > { %s520_s15 = scalar_lea.sflag (!%p6939_p3), [#allocation3], %s6519_s21  ;;  %s6525_s29 = scalar_lea.vmem (!%p6939_p3), [#allocation2], %s4487_s16 }
 0x15e   : > { %5994 = dma.done.wait (%p6465_p7), %s520_s15, 128  }
 0x15f   : > { %5996 = vsyncadd (%p6465_p7), %s520_s15, 4294967168  ;;  %s6940_s13 = sld [smem:[#allocation33_spill]] }
 0x165   : > { %p6941_p6 = scmp.eq.s32.totalorder %s6940_s13, 0 }
 0x167   : > { %5998 = dma.done.wait (%p6941_p6), [#allocation6], 528   ;;  %p6942_p10 = pmov %p6941_p6 }
 0x168   : > { %p6943_p11 = pmov %p6941_p6 }
 0x169   : > { %6000 = vsyncadd (%p6942_p10), [#allocation6], 4294966768 }
 0x16a   : > { %6002 = dma.done.wait (%p6943_p11), [#allocation9], 528   ;;  %p6944_p8 = pmov %p6941_p6 }
 0x16b   : > { %p6945_p5 = pmov %p6941_p6 }
 0x16c   : > { %6004 = vsyncadd (%p6944_p8), [#allocation9], 4294966768 }
 0x16d   : > { %6006 = dma.done.wait (%p6945_p5), [#allocation12], 32   ;;  %p6946_p9 = pmov %p6945_p5 }
 0x16e   : > { %p6947_p7 = pmov %p6945_p5 }
 0x16f   : > { %6008 = vsyncadd (%p6946_p9), [#allocation12], 4294967264 }
 0x170   : > { %6010 = dma.done.wait (%p6947_p7), [#allocation15], 8448   ;;  %p6948_p4 = pmov %p6945_p5 }
 0x172   : > { %6012 = vsyncadd (%p6948_p4), [#allocation15], 4294958848  ;;  %p6949_p12 = pmov %p6948_p4 }
 0x173   : > { %p6950_p1 = pmov %p6948_p4 }
 0x174   : > { %6014 = dma.done.wait (%p6949_p12), [#allocation18], 32784  }
 0x175   : > { %6016 = vsyncadd (%p6950_p1), [#allocation18], 4294934512  ;;  %p6951_p13 = pmov %p6950_p1 }
 0x176   : > { %p6952_p0 = pmov %p6950_p1 }
 0x177   : > { %6018 = dma.done.wait (%p6951_p13), [#allocation21], 32  }
 0x178   : > { %6020 = vsyncadd (%p6952_p0), [#allocation21], 4294967264  ;;  %v6057_v0 = vmov 0.0|0.0   ;;  %vm6058_vm0 = vmmov 0   ;;  %v6059_v1 = vmov 0.0   ;;  %v615_v2 = vld [vmem:[#allocation5] sm:$0xff] }
 0x179   : > { %5025 = vmatprep.subr.bf16.mxu0 %v6057_v0  ;;  %4902 = vmatprep.mubr.msk.f32.mxu0 %vm6058_vm0, %v6059_v1  ;;  %v616_v3 = vld [vmem:[#allocation5 + $0x8] sm:$0xff]  ;;  %v617_v4 = vld [vmem:[#allocation5 + $0x10] sm:$0xff]  ;;  %v618_v6 = vld [vmem:[#allocation5 + $0x18] sm:$0xff]  ;;  %vm626_vm1 = vcmask 261120   ;;  %s6060_s22 = smov 64   ;;  %s6061_s30 = smov 96  }
 0x17a   : > { %4905 = vmatprep.subr.mxu1 %v6059_v1  ;;  %4907 = vmatprep.mubr.msk.f32.mxu1 %vm6058_vm0, %v6059_v1  ;;  %v5026_v5 = vpack.c.bf16 %v616_v3, %v615_v2  ;;  %v5029_v7 = vpack.c.bf16 %v618_v6, %v617_v4  ;;  %v6561_v8 = vld [vmem:[%s6525_s29] sm:$0xff]  ;;  %v4501_v9 = vld [vmem:[#allocation7] ss:$0 sm:$0xff]  ;;  %s6062_s24 = smov 92   ;;  %vm709_vm2 = vcmask 31744   ;;  %vm785_vm3 = vcmask 64512  }
 0x17b   : > { %s6063_s20 = smov 60   ;;  %s6064_s23 = smov 88   ;;  %v701_v24 = vld [vmem:[#allocation8] sm:$0xff]  ;;  %vm876_vm4 = vcmask 1043456   ;;  %v702_v60 = vld [vmem:[#allocation8 + $0x8] sm:$0xff] }
 0x17c   : > { %5027 = vmatpush3.bf16.msra.mxu0 %v5026_v5  ;;  %s6065_s1 = smov 124   ;;  %v1122_v29 = vrot.slane %v701_v24, 4  ;;  %s6066_s14 = smov 120   ;;  %v4508_v61 = vld [vmem:[#allocation10] ss:$0 sm:$0xff] }
 0x17d   : > { %5028 = vmatprep.subr.bf16.mxu0 %v6057_v0  ;;  %s6067_s15 = smov 56   ;;  %s6068_s29 = smov 84  }
 0x17e   : > { %p6954_p3 = scmp.ne.s32.totalorder %s6934_s19, 0 }
 0x180   : > { %5030 = vmatpush3.bf16.msra.mxu0 %v5029_v7  ;;  %v1606_v7 = vrot.slane %v702_v60, 4 }
 0x181   : > { %4915 = vmatprep.subr.mxu0 %v6059_v1 }
 0x183   : > { %4903 = vmatmul.mubr.msk.f32.vlgmr.msra.gmra.mrb[0].mxu0 %vm626_vm1, %v6561_v8 }
 0x184   : > { %4917 = vmatprep.mubr.msk.f32.mxu0 %vm6058_vm0, %v6059_v1  ;;  %4916 = vmatpush3.msk.msra.mxu0 %vm876_vm4, %v701_v24 }
 0x185   : > { %4925 = vmatprep.subr.mxu0 %v6059_v1 }
 0x256   : > { %v696_v10 = vpop.f32.mrb[0].mxu0 }
 0x257   : > { %v6568_v11 = vadd.f32 %v4501_v9, %v696_v10  ;;  %v4904_v12 = vpop.f32.mrb[1].mxu0 }
 0x259   : > { %797 = vrot.lane.b32.xlu1 %v6568_v11, %s6060_s22  ;;  %707 = vrot.lane.b32.xlu0 %v6568_v11, %s6061_s30  ;;  %v6575_v14 = vmul.f32 0.5, %v6568_v11  ;;  %s6069_s22 = smov 116   ;;  %s6070_s30 = smov 52  }
 0x25d   : > { %959 = vrot.lane.b32.xlu1 %v6568_v11, %s6062_s24  ;;  %s6071_s24 = smov 80  }
 0x2cb   : > { %v708_v13 = vpop.permute.xlu0 %707  ;;  %v798_v15 = vpop.permute.xlu1 %797 }
 0x2cc   : > { %4906 = vmatpush3.xpose.msk.msra.mxu1 %vm709_vm2, %v708_v13 }
 0x2cd   : > { %4910 = vmatprep.subr.mxu1 %v6059_v1 }
 0x2cf   : > { %4908 = vmatmul.mubr.msk.f32.vlgmr.msra.gmra.mrb[0].mxu1 %vm709_vm2, %v6575_v14  ;;  %v960_v25 = vpop.permute.xlu1 %959 }
 0x2d0   : > { %4911 = vmatpush3.msra.mxu1 %v798_v15  ;;  %4912 = vmatprep.mubr.msk.f32.mxu1 %vm6058_vm0, %v6059_v1 }
 0x2d1   : > { %4920 = vmatprep.subr.mxu1 %v6059_v1 }
 0x3a2   : > { %v781_v16 = vpop.f32.mrb[0].mxu1 }
 0x3a3   : > { %v4909_v17 = vpop.f32.mrb[1].mxu1  ;;  %v786_v18 = vsel %vm785_vm3, %v781_v16, -inf }
 0x3a4   : > { %787 = vmax.xlane.f32.xlu0 %v786_v18 }
 0x3ba   : > { %1046 = vrot.lane.b32.xlu0 %v6568_v11, %s6063_s20  ;;  %s6072_s20 = smov 112  }
 0x3be   : > { %1201 = vrot.lane.b32.xlu0 %v6568_v11, %s6064_s23  ;;  %s6073_s23 = smov 48  }
 0x431   : > { %v788_v19 = vpop.xlane.xlu0 %787 }
 0x432   : > { %v789_v20 = vsub.f32 %v781_v16, %v788_v19 }
 0x434   : > { %v790_v21 = vmul.f32 1.442695, %v789_v20 }
 0x435   : > { %v1047_v32 = vpop.permute.xlu0 %1046 }
 0x436   : > { %5547 = vpow2.f32 %v790_v21 }
 0x439   : > { %v1202_v44 = vpop.permute.xlu0 %1201 }
 0x440   : > { %v5548_v22 = vpop.eup %5547 }
 0x441   : > { %v792_v23 = vsel %vm785_vm3, %v5548_v22, 0.0 }
 0x442   : > { %793 = vadd.xlane.f32.xlu1 %v792_v23 }
 0x453   : > { %957 = vrot.lane.b32.xlu1 %v6575_v14, %s6065_s1  ;;  %s6074_s1 = smov 76  }
 0x4cf   : > { %v794_v26 = vpop.xlane.xlu1 %793 }
 0x4d0   : > { %5549 = vrcp.f32 %v794_v26 }
 0x4d3   : > { %v958_v30 = vpop.permute.xlu1 %957 }
 0x4da   : > { %v5550_v27 = vpop.eup %5549 }
 0x4db   : > { %v796_v28 = vmul.f32 %v5550_v27, %v5548_v22 }
 0x4dd   : > { %4913 = vmatmul.mubr.msk.f32.vlgmr.msra.gmra.mrb[2].mxu1 %vm785_vm3, %v796_v28 }
 0x4de   : > { %4921 = vmatpush3.xpose.msk.msra.mxu1 %vm709_vm2, %v960_v25  ;;  %4922 = vmatprep.mubr.msk.f32.mxu1 %vm6058_vm0, %v6059_v1 }
 0x4df   : > { %4930 = vmatprep.subr.mxu1 %v6059_v1 }
 0x4e1   : > { %4923 = vmatmul.mubr.msk.f32.vlgmr.msra.gmra.mrb[4].mxu1 %vm709_vm2, %v958_v30 }
 0x4e2   : > { %4931 = vmatpush3.msk.msra.mxu1 %vm876_vm4, %v1122_v29  ;;  %4932 = vmatprep.mubr.msk.f32.mxu1 %vm6058_vm0, %v6059_v1 }
 0x4e3   : > { %4940 = vmatprep.subr.mxu1 %v6059_v1 }
 0x5b0   : > { %v869_v31 = vpop.f32.mrb[2].mxu1 }
 0x5b1   : > { %v4914_v33 = vpop.f32.mrb[3].mxu1  ;;  %4918 = vmatmul.mubr.msk.f32.vlgmr.msra.gmra.mrb[2].mxu0 %vm709_vm2, %v869_v31 }
 0x5b2   : > { %4926 = vmatpush3.msra.mxu0 %v1047_v32  ;;  %4927 = vmatprep.mubr.msk.f32.mxu0 %vm6058_vm0, %v6059_v1 }
 0x5b3   : > { %4935 = vmatprep.subr.mxu0 %v6059_v1 }
 0x5b4   : > { %v1031_v34 = vpop.f32.mrb[4].mxu1 }
 0x5b5   : > { %v4924_v35 = vpop.f32.mrb[5].mxu1  ;;  %v1035_v36 = vsel %vm785_vm3, %v1031_v34, -inf }
 0x5b6   : > { %1036 = vmax.xlane.f32.xlu1 %v1035_v36 }
 0x643   : > { %v1037_v37 = vpop.xlane.xlu1 %1036 }
 0x644   : > { %v1038_v38 = vsub.f32 %v1031_v34, %v1037_v37 }
 0x646   : > { %v1039_v39 = vmul.f32 1.442695, %v1038_v38 }
 0x648   : > { %5551 = vpow2.f32 %v1039_v39 }
 0x652   : > { %v5552_v40 = vpop.eup %5551 }
 0x653   : > { %v1041_v41 = vsel %vm785_vm3, %v5552_v40, 0.0 }
 0x654   : > { %1042 = vadd.xlane.f32.xlu0 %v1041_v41 }
 0x66a   : > { %1199 = vrot.lane.b32.xlu0 %v6575_v14, %s6066_s14  ;;  %s6075_s14 = smov 108  }
 0x684   : > { %v946_v42 = vpop.f32.mrb[2].mxu0 }
 0x685   : > { %v4919_v43 = vpop.f32.mrb[3].mxu0  ;;  %v956_v62 = vadd.f32 %v4508_v61, %v946_v42  ;;  %v703_v42 = vld [vmem:[#allocation8 + $0x10] sm:$0xff] }
 0x6e1   : > { %v1043_v45 = vpop.xlane.xlu0 %1042 }
 0x6e2   : > { %5553 = vrcp.f32 %v1043_v45 }
 0x6e5   : > { %v1200_v48 = vpop.permute.xlu0 %1199 }
 0x6ec   : > { %v5554_v46 = vpop.eup %5553 }
 0x6ed   : > { %v1045_v47 = vmul.f32 %v5554_v46, %v5552_v40 }
 0x6ef   : > { %4928 = vmatmul.mubr.msk.f32.vlgmr.msra.gmra.mrb[4].mxu0 %vm785_vm3, %v1045_v47 }
 0x6f0   : > { %4936 = vmatpush3.xpose.msk.msra.mxu0 %vm709_vm2, %v1202_v44  ;;  %4937 = vmatprep.mubr.msk.f32.mxu0 %vm6058_vm0, %v6059_v1 }
 0x6f1   : > { %4945 = vmatprep.subr.mxu0 %v6059_v1 }
 0x6f3   : > { %4938 = vmatmul.mubr.msk.f32.vlgmr.msra.gmra.mrb[6].mxu0 %vm709_vm2, %v1200_v48 }
 0x6f4   : > { %4947 = vmatprep.mubr.msk.f32.mxu0 %vm6058_vm0, %v6059_v1  ;;  %4946 = vmatpush3.msk.msra.mxu0 %vm876_vm4, %v702_v60 }
 0x6f5   : > { %4955 = vmatprep.subr.mxu0 %v6059_v1 }
 0x7c2   : > { %v1118_v49 = vpop.f32.mrb[4].mxu0 }
 0x7c3   : > { %v4929_v50 = vpop.f32.mrb[5].mxu0  ;;  %4933 = vmatmul.mubr.msk.f32.vlgmr.msra.gmra.mrb[6].mxu1 %vm709_vm2, %v1118_v49 }
 0x7c4   : > { %4942 = vmatprep.mubr.msk.f32.mxu1 %vm6058_vm0, %v6059_v1  ;;  %v2090_v50 = vrot.slane %v703_v42, 4 }
 0x7c6   : > { %v1273_v51 = vpop.f32.mrb[6].mxu0 }
 0x7c7   : > { %v4939_v52 = vpop.f32.mrb[7].mxu0  ;;  %v1277_v53 = vsel %vm785_vm3, %v1273_v51, -inf }
 0x7c8   : > { %1278 = vmax.xlane.f32.xlu1 %v1277_v53 }
 0x7d9   : > { %1288 = vrot.lane.b32.xlu1 %v6568_v11, %s6067_s15  ;;  %s6076_s15 = smov 44  }
 0x7dd   : > { %1443 = vrot.lane.b32.xlu1 %v6568_v11, %s6068_s29  ;;  %s6077_s29 = smov 72  }
 0x7e1   : > { %1441 = vrot.lane.b32.xlu1 %v6575_v14, %s6069_s22  ;;  %s6078_s22 = smov 104  }
 0x855   : > { %v1279_v54 = vpop.xlane.xlu1 %1278 }
 0x856   : > { %v1280_v55 = vsub.f32 %v1273_v51, %v1279_v54 }
 0x858   : > { %v1281_v56 = vmul.f32 1.442695, %v1280_v55 }
 0x859   : > { %v1289_v57 = vpop.permute.xlu1 %1288 }
 0x85a   : > { %5555 = vpow2.f32 %v1281_v56  ;;  %4941 = vmatpush3.msra.mxu1 %v1289_v57 }
 0x85b   : > { %4950 = vmatprep.subr.mxu1 %v6059_v1 }
 0x85d   : > { %v1444_v5 = vpop.permute.xlu1 %1443 }
 0x861   : > { %v1442_v9 = vpop.permute.xlu1 %1441 }
 0x864   : > { %v5556_v58 = vpop.eup %5555 }
 0x865   : > { %v1283_v59 = vsel %vm785_vm3, %v5556_v58, 0.0 }
 0x866   : > { %1284 = vadd.xlane.f32.xlu0 %v1283_v59 }
 0x87c   : > { %1530 = vrot.lane.b32.xlu0 %v6568_v11, %s6070_s30  ;;  %s6079_s30 = smov 40  }
 0x880   : > { %1685 = vrot.lane.b32.xlu0 %v6568_v11, %s6071_s24  ;;  %s6080_s24 = smov 68  }
 0x896   : > { %v1194_v63 = vpop.f32.mrb[6].mxu1 }
 0x897   : > { %v1198_v0 = vadd.f32 %v1194_v63, %v956_v62  ;;  %v4934_v2 = vpop.f32.mrb[7].mxu1 }
 0x8f3   : > { %v1285_v3 = vpop.xlane.xlu0 %1284 }
 0x8f4   : > { %5557 = vrcp.f32 %v1285_v3 }
 0x8f7   : > { %v1531_v12 = vpop.permute.xlu0 %1530 }
 0x8fb   : > { %v1686_v26 = vpop.permute.xlu0 %1685 }
 0x8fe   : > { %v5558_v4 = vpop.eup %5557 }
 0x8ff   : > { %v1287_v6 = vmul.f32 %v5558_v4, %v5556_v58 }
 0x901   : > { %4943 = vmatmul.mubr.msk.f32.vlgmr.msra.gmra.mrb[8].mxu1 %vm785_vm3, %v1287_v6 }
 0x902   : > { %4951 = vmatpush3.xpose.msk.msra.mxu1 %vm709_vm2, %v1444_v5  ;;  %4952 = vmatprep.mubr.msk.f32.mxu1 %vm6058_vm0, %v6059_v1 }
 0x903   : > { %4960 = vmatprep.subr.mxu1 %v6059_v1 }
 0x905   : > { %4953 = vmatmul.mubr.msk.f32.vlgmr.msra.gmra.mrb[10].mxu1 %vm709_vm2, %v1442_v9 }
 0x906   : > { %4961 = vmatpush3.msk.msra.mxu1 %vm876_vm4, %v1606_v7  ;;  %4962 = vmatprep.mubr.msk.f32.mxu1 %vm6058_vm0, %v6059_v1 }
 0x907   : > { %4970 = vmatprep.subr.mxu1 %v6059_v1 }
 0x9d4   : > { %v1360_v10 = vpop.f32.mrb[8].mxu1 }
 0x9d5   : > { %v4944_v13 = vpop.f32.mrb[9].mxu1  ;;  %4948 = vmatmul.mubr.msk.f32.vlgmr.msra.gmra.mrb[8].mxu0 %vm709_vm2, %v1360_v10 }
 0x9d6   : > { %4956 = vmatpush3.msra.mxu0 %v1531_v12  ;;  %4957 = vmatprep.mubr.msk.f32.mxu0 %vm6058_vm0, %v6059_v1 }
 0x9d7   : > { %4965 = vmatprep.subr.mxu0 %v6059_v1 }
 0x9d8   : > { %v1515_v15 = vpop.f32.mrb[10].mxu1 }
 0x9d9   : > { %v4954_v16 = vpop.f32.mrb[11].mxu1  ;;  %v1519_v17 = vsel %vm785_vm3, %v1515_v15, -inf }
 0x9da   : > { %1520 = vmax.xlane.f32.xlu1 %v1519_v17 }
 0xa67   : > { %v1521_v18 = vpop.xlane.xlu1 %1520 }
 0xa68   : > { %v1522_v19 = vsub.f32 %v1515_v15, %v1521_v18 }
 0xa6a   : > { %v1523_v20 = vmul.f32 1.442695, %v1522_v19 }
 0xa6c   : > { %5559 = vpow2.f32 %v1523_v20 }
 0xa76   : > { %v5560_v21 = vpop.eup %5559 }
 0xa77   : > { %v1525_v22 = vsel %vm785_vm3, %v5560_v21, 0.0 }
 0xa78   : > { %1526 = vadd.xlane.f32.xlu0 %v1525_v22 }
 0xa8e   : > { %1683 = vrot.lane.b32.xlu0 %v6575_v14, %s6072_s20  ;;  %s6081_s20 = smov 100  }
 0xaa8   : > { %v1436_v23 = vpop.f32.mrb[8].mxu0 }
 0xaa9   : > { %v1440_v24 = vadd.f32 %v1436_v23, %v1198_v0  ;;  %v4949_v25 = vpop.f32.mrb[9].mxu0 }
 0xb05   : > { %v1527_v27 = vpop.xlane.xlu0 %1526 }
 0xb06   : > { %5561 = vrcp.f32 %v1527_v27 }
 0xb09   : > { %v1684_v30 = vpop.permute.xlu0 %1683 }
 0xb10   : > { %v5562_v28 = vpop.eup %5561 }
 0xb11   : > { %v1529_v29 = vmul.f32 %v5562_v28, %v5560_v21 }
 0xb13   : > { %4958 = vmatmul.mubr.msk.f32.vlgmr.msra.gmra.mrb[10].mxu0 %vm785_vm3, %v1529_v29  ;;  %v704_v29 = vld [vmem:[#allocation8 + $0x18] sm:$0xff] }
 0xb14   : > { %4966 = vmatpush3.xpose.msk.msra.mxu0 %vm709_vm2, %v1686_v26  ;;  %4967 = vmatprep.mubr.msk.f32.mxu0 %vm6058_vm0, %v6059_v1 }
 0xb15   : > { %4975 = vmatprep.subr.mxu0 %v6059_v1 }
 0xb17   : > { %4968 = vmatmul.mubr.msk.f32.vlgmr.msra.gmra.mrb[12].mxu0 %vm709_vm2, %v1684_v30  ;;  %v2574_v30 = vrot.slane %v704_v29, 4 }
 0xb18   : > { %4977 = vmatprep.mubr.msk.f32.mxu0 %vm6058_vm0, %v6059_v1  ;;  %4976 = vmatpush3.msk.msra.mxu0 %vm876_vm4, %v703_v42 }
 0xb19   : > { %4985 = vmatprep.subr.mxu0 %v6059_v1 }
 0xbe6   : > { %v1602_v31 = vpop.f32.mrb[10].mxu0 }
 0xbe7   : > { %v4959_v32 = vpop.f32.mrb[11].mxu0  ;;  %4963 = vmatmul.mubr.msk.f32.vlgmr.msra.gmra.mrb[12].mxu1 %vm709_vm2, %v1602_v31 }
 0xbe8   : > { %4972 = vmatprep.mubr.msk.f32.mxu1 %vm6058_vm0, %v6059_v1 }
 0xbea   : > { %v1757_v33 = vpop.f32.mrb[12].mxu0 }
 0xbeb   : > { %v4969_v34 = vpop.f32.mrb[13].mxu0  ;;  %v1761_v35 = vsel %vm785_vm3, %v1757_v33, -inf }
 0xbec   : > { %1762 = vmax.xlane.f32.xlu1 %v1761_v35 }
 0xbfd   : > { %1772 = vrot.lane.b32.xlu1 %v6568_v11, %s6073_s23  ;;  %s6082_s23 = smov 36  }
 0xc01   : > { %1927 = vrot.lane.b32.xlu1 %v6568_v11, %s6074_s1  ;;  %s4558_s1 = sshll.u32 %s6940_s13, 7 }
 0xc05   : > { %1925 = vrot.lane.b32.xlu1 %v6575_v14, %s6075_s14  ;;  %s613_s14 = scalar_lea.vmem [#allocation23], %s4487_s16  ;;  %s6083_s16 = smov [#allocation23]  }
 0xc06   : > { %s5953_s13 = sshll.u32 %s6083_s16, 4  ;;  %s5954_s13 = int_to_ptr.vmem [resolvable:$false] %s5953_s13 }
 0xc07   : > { %s5955_s2 = scalar_lea.vmem %s5954_s13, 256 }
 0xc79   : > { %v1763_v36 = vpop.xlane.xlu1 %1762 }
 0xc7a   : > { %v1764_v37 = vsub.f32 %v1757_v33, %v1763_v36 }
 0xc7c   : > { %v1765_v38 = vmul.f32 1.442695, %v1764_v37 }
 0xc7d   : > { %v1773_v39 = vpop.permute.xlu1 %1772 }
 0xc7e   : > { %5563 = vpow2.f32 %v1765_v38  ;;  %4971 = vmatpush3.msra.mxu1 %v1773_v39 }
 0xc7f   : > { %4980 = vmatprep.subr.mxu1 %v6059_v1 }
 0xc81   : > { %v1928_v48 = vpop.permute.xlu1 %1927 }
 0xc85   : > { %v1926_v51 = vpop.permute.xlu1 %1925 }
 0xc88   : > { %v5564_v40 = vpop.eup %5563 }
 0xc89   : > { %v1767_v41 = vsel %vm785_vm3, %v5564_v40, 0.0 }
 0xc8a   : > { %1768 = vadd.xlane.f32.xlu0 %v1767_v41 }
 0xca0   : > { %2014 = vrot.lane.b32.xlu0 %v6568_v11, %s6076_s15  ;;  %s4285_s15 = sshll.u32 %s613_s14, 4  ;;  %s6850_s15 = int_to_ptr.vmem [resolvable:$true] %s4285_s15 }
 0xca1   : > { %p5956_p11 = scmp.lt.s32.totalorder %s6850_s15, %s5954_s13 }
 0xca4   : > { %2169 = vrot.lane.b32.xlu0 %v6568_v11, %s6077_s29 }
 0xcba   : > { %v1678_v43 = vpop.f32.mrb[12].mxu1 }
 0xcbb   : > { %v1682_v44 = vadd.f32 %v1678_v43, %v1440_v24  ;;  %v4964_v45 = vpop.f32.mrb[13].mxu1 }
 0xd17   : > { %v1769_v46 = vpop.xlane.xlu0 %1768 }
 0xd18   : > { %5565 = vrcp.f32 %v1769_v46 }
 0xd1b   : > { %v2015_v53 = vpop.permute.xlu0 %2014 }
 0xd1f   : > { %v2170_v3 = vpop.permute.xlu0 %2169 }
 0xd22   : > { %v5566_v47 = vpop.eup %5565 }
 0xd23   : > { %v1771_v49 = vmul.f32 %v5566_v47, %v5564_v40 }
 0xd25   : > { %4973 = vmatmul.mubr.msk.f32.vlgmr.msra.gmra.mrb[14].mxu1 %vm785_vm3, %v1771_v49 }
 0xd26   : > { %4981 = vmatpush3.xpose.msk.msra.mxu1 %vm709_vm2, %v1928_v48  ;;  %4982 = vmatprep.mubr.msk.f32.mxu1 %vm6058_vm0, %v6059_v1 }
 0xd27   : > { %4990 = vmatprep.subr.mxu1 %v6059_v1 }
 0xd29   : > { %4983 = vmatmul.mubr.msk.f32.vlgmr.msra.gmra.mrb[16].mxu1 %vm709_vm2, %v1926_v51 }
 0xd2a   : > { %4991 = vmatpush3.msk.msra.mxu1 %vm876_vm4, %v2090_v50  ;;  %4992 = vmatprep.mubr.msk.f32.mxu1 %vm6058_vm0, %v6059_v1 }
 0xd2b   : > { %5000 = vmatprep.subr.mxu1 %v6059_v1 }
 0xdf8   : > { %v1844_v52 = vpop.f32.mrb[14].mxu1 }
 0xdf9   : > { %v4974_v54 = vpop.f32.mrb[15].mxu1  ;;  %4978 = vmatmul.mubr.msk.f32.vlgmr.msra.gmra.mrb[14].mxu0 %vm709_vm2, %v1844_v52 }
 0xdfa   : > { %4986 = vmatpush3.msra.mxu0 %v2015_v53  ;;  %4987 = vmatprep.mubr.msk.f32.mxu0 %vm6058_vm0, %v6059_v1 }
 0xdfb   : > { %4995 = vmatprep.subr.mxu0 %v6059_v1 }
 0xdfc   : > { %v1999_v55 = vpop.f32.mrb[16].mxu1 }
 0xdfd   : > { %v4984_v56 = vpop.f32.mrb[17].mxu1  ;;  %v2003_v57 = vsel %vm785_vm3, %v1999_v55, -inf }
 0xdfe   : > { %2004 = vmax.xlane.f32.xlu1 %v2003_v57 }
 0xe8b   : > { %v2005_v58 = vpop.xlane.xlu1 %2004 }
 0xe8c   : > { %v2006_v59 = vsub.f32 %v1999_v55, %v2005_v58 }
 0xe8e   : > { %v2007_v60 = vmul.f32 1.442695, %v2006_v59  ;;  %v2683_v59 = vld [vmem:[#allocation14 + $0x8] sm:$0xff] }
 0xe90   : > { %5567 = vpow2.f32 %v2007_v60  ;;  %v2699_v60 = vld [vmem:[#allocation14 + $0x88] sm:$0xff] }
 0xe9a   : > { %v5568_v61 = vpop.eup %5567 }
 0xe9b   : > { %v2009_v62 = vsel %vm785_vm3, %v5568_v61, 0.0 }
 0xe9c   : > { %2010 = vadd.xlane.f32.xlu0 %v2009_v62  ;;  %v5031_v62 = vpack.c.bf16 %v2699_v60, %v2683_v59 }
 0xeb2   : > { %2167 = vrot.lane.b32.xlu0 %v6575_v14, %s6078_s22 }
 0xecc   : > { %v1920_v63 = vpop.f32.mrb[14].mxu0 }
 0xecd   : > { %v1924_v0 = vadd.f32 %v1920_v63, %v1682_v44  ;;  %v4979_v2 = vpop.f32.mrb[15].mxu0  ;;  %v2701_v63 = vld [vmem:[#allocation14 + $0x98] sm:$0xff] }
 0xece   : > { %v2698_v2 = vld [vmem:[#allocation14 + $0x80] sm:$0xff] }
 0xf29   : > { %v2011_v4 = vpop.xlane.xlu0 %2010 }
 0xf2a   : > { %5569 = vrcp.f32 %v2011_v4 }
 0xf2d   : > { %v2168_v7 = vpop.permute.xlu0 %2167 }
 0xf34   : > { %v5570_v5 = vpop.eup %5569 }
 0xf35   : > { %v2013_v6 = vmul.f32 %v5570_v5, %v5568_v61  ;;  %v2685_v61 = vld [vmem:[#allocation14 + $0x18] sm:$0xff]  ;;  %v2700_v5 = vld [vmem:[#allocation14 + $0x90] sm:$0xff] }
 0xf37   : > { %4988 = vmatmul.mubr.msk.f32.vlgmr.msra.gmra.mrb[16].mxu0 %vm785_vm3, %v2013_v6 }
 0xf38   : > { %4996 = vmatpush3.xpose.msk.msra.mxu0 %vm709_vm2, %v2170_v3  ;;  %4997 = vmatprep.mubr.msk.f32.mxu0 %vm6058_vm0, %v6059_v1  ;;  %v5039_v3 = vpack.c.bf16 %v2701_v63, %v2685_v61  ;;  %v2692_v61 = vld [vmem:[#allocation14 + $0x50] sm:$0xff]  ;;  %v2723_v63 = vld [vmem:[#allocation14 + $0x148] sm:$0xff] }
 0xf39   : > { %5005 = vmatprep.subr.mxu0 %v6059_v1 }
 0xf3b   : > { %4998 = vmatmul.mubr.msk.f32.vlgmr.msra.gmra.mrb[18].mxu0 %vm709_vm2, %v2168_v7  ;;  %v2715_v7 = vld [vmem:[#allocation14 + $0x108] sm:$0xff] }
 0xf3c   : > { %5007 = vmatprep.mubr.msk.f32.mxu0 %vm6058_vm0, %v6059_v1  ;;  %5006 = vmatpush3.msk.msra.mxu0 %vm876_vm4, %v704_v29 }
 0xf3d   : > { %5015 = vmatprep.subr.mxu0 %v6059_v1 }
0x100a   : > { %v2086_v9 = vpop.f32.mrb[16].mxu0 }
0x100b   : > { %v4989_v10 = vpop.f32.mrb[17].mxu0  ;;  %4993 = vmatmul.mubr.msk.f32.vlgmr.msra.gmra.mrb[18].mxu1 %vm709_vm2, %v2086_v9  ;;  %v2731_v9 = vld [vmem:[#allocation14 + $0x188] sm:$0xff] }
0x100c   : > { %5002 = vmatprep.mubr.msk.f32.mxu1 %vm6058_vm0, %v6059_v1  ;;  %v2717_v10 = vld [vmem:[#allocation14 + $0x118] sm:$0xff] }
0x100e   : > { %v2241_v12 = vpop.f32.mrb[18].mxu0 }
0x100f   : > { %v4999_v13 = vpop.f32.mrb[19].mxu0  ;;  %v2245_v15 = vsel %vm785_vm3, %v2241_v12, -inf }
0x1010   : > { %2246 = vmax.xlane.f32.xlu1 %v2245_v15  ;;  %v2733_v13 = vld [vmem:[#allocation14 + $0x198] sm:$0xff]  ;;  %v2714_v15 = vld [vmem:[#allocation14 + $0x100] sm:$0xff] }
0x1021   : > { %2256 = vrot.lane.b32.xlu1 %v6568_v11, %s6079_s30  ;;  %s6953_s30 = sld [smem:[#allocation38_spill]] }
0x1025   : > { %2411 = vrot.lane.b32.xlu1 %v6568_v11, %s6080_s24 }
0x1027   : > { %s6848_s24 = scalar_lea.hbm %s6953_s30, %s4558_s1 }
0x1029   : > { %2409 = vrot.lane.b32.xlu1 %v6575_v14, %s6081_s20  ;;  %s4272_s20 = scalar_lea.sflag [#allocation4], %s6519_s21 }
0x109d   : > { %v2247_v16 = vpop.xlane.xlu1 %2246 }
0x109e   : > { %v2248_v17 = vsub.f32 %v2241_v12, %v2247_v16  ;;  %v5035_v12 = vpack.c.bf16 %v2731_v9, %v2715_v7  ;;  %v2730_v16 = vld [vmem:[#allocation14 + $0x180] sm:$0xff] }
0x10a0   : > { %v2249_v18 = vmul.f32 1.442695, %v2248_v17  ;;  %v5043_v17 = vpack.c.bf16 %v2733_v13, %v2717_v10  ;;  %v2724_v10 = vld [vmem:[#allocation14 + $0x150] sm:$0xff]  ;;  %v2695_v13 = vld [vmem:[#allocation14 + $0x68] sm:$0xff] }
0x10a1   : > { %v2257_v19 = vpop.permute.xlu1 %2256 }
0x10a2   : > { %5571 = vpow2.f32 %v2249_v18  ;;  %5001 = vmatpush3.msra.mxu1 %v2257_v19  ;;  %v5037_v18 = vpack.c.bf16 %v2730_v16, %v2714_v15  ;;  %v2716_v19 = vld [vmem:[#allocation14 + $0x110] sm:$0xff]  ;;  %v2711_v15 = vld [vmem:[#allocation14 + $0xe8] sm:$0xff]  ;;  %v2697_v16 = vld [vmem:[#allocation14 + $0x78] sm:$0xff] }
0x10a3   : > { %5010 = vmatprep.subr.mxu1 %v6059_v1 }
0x10a5   : > { %v2412_v27 = vpop.permute.xlu1 %2411 }
0x10a9   : > { %v2410_v28 = vpop.permute.xlu1 %2409 }
0x10ac   : > { %v5572_v20 = vpop.eup %5571 }
0x10ad   : > { %v2251_v21 = vsel %vm785_vm3, %v5572_v20, 0.0 }
0x10ae   : > { %2252 = vadd.xlane.f32.xlu0 %v2251_v21 }
0x10de   : > { %v2162_v22 = vpop.f32.mrb[18].mxu1 }
0x10df   : > { %v2166_v23 = vadd.f32 %v2162_v22, %v1924_v0  ;;  %v4994_v24 = vpop.f32.mrb[19].mxu1  ;;  %v2682_v0 = vld [vmem:[#allocation14] sm:$0xff]  ;;  %v2687_v22 = vld [vmem:[#allocation14 + $0x28] sm:$0xff] }
0x10e0   : > { %v5033_v4 = vpack.c.bf16 %v2698_v2, %v2682_v0  ;;  %v2689_v24 = vld [vmem:[#allocation14 + $0x38] sm:$0xff]  ;;  %v2739_v0 = vld [vmem:[#allocation14 + $0x1c8] sm:$0xff] }
0x10e1   : > { %v2725_v2 = vld [vmem:[#allocation14 + $0x158] sm:$0xff]  ;;  %v5067_v7 = vpack.c.bf16 %v2739_v0, %v2723_v63  ;;  %v3469_v63 = vld [vmem:[#allocation17 + $0x1a0] sm:$0xff] }
0x10e2   : > { %v3470_v0 = vld [vmem:[#allocation17 + $0x1a8] sm:$0xff] }
0x113b   : > { %v2253_v25 = vpop.xlane.xlu0 %2252 }
0x113c   : > { %5573 = vrcp.f32 %v2253_v25 }
0x1146   : > { %v5574_v26 = vpop.eup %5573 }
0x1147   : > { %v2255_v14 = vmul.f32 %v5574_v26, %v5572_v20  ;;  %v2732_v20 = vld [vmem:[#allocation14 + $0x190] sm:$0xff]  ;;  %v2705_v26 = vld [vmem:[#allocation14 + $0xb8] sm:$0xff] }
0x1148   : > { %v5045_v21 = vpack.c.bf16 %v2732_v20, %v2716_v19  ;;  %v2694_v20 = vld [vmem:[#allocation14 + $0x60] sm:$0xff] }
0x1149   : > { %5003 = vmatmul.mubr.msk.f32.vlgmr.msra.gmra.mrb[20].mxu1 %vm785_vm3, %v2255_v14 }
0x114a   : > { %5011 = vmatpush3.xpose.msk.msra.mxu1 %vm709_vm2, %v2412_v27  ;;  %5012 = vmatprep.mubr.msk.f32.mxu1 %vm6058_vm0, %v6059_v1  ;;  %v5055_v27 = vpack.c.bf16 %v2705_v26, %v2689_v24  ;;  %v2696_v24 = vld [vmem:[#allocation14 + $0x70] sm:$0xff]  ;;  %v2727_v26 = vld [vmem:[#allocation14 + $0x168] sm:$0xff] }
0x114b   : > { %5020 = vmatprep.subr.mxu1 %v6059_v1 }
0x114d   : > { %5013 = vmatmul.mubr.msk.f32.vlgmr.msra.gmra.mrb[22].mxu1 %vm709_vm2, %v2410_v28 }
0x114e   : > { %5022 = vmatprep.mubr.msk.f32.mxu1 %vm6058_vm0, %v6059_v1  ;;  %5021 = vmatpush3.msk.msra.mxu1 %vm876_vm4, %v2574_v30  ;;  %v4544_v30 = vld [vmem:[#allocation11] ss:$0 sm:$0xff] }
0x114f   : > { %5040 = vmatprep.subr.bf16.mxu1 %v5039_v3  ;;  %v2741_v3 = vld [vmem:[#allocation14 + $0x1d8] sm:$0xff] }
0x1150   : > { %v5075_v9 = vpack.c.bf16 %v2741_v3, %v2725_v2  ;;  %v3421_v3 = vld [vmem:[#allocation17 + $0x20] sm:$0xff] }
0x121c   : > { %v2328_v31 = vpop.f32.mrb[20].mxu1 }
0x121d   : > { %v5004_v32 = vpop.f32.mrb[21].mxu1  ;;  %5008 = vmatmul.mubr.msk.f32.vlgmr.msra.gmra.mrb[20].mxu0 %vm709_vm2, %v2328_v31 }
0x121e   : > { %5017 = vmatprep.mubr.msk.f32.mxu0 %vm6058_vm0, %v6059_v1  ;;  %v4545_v32 = vld [vmem:[#allocation13] ss:$0 sm:$0xff] }
0x1220   : > { %v2483_v33 = vpop.f32.mrb[22].mxu1 }
0x1221   : > { %v5014_v34 = vpop.f32.mrb[23].mxu1  ;;  %v2487_v35 = vsel %vm785_vm3, %v2483_v33, -inf }
0x1222   : > { %2488 = vmax.xlane.f32.xlu1 %v2487_v35  ;;  %v2702_v34 = vld [vmem:[#allocation14 + $0xa0] sm:$0xff] }
0x12af   : > { %v2489_v36 = vpop.xlane.xlu1 %2488 }
0x12b0   : > { %v2490_v37 = vsub.f32 %v2483_v33, %v2489_v36  ;;  %v2686_v33 = vld [vmem:[#allocation14 + $0x20] sm:$0xff]  ;;  %v2688_v36 = vld [vmem:[#allocation14 + $0x30] sm:$0xff] }
0x12b2   : > { %v2491_v38 = vmul.f32 1.442695, %v2490_v37  ;;  %v2704_v37 = vld [vmem:[#allocation14 + $0xb0] sm:$0xff] }
0x12b4   : > { %5575 = vpow2.f32 %v2491_v38  ;;  %v2719_v38 = vld [vmem:[#allocation14 + $0x128] sm:$0xff] }
0x12be   : > { %v5576_v39 = vpop.eup %5575 }
0x12bf   : > { %v2493_v40 = vsel %vm785_vm3, %v5576_v39, 0.0 }
0x12c0   : > { %2494 = vadd.xlane.f32.xlu0 %v2493_v40  ;;  %v2721_v40 = vld [vmem:[#allocation14 + $0x138] sm:$0xff] }
0x12d6   : > { %2498 = vrot.lane.b32.xlu0 %v6568_v11, %s6082_s23  ;;  %s5949_s23 = scalar_lea.vmem %s6850_s15, 128 }
0x12d7   : > { %p5950_p2 = scmp.ne.s32.totalorder %s6850_s15, %s5949_s23  ;;  %p5957_p8 = scmp.lt.s32.totalorder %s5955_s2, %s5949_s23 }
0x12d9   : > { %p5951_p6 = pnand %p5950_p2, %p6954_p3  ;;  %p5958_p5 = por %p5957_p8, %p5956_p11 }
0x12db   : > { %p5952_p10 = pneg %p5951_p6 }
0x12dd   : > { %p5959_p9 = pnand %p5958_p5, %p5952_p10 }
0x12f0   : > { %v2404_v41 = vpop.f32.mrb[20].mxu0 }
0x12f1   : > { %v2408_v42 = vadd.f32 %v2404_v41, %v2166_v23  ;;  %v5009_v43 = vpop.f32.mrb[21].mxu0  ;;  %v2703_v23 = vld [vmem:[#allocation14 + $0xa8] sm:$0xff]  ;;  %v2737_v41 = vld [vmem:[#allocation14 + $0x1b8] sm:$0xff] }
0x12f2   : > { %v5047_v25 = vpack.c.bf16 %v2703_v23, %v2687_v22  ;;  %v5049_v43 = vpack.c.bf16 %v2702_v34, %v2686_v33  ;;  %v5079_v22 = vpack.c.bf16 %v2711_v15, %v2695_v13  ;;  %v3472_v13 = vld [vmem:[#allocation17 + $0x1b8] sm:$0xff] }
0x134d   : > { %v2495_v44 = vpop.xlane.xlu0 %2494 }
0x134e   : > { %5577 = vrcp.f32 %v2495_v44  ;;  %v5057_v44 = vpack.c.bf16 %v2704_v37, %v2688_v36  ;;  %v2744_v36 = vld [vmem:[#allocation14 + $0x1f0] sm:$0xff] }
0x134f   : > { %v3433_v37 = vld [vmem:[#allocation17 + $0x80] sm:$0xff] }
0x1351   : > { %v2499_v45 = vpop.permute.xlu0 %2498 }
0x1352   : > { %5016 = vmatpush3.msra.mxu0 %v2499_v45  ;;  %v2718_v45 = vld [vmem:[#allocation14 + $0x120] sm:$0xff] }
0x1353   : > { %5032 = vmatprep.subr.bf16.mxu0 %v5031_v62  ;;  %v2708_v62 = vld [vmem:[#allocation14 + $0xd0] sm:$0xff] }
0x1358   : > { %v5578_v46 = vpop.eup %5577 }
0x1359   : > { %v2497_v47 = vmul.f32 %v5578_v46, %v5576_v39  ;;  %v2735_v39 = vld [vmem:[#allocation14 + $0x1a8] sm:$0xff]  ;;  %v2734_v46 = vld [vmem:[#allocation14 + $0x1a0] sm:$0xff] }
0x135b   : > { %5018 = vmatmul.mubr.msk.f32.vlgmr.msra.gmra.mrb[22].mxu0 %vm785_vm3, %v2497_v47 }
0x135c   : > { %2897 = vmatprep.mubr.f32.mxu0 %v6059_v1  ;;  %5034 = vmatpush1.bf16.msra.mxu0 %v5033_v4 }
0x135d   : > { %5036 = vmatprep.subr.bf16.mxu0 %v5035_v12  ;;  %v2740_v12 = vld [vmem:[#allocation14 + $0x1d0] sm:$0xff] }
0x135e   : > { %v5077_v19 = vpack.c.bf16 %v2740_v12, %v2724_v10  ;;  %v3440_v10 = vld [vmem:[#allocation17 + $0xb8] sm:$0xff]  ;;  %v3471_v12 = vld [vmem:[#allocation17 + $0x1b0] sm:$0xff] }
0x1360   : > { %5038 = vmatpush1.bf16.msra.mxu0 %v5037_v18 }
0x1361   : > { %5048 = vmatprep.subr.bf16.mxu0 %v5047_v25  ;;  %v2712_v25 = vld [vmem:[#allocation14 + $0xf0] sm:$0xff] }
0x142e   : > { %v2570_v48 = vpop.f32.mrb[22].mxu0 }
0x142f   : > { %v5019_v49 = vpop.f32.mrb[23].mxu0  ;;  %5023 = vmatmul.mubr.msk.f32.vlgmr.msra.gmra.mrb[24].mxu1 %vm709_vm2, %v2570_v48  ;;  %v5051_v48 = vpack.c.bf16 %v2735_v39, %v2719_v38  ;;  %v3434_v38 = vld [vmem:[#allocation17 + $0x88] sm:$0xff]  ;;  %v3465_v39 = vld [vmem:[#allocation17 + $0x180] sm:$0xff] }
0x1430   : > { %2968 = vmatprep.mubr.f32.mxu1 %v6059_v1  ;;  %v5059_v49 = vpack.c.bf16 %v2737_v41, %v2721_v40  ;;  %v3466_v40 = vld [vmem:[#allocation17 + $0x188] sm:$0xff] }
0x1502   : > { %v2646_v11 = vpop.f32.mrb[24].mxu1 }
0x1503   : > { %v2650_v50 = vadd.f32 %v2646_v11, %v2408_v42  ;;  %v5024_v51 = vpop.f32.mrb[25].mxu1  ;;  %v2720_v11 = vld [vmem:[#allocation14 + $0x130] sm:$0xff] }
0x1504   : > { %v2691_v51 = vld [vmem:[#allocation14 + $0x48] sm:$0xff] }
0x1505   : > { %v2651_v52 = vadd.f32 %v2650_v50, %v6561_v8  ;;  %v2684_v8 = vld [vmem:[#allocation14 + $0x10] sm:$0xff] }
0x1506   : > { %v5041_v6 = vpack.c.bf16 %v2700_v5, %v2684_v8  ;;  %v2736_v50 = vld [vmem:[#allocation14 + $0x1b0] sm:$0xff]  ;;  %v5073_v8 = vpack.c.bf16 %v2708_v62, %v2692_v61  ;;  %v2722_v5 = vld [vmem:[#allocation14 + $0x140] sm:$0xff]  ;;  %v3438_v62 = vld [vmem:[#allocation17 + $0xa8] sm:$0xff] }
0x1507   : > { %v2652_v53 = vsel %vm626_vm1, %v2651_v52, 0.0  ;;  %v3437_v61 = vld [vmem:[#allocation17 + $0xa0] sm:$0xff] }
0x1508   : > { %2653 = vadd.xlane.f32.xlu0 %v2652_v53  ;;  %5042 = vmatpush1.bf16.msra.mxu1 %v5041_v6  ;;  %v2693_v53 = vld [vmem:[#allocation14 + $0x58] sm:$0xff]  ;;  %v2738_v6 = vld [vmem:[#allocation14 + $0x1c0] sm:$0xff] }
0x1509   : > { %5044 = vmatprep.subr.bf16.mxu1 %v5043_v17  ;;  %v2713_v17 = vld [vmem:[#allocation14 + $0xf8] sm:$0xff]  ;;  %v5069_v18 = vpack.c.bf16 %v2738_v6, %v2722_v5  ;;  %v5135_v5 = vpack.c.bf16 %v3470_v0, %v3469_v63  ;;  %v3453_v6 = vld [vmem:[#allocation17 + $0x120] sm:$0xff]  ;;  %v3480_v0 = vld [vmem:[#allocation17 + $0x1f8] sm:$0xff] }
0x150a   : > { %v5087_v23 = vpack.c.bf16 %v2713_v17, %v2697_v16  ;;  %v3423_v17 = vld [vmem:[#allocation17 + $0x30] sm:$0xff] }
0x150c   : > { %5046 = vmatpush1.bf16.msra.mxu1 %v5045_v21  ;;  %v2710_v21 = vld [vmem:[#allocation14 + $0xe0] sm:$0xff] }
0x150d   : > { %5056 = vmatprep.subr.bf16.mxu1 %v5055_v27  ;;  %v2743_v27 = vld [vmem:[#allocation14 + $0x1e8] sm:$0xff] }
0x150e   : > { %v5083_v33 = vpack.c.bf16 %v2743_v27, %v2727_v26  ;;  %v3474_v26 = vld [vmem:[#allocation17 + $0x1c8] sm:$0xff] }
0x1595   : > { %v2654_v54 = vpop.xlane.xlu0 %2653 }
0x1596   : > { %v2656_v55 = vmul.f32 0.03125, %v2654_v54  ;;  %v2709_v54 = vld [vmem:[#allocation14 + $0xd8] sm:$0xff] }
0x1597   : > { %v5071_v60 = vpack.c.bf16 %v2709_v54, %v2693_v53 }
0x1598   : > { %v2657_v56 = vsub.f32 %v2651_v52, %v2656_v55  ;;  %v2707_v52 = vld [vmem:[#allocation14 + $0xc8] sm:$0xff]  ;;  %v5053_v55 = vpack.c.bf16 %v2734_v46, %v2718_v45  ;;  %v5095_v45 = vpack.c.bf16 %v3434_v38, %v3433_v37  ;;  %v5127_v46 = vpack.c.bf16 %v3466_v40, %v3465_v39  ;;  %v3427_v40 = vld [vmem:[#allocation17 + $0x50] sm:$0xff] }
0x1599   : > { %v5063_v59 = vpack.c.bf16 %v2707_v52, %v2691_v51  ;;  %v3467_v51 = vld [vmem:[#allocation17 + $0x190] sm:$0xff]  ;;  %v3468_v52 = vld [vmem:[#allocation17 + $0x198] sm:$0xff] }
0x159a   : > { %v2658_v57 = vmul.f32 %v2657_v56, %v2657_v56  ;;  %v3476_v37 = vld [vmem:[#allocation17 + $0x1d8] sm:$0xff] }
0x159c   : > { %v2659_v58 = vsel %vm626_vm1, %v2658_v57, 0.0  ;;  %v2690_v57 = vld [vmem:[#allocation14 + $0x40] sm:$0xff] }
0x159d   : > { %2660 = vadd.xlane.f32.xlu1 %v2659_v58  ;;  %v2706_v58 = vld [vmem:[#allocation14 + $0xc0] sm:$0xff] }
0x159e   : > { %v5065_v4 = vpack.c.bf16 %v2706_v58, %v2690_v57  ;;  %v5131_v58 = vpack.c.bf16 %v3468_v52, %v3467_v51  ;;  %v3429_v52 = vld [vmem:[#allocation17 + $0x60] sm:$0xff] }
0x162a   : > { %v2661_v14 = vpop.xlane.xlu1 %2660 }
0x162b   : > { %v2662_v28 = vmul.f32 0.03125, %v2661_v14  ;;  %v2729_v14 = vld [vmem:[#allocation14 + $0x178] sm:$0xff] }
0x162d   : > { %v2663_v29 = vadd.f32 1e-05, %v2662_v28  ;;  %v2745_v28 = vld [vmem:[#allocation14 + $0x1f8] sm:$0xff] }
0x162e   : > { %v5091_v34 = vpack.c.bf16 %v2745_v28, %v2729_v14  ;;  %v3425_v28 = vld [vmem:[#allocation17 + $0x40] sm:$0xff] }
0x162f   : > { %5579 = vrsqrt.f32 %v2663_v29  ;;  %v5081_v29 = vpack.c.bf16 %v2710_v21, %v2694_v20  ;;  %v5139_v20 = vpack.c.bf16 %v3472_v13, %v3471_v12  ;;  %v3455_v21 = vld [vmem:[#allocation17 + $0x130] sm:$0xff]  ;;  %v3530_v13 = vld [vmem:[#allocation17 + $0x388] sm:$0xff] }
0x1639   : > { %v5580_v31 = vpop.eup %5579 }
0x163a   : > { %v2665_v35 = vmul.f32 %v5580_v31, %v2657_v56  ;;  %v5061_v56 = vpack.c.bf16 %v2736_v50, %v2720_v11  ;;  %v2726_v31 = vld [vmem:[#allocation14 + $0x160] sm:$0xff]  ;;  %v3436_v50 = vld [vmem:[#allocation17 + $0x98] sm:$0xff] }
0x163b   : > { %v3435_v11 = vld [vmem:[#allocation17 + $0x90] sm:$0xff] }
0x163c   : > { %v2673_v42 = vmul.f32 %v4544_v30, %v2665_v35  ;;  %v5089_v30 = vpack.c.bf16 %v2712_v25, %v2696_v24  ;;  %v2728_v35 = vld [vmem:[#allocation14 + $0x170] sm:$0xff]  ;;  %v5099_v57 = vpack.c.bf16 %v3436_v50, %v3435_v11  ;;  %v3442_v24 = vld [vmem:[#allocation17 + $0xc8] sm:$0xff] }
0x163d   : > { %v3473_v25 = vld [vmem:[#allocation17 + $0x1c0] sm:$0xff]  ;;  %v3478_v11 = vld [vmem:[#allocation17 + $0x1e8] sm:$0xff] }
0x163e   : > { %v6724_v47 = vadd.f32 %v4545_v32, %v2673_v42  ;;  %v2742_v32 = vld [vmem:[#allocation14 + $0x1e0] sm:$0xff]  ;;  %v5093_v42 = vpack.c.bf16 %v2744_v36, %v2728_v35  ;;  %v3444_v35 = vld [vmem:[#allocation17 + $0xd8] sm:$0xff] }
0x163f   : > { %v5085_v41 = vpack.c.bf16 %v2742_v32, %v2726_v31  ;;  %v5143_v31 = vpack.c.bf16 %v3474_v26, %v3473_v25  ;;  %v3457_v32 = vld [vmem:[#allocation17 + $0x140] sm:$0xff]  ;;  %v3475_v36 = vld [vmem:[#allocation17 + $0x1d0] sm:$0xff] }
0x1640   : > { %4546 = vmatmul.mubr.msk.f32.vlgmr.msra.gmra.mrb[24].mxu0 %vm626_vm1, %v6724_v47  ;;  %4547 = vmatmul.mubr.msk.f32.vlgmr.msra.gmra.mrb[26].mxu1 %vm626_vm1, %v6724_v47 }
0x1641   : > { %5050 = vmatpush1.bf16.msra.mxu0 %v5049_v43  ;;  %5058 = vmatpush1.bf16.msra.mxu1 %v5057_v44  ;;  %v3417_v43 = vld [vmem:[#allocation17] sm:$0xff]  ;;  %v3418_v44 = vld [vmem:[#allocation17 + $0x8] sm:$0xff] }
0x1642   : > { %5052 = vmatprep.subr.bf16.mxu0 %v5051_v48  ;;  %5060 = vmatprep.subr.bf16.mxu1 %v5059_v49  ;;  %v3449_v48 = vld [vmem:[#allocation17 + $0x100] sm:$0xff]  ;;  %v3450_v49 = vld [vmem:[#allocation17 + $0x108] sm:$0xff]  ;;  %v5097_v53 = vpack.c.bf16 %v3418_v44, %v3417_v43  ;;  %v5147_v43 = vpack.c.bf16 %v3476_v37, %v3475_v36  ;;  %v3459_v44 = vld [vmem:[#allocation17 + $0x150] sm:$0xff] }
0x1643   : > { %3039 = vmatprep.mubr.f32.mxu0 %v6059_v1  ;;  %3110 = vmatprep.mubr.f32.mxu1 %v6059_v1  ;;  %v5129_v54 = vpack.c.bf16 %v3450_v49, %v3449_v48  ;;  %v3446_v48 = vld [vmem:[#allocation17 + $0xe8] sm:$0xff]  ;;  %v3477_v49 = vld [vmem:[#allocation17 + $0x1e0] sm:$0xff] }
0x1644   : > { %v3513_v37 = vld [vmem:[#allocation17 + $0x300] sm:$0xff] }
0x1645   : > { %5054 = vmatpush1.bf16.msra.mxu0 %v5053_v55  ;;  %5062 = vmatpush1.bf16.msra.mxu1 %v5061_v56  ;;  %v3419_v55 = vld [vmem:[#allocation17 + $0x10] sm:$0xff]  ;;  %v3420_v56 = vld [vmem:[#allocation17 + $0x18] sm:$0xff] }
0x1646   : > { %5064 = vmatprep.subr.bf16.mxu0 %v5063_v59  ;;  %5072 = vmatprep.subr.bf16.mxu1 %v5071_v60  ;;  %v3451_v59 = vld [vmem:[#allocation17 + $0x110] sm:$0xff]  ;;  %v3452_v60 = vld [vmem:[#allocation17 + $0x118] sm:$0xff] }
0x1647   : > { %v5133_v2 = vpack.c.bf16 %v3452_v60, %v3451_v59  ;;  %v3447_v60 = vld [vmem:[#allocation17 + $0xf0] sm:$0xff] }
0x1648   : > { %4548 = vmatmul.mubr.msk.f32.vlgmr.msra.gmra.mrb[26].mxu0 %vm626_vm1, %v6724_v47  ;;  %4549 = vmatmul.mubr.msk.f32.vlgmr.msra.gmra.mrb[28].mxu1 %vm626_vm1, %v6724_v47 }
0x1649   : > { %5066 = vmatpush1.bf16.msra.mxu0 %v5065_v4  ;;  %5074 = vmatpush1.bf16.msra.mxu1 %v5073_v8  ;;  %v3422_v4 = vld [vmem:[#allocation17 + $0x28] sm:$0xff]  ;;  %v5103_v8 = vpack.c.bf16 %v3438_v62, %v3437_v61  ;;  %v3448_v61 = vld [vmem:[#allocation17 + $0xf8] sm:$0xff]  ;;  %v3479_v62 = vld [vmem:[#allocation17 + $0x1f0] sm:$0xff] }
0x164a   : > { %5068 = vmatprep.subr.bf16.mxu0 %v5067_v7  ;;  %5076 = vmatprep.subr.bf16.mxu1 %v5075_v9  ;;  %v3454_v7 = vld [vmem:[#allocation17 + $0x128] sm:$0xff]  ;;  %v3439_v9 = vld [vmem:[#allocation17 + $0xb0] sm:$0xff]  ;;  %v5105_v15 = vpack.c.bf16 %v3422_v4, %v3421_v3  ;;  %v5123_v63 = vpack.c.bf16 %v3448_v61, %v3447_v60  ;;  %v5155_v3 = vpack.c.bf16 %v3480_v0, %v3479_v62 }
0x164b   : > { %3181 = vmatprep.mubr.f32.mxu0 %v6059_v1  ;;  %3252 = vmatprep.mubr.f32.mxu1 %v6059_v1  ;;  %v5137_v16 = vpack.c.bf16 %v3454_v7, %v3453_v6  ;;  %v3497_v7 = vld [vmem:[#allocation17 + $0x280] sm:$0xff]  ;;  %v3502_v62 = vld [vmem:[#allocation17 + $0x2a8] sm:$0xff] }
0x164c   : > { %v3534_v0 = vld [vmem:[#allocation17 + $0x3a8] sm:$0xff] }
0x164d   : > { %5070 = vmatpush1.bf16.msra.mxu0 %v5069_v18  ;;  %5078 = vmatpush1.bf16.msra.mxu1 %v5077_v19  ;;  %v3424_v18 = vld [vmem:[#allocation17 + $0x38] sm:$0xff]  ;;  %v5107_v19 = vpack.c.bf16 %v3440_v10, %v3439_v9  ;;  %v3498_v9 = vld [vmem:[#allocation17 + $0x288] sm:$0xff]  ;;  %v3529_v10 = vld [vmem:[#allocation17 + $0x380] sm:$0xff] }
0x164e   : > { %5080 = vmatprep.subr.bf16.mxu0 %v5079_v22  ;;  %5088 = vmatprep.subr.bf16.mxu1 %v5087_v23  ;;  %v3456_v22 = vld [vmem:[#allocation17 + $0x138] sm:$0xff]  ;;  %v3441_v23 = vld [vmem:[#allocation17 + $0xc0] sm:$0xff]  ;;  %v5109_v27 = vpack.c.bf16 %v3424_v18, %v3423_v17  ;;  %v5159_v12 = vpack.c.bf16 %v3498_v9, %v3497_v7 }
0x164f   : > { %v5141_v14 = vpack.c.bf16 %v3456_v22, %v3455_v21 }
0x1650   : > { %4550 = vmatmul.mubr.msk.f32.vlgmr.msra.gmra.mrb[28].mxu0 %vm626_vm1, %v6724_v47  ;;  %4551 = vmatmul.mubr.msk.f32.vlgmr.msra.gmra.mrb[30].mxu1 %vm626_vm1, %v6724_v47 }
0x1651   : > { %5082 = vmatpush1.bf16.msra.mxu0 %v5081_v29  ;;  %5090 = vmatpush1.bf16.msra.mxu1 %v5089_v30  ;;  %v3426_v29 = vld [vmem:[#allocation17 + $0x48] sm:$0xff]  ;;  %v5111_v30 = vpack.c.bf16 %v3442_v24, %v3441_v23  ;;  %v6760_v23 = vld [vmem:[#allocation16] sm:$0xff] }
0x1652   : > { %5084 = vmatprep.subr.bf16.mxu0 %v5083_v33  ;;  %5092 = vmatprep.subr.bf16.mxu1 %v5091_v34  ;;  %v3458_v33 = vld [vmem:[#allocation17 + $0x148] sm:$0xff]  ;;  %v3443_v34 = vld [vmem:[#allocation17 + $0xd0] sm:$0xff]  ;;  %v5113_v38 = vpack.c.bf16 %v3426_v29, %v3425_v28 }
0x1653   : > { %3323 = vmatprep.mubr.f32.mxu0 %v6059_v1  ;;  %3394 = vmatprep.mubr.f32.mxu1 %v6059_v1  ;;  %v5101_v1 = vpack.c.bf16 %v3420_v56, %v3419_v55  ;;  %v5145_v39 = vpack.c.bf16 %v3458_v33, %v3457_v32  ;;  %v3430_v55 = vld [vmem:[#allocation17 + $0x68] sm:$0xff]  ;;  %v3461_v56 = vld [vmem:[#allocation17 + $0x160] sm:$0xff] }
0x1654   : > { %v3482_v32 = vld [vmem:[#allocation17 + $0x208] sm:$0xff] }
0x1655   : > { %5086 = vmatpush1.bf16.msra.mxu0 %v5085_v41  ;;  %5094 = vmatpush1.bf16.msra.mxu1 %v5093_v42  ;;  %v3428_v41 = vld [vmem:[#allocation17 + $0x58] sm:$0xff]  ;;  %v5115_v42 = vpack.c.bf16 %v3444_v35, %v3443_v34 }
0x1656   : > { %5096 = vmatprep.subr.bf16.mxu0 %v5095_v45  ;;  %5128 = vmatprep.subr.bf16.mxu1 %v5127_v46  ;;  %v3460_v45 = vld [vmem:[#allocation17 + $0x158] sm:$0xff]  ;;  %v3445_v46 = vld [vmem:[#allocation17 + $0xe0] sm:$0xff]  ;;  %v5117_v50 = vpack.c.bf16 %v3428_v41, %v3427_v40 }
0x1657   : > { %v5149_v51 = vpack.c.bf16 %v3460_v45, %v3459_v44  ;;  %v3500_v44 = vld [vmem:[#allocation17 + $0x298] sm:$0xff]  ;;  %v3531_v45 = vld [vmem:[#allocation17 + $0x390] sm:$0xff] }
0x1658   : > { %4552 = vmatmul.mubr.msk.f32.vlgmr.msra.gmra.mrb[30].mxu0 %vm626_vm1, %v6724_v47  ;;  %4553 = vmatmul.mubr.msk.f32.vlgmr.msra.gmra.mrb[32].mxu1 %vm626_vm1, %v6724_v47 }
0x1659   : > { %5098 = vmatpush3.bf16.msra.mxu0 %v5097_v53  ;;  %5130 = vmatpush3.bf16.msra.mxu1 %v5129_v54  ;;  %v5119_v53 = vpack.c.bf16 %v3446_v48, %v3445_v46  ;;  %v5151_v54 = vpack.c.bf16 %v3478_v11, %v3477_v49  ;;  %v3532_v46 = vld [vmem:[#allocation17 + $0x398] sm:$0xff] }
0x165a   : > { %5100 = vmatprep.subr.bf16.mxu0 %v5099_v57  ;;  %5132 = vmatprep.subr.bf16.mxu1 %v5131_v58  ;;  %v3462_v57 = vld [vmem:[#allocation17 + $0x168] sm:$0xff]  ;;  %v5121_v58 = vpack.c.bf16 %v3430_v55, %v3429_v52  ;;  %v3484_v52 = vld [vmem:[#allocation17 + $0x218] sm:$0xff] }
0x165b   : > { %v5153_v59 = vpack.c.bf16 %v3462_v57, %v3461_v56  ;;  %v5195_v56 = vpack.c.bf16 %v3532_v46, %v3531_v45  ;;  %v3515_v57 = vld [vmem:[#allocation17 + $0x310] sm:$0xff]  ;;  %v3537_v45 = vld [vmem:[#allocation17 + $0x3c0] sm:$0xff]  ;;  %v3538_v46 = vld [vmem:[#allocation17 + $0x3c8] sm:$0xff] }
0x165d   : > { %5102 = vmatpush3.bf16.msra.mxu0 %v5101_v1  ;;  %5134 = vmatpush3.bf16.msra.mxu1 %v5133_v2  ;;  %v3431_v1 = vld [vmem:[#allocation17 + $0x70] sm:$0xff]  ;;  %v3432_v2 = vld [vmem:[#allocation17 + $0x78] sm:$0xff] }
0x165e   : > { %5104 = vmatprep.subr.bf16.mxu0 %v5103_v8  ;;  %5136 = vmatprep.subr.bf16.mxu1 %v5135_v5  ;;  %v5125_v4 = vpack.c.bf16 %v3432_v2, %v3431_v1  ;;  %v3463_v8 = vld [vmem:[#allocation17 + $0x170] sm:$0xff]  ;;  %v3464_v5 = vld [vmem:[#allocation17 + $0x178] sm:$0xff] }
0x165f   : > { %v5157_v6 = vpack.c.bf16 %v3464_v5, %v3463_v8  ;;  %v3485_v8 = vld [vmem:[#allocation17 + $0x220] sm:$0xff]  ;;  %v3486_v5 = vld [vmem:[#allocation17 + $0x228] sm:$0xff] }
0x1661   : > { %5106 = vmatpush3.bf16.msra.mxu0 %v5105_v15  ;;  %5138 = vmatpush3.bf16.msra.mxu1 %v5137_v16  ;;  %v5191_v15 = vpack.c.bf16 %v3530_v13, %v3529_v10  ;;  %v2750_v16 = vlaneseq  ;;  %v3518_v13 = vld [vmem:[#allocation17 + $0x328] sm:$0xff] }
0x1662   : > { %5108 = vmatprep.subr.bf16.mxu0 %v5107_v19  ;;  %5140 = vmatprep.subr.bf16.mxu1 %v5139_v20  ;;  %v6751_v19 = vld [vmem:[#allocation16 + $0x8] sm:$0xff] }
0x1663   : > { %v6748_v17 = vshrl.u32 %v2750_v16, 7 }
0x1665   : > { %5110 = vmatpush3.bf16.msra.mxu0 %v5109_v27  ;;  %5142 = vmatpush3.bf16.msra.mxu1 %v5141_v14  ;;  %v2776_v18 = vsub.s32 6, %v6748_v17  ;;  %v2752_v21 = vsub.s32 0, %v6748_v17  ;;  %v2760_v22 = vsub.s32 2, %v6748_v17  ;;  %v2756_v24 = vsub.s32 1, %v6748_v17 }
0x1666   : > { %5112 = vmatprep.subr.bf16.mxu0 %v5111_v30  ;;  %5144 = vmatprep.subr.bf16.mxu1 %v5143_v31  ;;  %v2764_v25 = vsub.s32 3, %v6748_v17  ;;  %v3481_v31 = vld [vmem:[#allocation17 + $0x200] sm:$0xff] }
0x1667   : > { %v6756_v20 = vrot.slane %v6751_v19, %v2776_v18  ;;  %v2753_v26 = vrot.slane %v6760_v23, %v2752_v21  ;;  %v2761_v27 = vrot.slane %v6760_v23, %v2760_v22  ;;  %v2757_v14 = vrot.slane %v6760_v23, %v2756_v24 }
0x1668   : > { %v2765_v28 = vrot.slane %v6760_v23, %v2764_v25  ;;  %v5161_v11 = vpack.c.bf16 %v3482_v32, %v3481_v31  ;;  %v2785_v32 = vrot.slane %v6751_v19, %v2752_v21 }
0x1669   : > { %5114 = vmatpush3.bf16.msra.mxu0 %v5113_v38  ;;  %5146 = vmatpush3.bf16.msra.mxu1 %v5145_v39  ;;  %v3514_v38 = vld [vmem:[#allocation17 + $0x308] sm:$0xff]  ;;  %v3499_v39 = vld [vmem:[#allocation17 + $0x290] sm:$0xff] }
0x166a   : > { %5116 = vmatprep.subr.bf16.mxu0 %v5115_v42  ;;  %5148 = vmatprep.subr.bf16.mxu1 %v5147_v43  ;;  %v2772_v42 = vsub.s32 5, %v6748_v17  ;;  %v2780_v43 = vsub.s32 7, %v6748_v17  ;;  %v5163_v55 = vpack.c.bf16 %v3500_v44, %v3499_v39  ;;  %v3506_v44 = vld [vmem:[#allocation17 + $0x2c8] sm:$0xff] }
0x166c   : > { %v2773_v60 = vrot.slane %v6760_v23, %v2772_v42  ;;  %v2781_v61 = vrot.slane %v6760_v23, %v2780_v43 }
0x166d   : > { %5118 = vmatpush3.bf16.msra.mxu0 %v5117_v50  ;;  %5150 = vmatpush3.bf16.msra.mxu1 %v5149_v51  ;;  %v5193_v50 = vpack.c.bf16 %v3514_v38, %v3513_v37  ;;  %v3483_v51 = vld [vmem:[#allocation17 + $0x210] sm:$0xff]  ;;  %v2793_v37 = vrot.slane %v6751_v19, %v2760_v22 }
0x166e   : > { %5120 = vmatprep.subr.bf16.mxu0 %v5119_v53  ;;  %5152 = vmatprep.subr.bf16.mxu1 %v5151_v54 }
0x1671   : > { %5122 = vmatpush3.bf16.msra.mxu0 %v5121_v58  ;;  %5154 = vmatpush3.bf16.msra.mxu1 %v5153_v59  ;;  %v3516_v58 = vld [vmem:[#allocation17 + $0x318] sm:$0xff]  ;;  %v3501_v59 = vld [vmem:[#allocation17 + $0x2a0] sm:$0xff] }
0x1672   : > { %5124 = vmatprep.subr.bf16.mxu0 %v5123_v63  ;;  %5156 = vmatprep.subr.bf16.mxu1 %v5155_v3  ;;  %v3533_v63 = vld [vmem:[#allocation17 + $0x3a0] sm:$0xff]  ;;  %v5165_v3 = vpack.c.bf16 %v3484_v52, %v3483_v51  ;;  %v5167_v9 = vpack.c.bf16 %v3502_v62, %v3501_v59  ;;  %v3490_v52 = vld [vmem:[#allocation17 + $0x248] sm:$0xff]  ;;  %v3507_v59 = vld [vmem:[#allocation17 + $0x2d0] sm:$0xff] }
0x1673   : > { %v5199_v10 = vpack.c.bf16 %v3534_v0, %v3533_v63  ;;  %v3489_v51 = vld [vmem:[#allocation17 + $0x240] sm:$0xff]  ;;  %v3540_v62 = vld [vmem:[#allocation17 + $0x3d8] sm:$0xff]  ;;  %v2768_v63 = vsub.s32 4, %v6748_v17 }
0x1674   : > { %v5177_v0 = vpack.c.bf16 %v3490_v52, %v3489_v51  ;;  %v3528_v52 = vld [vmem:[#allocation17 + $0x378] sm:$0xff] }
0x1675   : > { %5126 = vmatpush3.bf16.msra.mxu0 %v5125_v4  ;;  %5158 = vmatpush3.bf16.msra.mxu1 %v5157_v6  ;;  %v5197_v4 = vpack.c.bf16 %v3516_v58, %v3515_v57  ;;  %v3521_v57 = vld [vmem:[#allocation17 + $0x340] sm:$0xff]  ;;  %v3522_v58 = vld [vmem:[#allocation17 + $0x348] sm:$0xff] }
0x1676   : > { %5160 = vmatprep.subr.bf16.mxu0 %v5159_v12  ;;  %5192 = vmatprep.subr.bf16.mxu1 %v5191_v15  ;;  %v3517_v12 = vld [vmem:[#allocation17 + $0x320] sm:$0xff]  ;;  %v3503_v15 = vld [vmem:[#allocation17 + $0x2b0] sm:$0xff] }
0x1713   : > { %v2899_v29 = vpop.f32.mrb[24].mxu0  ;;  %v2970_v30 = vpop.f32.mrb[26].mxu1 }
0x1714   : > { %v2900_v33 = vadd.f32 %v2899_v29, %v2753_v26  ;;  %v2971_v34 = vadd.f32 %v2970_v30, %v2761_v27  ;;  %v2901_v35 = vpop.f32.mrb[25].mxu0  ;;  %v2972_v36 = vpop.f32.mrb[27].mxu1  ;;  %v3504_v27 = vld [vmem:[#allocation17 + $0x2b8] sm:$0xff]  ;;  %v5169_v29 = vpack.c.bf16 %v3486_v5, %v3485_v8  ;;  %v3523_v5 = vld [vmem:[#allocation17 + $0x350] sm:$0xff] }
0x1715   : > { %v2902_v40 = vadd.f32 %v2901_v35, %v2757_v14  ;;  %v2973_v41 = vadd.f32 %v2972_v36, %v2765_v28  ;;  %v3535_v14 = vld [vmem:[#allocation17 + $0x3b0] sm:$0xff]  ;;  %v3536_v28 = vld [vmem:[#allocation17 + $0x3b8] sm:$0xff]  ;;  %v5171_v38 = vpack.c.bf16 %v3504_v27, %v3503_v15  ;;  %v3541_v15 = vld [vmem:[#allocation17 + $0x3e0] sm:$0xff] }
0x1716   : > { %v3401_v53 = vmax.f32 %v2900_v33, 0.0  ;;  %v3403_v54 = vmax.f32 %v2971_v34, 0.0  ;;  %v5201_v33 = vpack.c.bf16 %v3518_v13, %v3517_v12  ;;  %v3487_v34 = vld [vmem:[#allocation17 + $0x230] sm:$0xff]  ;;  %v3488_v35 = vld [vmem:[#allocation17 + $0x238] sm:$0xff]  ;;  %v5203_v39 = vpack.c.bf16 %v3536_v28, %v3535_v14  ;;  %v3509_v12 = vld [vmem:[#allocation17 + $0x2e0] sm:$0xff] }
0x1717   : > { %v3402_v48 = vmax.f32 %v2902_v40, 0.0  ;;  %v3404_v49 = vmax.f32 %v2973_v41, 0.0  ;;  %v3519_v36 = vld [vmem:[#allocation17 + $0x330] sm:$0xff]  ;;  %v3520_v40 = vld [vmem:[#allocation17 + $0x338] sm:$0xff]  ;;  %v3505_v41 = vld [vmem:[#allocation17 + $0x2c0] sm:$0xff] }
0x1718   : > { %v3492_v8 = vld [vmem:[#allocation17 + $0x258] sm:$0xff]  ;;  %v3510_v13 = vld [vmem:[#allocation17 + $0x2e8] sm:$0xff] }
0x1719   : > { %3744 = vmatprep.mubr.f32.mxu0 %v3402_v48  ;;  %3814 = vmatprep.mubr.f32.mxu1 %v3404_v49  ;;  %v5173_v49 = vpack.c.bf16 %v3488_v35, %v3487_v34 }
0x171a   : > { %3745 = vmatmul.mubr.f32.vlgmr.msra.gmra.mrb[32].mxu0 %v3401_v53  ;;  %3815 = vmatmul.mubr.f32.vlgmr.msra.gmra.mrb[34].mxu1 %v3403_v54 }
0x171b   : > { %v6784_v1 = vpop.f32.mrb[26].mxu0  ;;  %v6786_v2 = vpop.f32.mrb[28].mxu1  ;;  %5162 = vmatpush3.bf16.msra.mxu0 %v5161_v11  ;;  %5194 = vmatpush3.bf16.msra.mxu1 %v5193_v50  ;;  %v5205_v11 = vpack.c.bf16 %v3520_v40, %v3519_v36  ;;  %v5175_v50 = vpack.c.bf16 %v3506_v44, %v3505_v41  ;;  %v3512_v40 = vld [vmem:[#allocation17 + $0x2f8] sm:$0xff]  ;;  %v3543_v41 = vld [vmem:[#allocation17 + $0x3f0] sm:$0xff] }
0x171c   : > { %v3043_v6 = vpop.f32.mrb[27].mxu0  ;;  %v3114_v7 = vpop.f32.mrb[29].mxu1  ;;  %5164 = vmatprep.subr.bf16.mxu0 %v5163_v55  ;;  %5196 = vmatprep.subr.bf16.mxu1 %v5195_v56  ;;  %v5207_v56 = vpack.c.bf16 %v3538_v46, %v3537_v45  ;;  %v3544_v44 = vld [vmem:[#allocation17 + $0x3f8] sm:$0xff]  ;;  %v2769_v45 = vrot.slane %v6760_v23, %v2768_v63 }
0x171d   : > { %v3044_v16 = vadd.f32 %v3043_v6, %v2773_v60  ;;  %v3115_v26 = vadd.f32 %v3114_v7, %v2781_v61  ;;  %v3508_v60 = vld [vmem:[#allocation17 + $0x2d8] sm:$0xff]  ;;  %v3539_v61 = vld [vmem:[#allocation17 + $0x3d0] sm:$0xff]  ;;  %v2801_v6 = vrot.slane %v6751_v19, %v2768_v63  ;;  %v5219_v51 = vpack.c.bf16 %v3544_v44, %v3543_v41  ;;  %v3549_v41 = vld [vmem:[#allocation17 + $0x420] sm:$0xff] }
0x171e   : > { %v5179_v7 = vpack.c.bf16 %v3508_v60, %v3507_v59  ;;  %v3593_v59 = vld [vmem:[#allocation17 + $0x580] sm:$0xff]  ;;  %v3594_v60 = vld [vmem:[#allocation17 + $0x588] sm:$0xff]  ;;  %v3042_v63 = vadd.f32 %v6784_v1, %v2769_v45 }
0x171f   : > { %v3406_v30 = vmax.f32 %v3044_v16, 0.0  ;;  %v3408_v31 = vmax.f32 %v3115_v26, 0.0  ;;  %5166 = vmatpush3.bf16.msra.mxu0 %v5165_v3  ;;  %5198 = vmatpush3.bf16.msra.mxu1 %v5197_v4  ;;  %v5209_v3 = vpack.c.bf16 %v3522_v58, %v3521_v57  ;;  %v3491_v4 = vld [vmem:[#allocation17 + $0x250] sm:$0xff]  ;;  %v3542_v16 = vld [vmem:[#allocation17 + $0x3e8] sm:$0xff]  ;;  %v2789_v58 = vrot.slane %v6751_v19, %v2756_v24  ;;  %v3581_v45 = vld [vmem:[#allocation17 + $0x520] sm:$0xff] }
0x1720   : > { %5168 = vmatprep.subr.bf16.mxu0 %v5167_v9  ;;  %5200 = vmatprep.subr.bf16.mxu1 %v5199_v10  ;;  %v5211_v9 = vpack.c.bf16 %v3540_v62, %v3539_v61  ;;  %v3524_v10 = vld [vmem:[#allocation17 + $0x358] sm:$0xff]  ;;  %v5181_v14 = vpack.c.bf16 %v3492_v8, %v3491_v4  ;;  %v5215_v36 = vpack.c.bf16 %v3542_v16, %v3541_v15  ;;  %v3562_v57 = vld [vmem:[#allocation17 + $0x488] sm:$0xff]  ;;  %v3545_v4 = vld [vmem:[#allocation17 + $0x400] sm:$0xff] }
0x1721   : > { %3884 = vmatprep.mubr.f32.mxu0 %v3406_v30  ;;  %3954 = vmatprep.mubr.f32.mxu1 %v3408_v31  ;;  %v5213_v28 = vpack.c.bf16 %v3524_v10, %v3523_v5  ;;  %v3493_v30 = vld [vmem:[#allocation17 + $0x260] sm:$0xff]  ;;  %v3494_v31 = vld [vmem:[#allocation17 + $0x268] sm:$0xff]  ;;  %v2797_v61 = vrot.slane %v6751_v19, %v2764_v25  ;;  %v3595_v10 = vld [vmem:[#allocation17 + $0x590] sm:$0xff] }
0x1722   : > { %v5185_v46 = vpack.c.bf16 %v3494_v31, %v3493_v30  ;;  %v3546_v24 = vld [vmem:[#allocation17 + $0x408] sm:$0xff]  ;;  %v3577_v5 = vld [vmem:[#allocation17 + $0x500] sm:$0xff]  ;;  %v3547_v16 = vld [vmem:[#allocation17 + $0x410] sm:$0xff] }
0x1723   : > { %v3183_v21 = vpop.f32.mrb[28].mxu0  ;;  %v3254_v48 = vpop.f32.mrb[30].mxu1  ;;  %5170 = vmatpush3.bf16.msra.mxu0 %v5169_v29  ;;  %5202 = vmatpush3.bf16.msra.mxu1 %v5201_v33  ;;  %v5183_v29 = vpack.c.bf16 %v3510_v13, %v3509_v12  ;;  %v3596_v12 = vld [vmem:[#allocation17 + $0x598] sm:$0xff]  ;;  %v5225_v1 = vpack.c.bf16 %v3546_v24, %v3545_v4  ;;  %v3405_v13 = vmax.f32 %v3042_v63, 0.0  ;;  %v3565_v30 = vld [vmem:[#allocation17 + $0x4a0] sm:$0xff]  ;;  %v3550_v44 = vld [vmem:[#allocation17 + $0x428] sm:$0xff] }
0x1724   : > { %v6794_v53 = vadd.f32 %v3183_v21, %v2785_v32  ;;  %v6796_v22 = vadd.f32 %v3254_v48, %v2793_v37  ;;  %v6798_v54 = vpop.f32.mrb[29].mxu0  ;;  %v6800_v55 = vpop.f32.mrb[31].mxu1  ;;  %5172 = vmatprep.subr.bf16.mxu0 %v5171_v38  ;;  %5204 = vmatprep.subr.bf16.mxu1 %v5203_v39  ;;  %v3525_v37 = vld [vmem:[#allocation17 + $0x360] sm:$0xff]  ;;  %v3526_v38 = vld [vmem:[#allocation17 + $0x368] sm:$0xff]  ;;  %v3511_v39 = vld [vmem:[#allocation17 + $0x2f0] sm:$0xff] }
0x1725   : > { %v3495_v21 = vld [vmem:[#allocation17 + $0x270] sm:$0xff]  ;;  %v3496_v48 = vld [vmem:[#allocation17 + $0x278] sm:$0xff]  ;;  %v3186_v8 = vadd.f32 %v6798_v54, %v2789_v58  ;;  %v3257_v25 = vadd.f32 %v6800_v55, %v2797_v61  ;;  %v3566_v55 = vld [vmem:[#allocation17 + $0x4a8] sm:$0xff] }
0x1726   : > { %v3583_v58 = vld [vmem:[#allocation17 + $0x530] sm:$0xff]  ;;  %v3569_v61 = vld [vmem:[#allocation17 + $0x4c0] sm:$0xff]  ;;  %v3554_v24 = vld [vmem:[#allocation17 + $0x448] sm:$0xff] }
0x1727   : > { %5174 = vmatpush3.bf16.msra.mxu0 %v5173_v49  ;;  %5206 = vmatpush3.bf16.msra.mxu1 %v5205_v11  ;;  %v3527_v49 = vld [vmem:[#allocation17 + $0x370] sm:$0xff]  ;;  %v2777_v11 = vrot.slane %v6760_v23, %v2776_v18  ;;  %v5189_v18 = vpack.c.bf16 %v3496_v48, %v3495_v21  ;;  %v3410_v54 = vmax.f32 %v3186_v8, 0.0  ;;  %v3412_v31 = vmax.f32 %v3257_v25, 0.0  ;;  %v3568_v48 = vld [vmem:[#allocation17 + $0x4b8] sm:$0xff]  ;;  %v3553_v4 = vld [vmem:[#allocation17 + $0x440] sm:$0xff] }
0x1728   : > { %5176 = vmatprep.subr.bf16.mxu0 %v5175_v50  ;;  %5208 = vmatprep.subr.bf16.mxu1 %v5207_v56  ;;  %v5187_v50 = vpack.c.bf16 %v3512_v40, %v3511_v39  ;;  %v3561_v56 = vld [vmem:[#allocation17 + $0x480] sm:$0xff]  ;;  %v5221_v23 = vpack.c.bf16 %v3528_v52, %v3527_v49  ;;  %v5231_v40 = vpack.c.bf16 %v3566_v55, %v3565_v30  ;;  %v3567_v21 = vld [vmem:[#allocation17 + $0x4b0] sm:$0xff]  ;;  %v3572_v25 = vld [vmem:[#allocation17 + $0x4d8] sm:$0xff] }
0x1729   : > { %v5223_v62 = vpack.c.bf16 %v3562_v57, %v3561_v56  ;;  %v3599_v49 = vld [vmem:[#allocation17 + $0x5b0] sm:$0xff]  ;;  %v5235_v52 = vpack.c.bf16 %v3568_v48, %v3567_v21  ;;  %v3552_v57 = vld [vmem:[#allocation17 + $0x438] sm:$0xff]  ;;  %v3585_v8 = vld [vmem:[#allocation17 + $0x540] sm:$0xff] }
0x172a   : > { %v3551_v56 = vld [vmem:[#allocation17 + $0x430] sm:$0xff] }
0x172b   : > { %v3325_v26 = vpop.f32.mrb[30].mxu0  ;;  %v3396_v27 = vpop.f32.mrb[32].mxu1  ;;  %5178 = vmatpush3.bf16.msra.mxu0 %v5177_v0  ;;  %5210 = vmatpush3.bf16.msra.mxu1 %v5209_v3  ;;  %v3113_v0 = vadd.f32 %v6786_v2, %v2777_v11  ;;  %v5255_v3 = vpack.c.bf16 %v3594_v60, %v3593_v59  ;;  %v3600_v11 = vld [vmem:[#allocation17 + $0x5b8] sm:$0xff]  ;;  %v5237_v63 = vpack.c.bf16 %v3552_v57, %v3551_v56  ;;  %v3625_v56 = vld [vmem:[#allocation17 + $0x680] sm:$0xff]  ;;  %v3626_v57 = vld [vmem:[#allocation17 + $0x688] sm:$0xff] }
0x172c   : > { %v6804_v32 = vadd.f32 %v3325_v26, %v2801_v6  ;;  %v6807_v33 = vadd.f32 %v3396_v27, %v6756_v20  ;;  %v6809_v34 = vpop.f32.mrb[31].mxu0  ;;  %v6811_v35 = vpop.f32.mrb[33].mxu1  ;;  %5180 = vmatprep.subr.bf16.mxu0 %v5179_v7  ;;  %5212 = vmatprep.subr.bf16.mxu1 %v5211_v9  ;;  %v5217_v20 = vpack.c.bf16 %v3526_v38, %v3525_v37  ;;  %v3578_v6 = vld [vmem:[#allocation17 + $0x508] sm:$0xff]  ;;  %v3563_v7 = vld [vmem:[#allocation17 + $0x490] sm:$0xff]  ;;  %v3564_v9 = vld [vmem:[#allocation17 + $0x498] sm:$0xff] }
0x172d   : > { %v3407_v2 = vmax.f32 %v3113_v0, 0.0  ;;  %v5257_v15 = vpack.c.bf16 %v3578_v6, %v3577_v5  ;;  %v3548_v26 = vld [vmem:[#allocation17 + $0x418] sm:$0xff]  ;;  %v3579_v27 = vld [vmem:[#allocation17 + $0x510] sm:$0xff]  ;;  %v3598_v37 = vld [vmem:[#allocation17 + $0x5a8] sm:$0xff]  ;;  %v5267_v59 = vpack.c.bf16 %v3600_v11, %v3599_v49 }
0x172e   : > { %v5229_v38 = vpack.c.bf16 %v3548_v26, %v3547_v16  ;;  %v3584_v60 = vld [vmem:[#allocation17 + $0x538] sm:$0xff]  ;;  %v3586_v6 = vld [vmem:[#allocation17 + $0x548] sm:$0xff]  ;;  %v3587_v16 = vld [vmem:[#allocation17 + $0x550] sm:$0xff] }
0x172f   : > { %5182 = vmatpush3.bf16.msra.mxu0 %v5181_v14  ;;  %5214 = vmatpush3.bf16.msra.mxu1 %v5213_v28  ;;  %v5227_v14 = vpack.c.bf16 %v3564_v9, %v3563_v7  ;;  %v5259_v28 = vpack.c.bf16 %v3596_v12, %v3595_v10  ;;  %v5269_v0 = vpack.c.bf16 %v3584_v60, %v3583_v58  ;;  %v3571_v7 = vld [vmem:[#allocation17 + $0x4d0] sm:$0xff]  ;;  %v3604_v10 = vld [vmem:[#allocation17 + $0x5d8] sm:$0xff]  ;;  %v3658_v60 = vld [vmem:[#allocation17 + $0x788] sm:$0xff] }
0x1730   : > { %5184 = vmatprep.subr.bf16.mxu0 %v5183_v29  ;;  %5216 = vmatprep.subr.bf16.mxu1 %v5215_v36  ;;  %v3580_v29 = vld [vmem:[#allocation17 + $0x518] sm:$0xff]  ;;  %v3597_v36 = vld [vmem:[#allocation17 + $0x5a0] sm:$0xff]  ;;  %v3603_v9 = vld [vmem:[#allocation17 + $0x5d0] sm:$0xff]  ;;  %v5241_v12 = vpack.c.bf16 %v3554_v24, %v3553_v4  ;;  %v2805_v58 = vrot.slane %v6751_v19, %v2772_v42 }
0x1731   : > { %v5261_v39 = vpack.c.bf16 %v3580_v29, %v3579_v27  ;;  %v5275_v26 = vpack.c.bf16 %v3604_v10, %v3603_v9  ;;  %v3588_v27 = vld [vmem:[#allocation17 + $0x558] sm:$0xff]  ;;  %v3606_v29 = vld [vmem:[#allocation17 + $0x5e8] sm:$0xff]  ;;  %v3559_v49 = vld [vmem:[#allocation17 + $0x470] sm:$0xff] }
0x1732   : > { %v5277_v55 = vpack.c.bf16 %v3588_v27, %v3587_v16  ;;  %v3560_v11 = vld [vmem:[#allocation17 + $0x478] sm:$0xff]  ;;  %v3641_v4 = vld [vmem:[#allocation17 + $0x700] sm:$0xff]  ;;  %v3642_v24 = vld [vmem:[#allocation17 + $0x708] sm:$0xff]  ;;  %v3328_v42 = vadd.f32 %v6809_v34, %v2805_v58 }
0x1733   : > { %5186 = vmatpush3.bf16.msra.mxu0 %v5185_v46  ;;  %5218 = vmatpush3.bf16.msra.mxu1 %v5217_v20  ;;  %v5263_v46 = vpack.c.bf16 %v3598_v37, %v3597_v36  ;;  %v3582_v20 = vld [vmem:[#allocation17 + $0x528] sm:$0xff]  ;;  %v3557_v36 = vld [vmem:[#allocation17 + $0x460] sm:$0xff]  ;;  %v3611_v9 = vld [vmem:[#allocation17 + $0x610] sm:$0xff] }
0x1734   : > { %5188 = vmatprep.subr.bf16.mxu0 %v5187_v50  ;;  %5220 = vmatprep.subr.bf16.mxu1 %v5219_v51  ;;  %v5233_v50 = vpack.c.bf16 %v3550_v44, %v3549_v41  ;;  %v5265_v51 = vpack.c.bf16 %v3582_v20, %v3581_v45  ;;  %v3558_v37 = vld [vmem:[#allocation17 + $0x468] sm:$0xff]  ;;  %v3575_v41 = vld [vmem:[#allocation17 + $0x4f0] sm:$0xff]  ;;  %v3576_v44 = vld [vmem:[#allocation17 + $0x4f8] sm:$0xff] }
0x1735   : > { %v3607_v45 = vld [vmem:[#allocation17 + $0x5f0] sm:$0xff]  ;;  %v5249_v20 = vpack.c.bf16 %v3558_v37, %v3557_v36  ;;  %v5251_v48 = vpack.c.bf16 %v3576_v44, %v3575_v41  ;;  %v3612_v10 = vld [vmem:[#allocation17 + $0x618] sm:$0xff]  ;;  %v3662_v27 = vld [vmem:[#allocation17 + $0x7a8] sm:$0xff] }
0x1736   : > { %v3631_v36 = vld [vmem:[#allocation17 + $0x6b0] sm:$0xff]  ;;  %v3632_v37 = vld [vmem:[#allocation17 + $0x6b8] sm:$0xff]  ;;  %v3617_v58 = vld [vmem:[#allocation17 + $0x640] sm:$0xff] }
0x1737   : > { %5190 = vmatpush3.bf16.msra.mxu0 %v5189_v18  ;;  %5222 = vmatpush3.bf16.msra.mxu1 %v5221_v23  ;;  %v3570_v18 = vld [vmem:[#allocation17 + $0x4c8] sm:$0xff]  ;;  %v3601_v23 = vld [vmem:[#allocation17 + $0x5c0] sm:$0xff]  ;;  %v5299_v44 = vpack.c.bf16 %v3632_v37, %v3631_v36  ;;  %v3413_v37 = vmax.f32 %v6804_v32, 0.0 }
0x1738   : > { %5224 = vmatprep.subr.bf16.mxu0 %v5223_v62  ;;  %5256 = vmatprep.subr.bf16.mxu1 %v5255_v3  ;;  %v3602_v62 = vld [vmem:[#allocation17 + $0x5c8] sm:$0xff]  ;;  %v5239_v3 = vpack.c.bf16 %v3570_v18, %v3569_v61  ;;  %v2813_v61 = vrot.slane %v6751_v19, %v2780_v43  ;;  %v5253_v18 = vpack.c.bf16 %v3560_v11, %v3559_v49  ;;  %v3659_v43 = vld [vmem:[#allocation17 + $0x790] sm:$0xff]  ;;  %v3633_v49 = vld [vmem:[#allocation17 + $0x6c0] sm:$0xff] }
0x1739   : > { %v5271_v5 = vpack.c.bf16 %v3602_v62, %v3601_v23  ;;  %v5287_v62 = vpack.c.bf16 %v3626_v57, %v3625_v56  ;;  %v3634_v11 = vld [vmem:[#allocation17 + $0x6c8] sm:$0xff] }
0x173a   : > { %3885 = vmatmul.mubr.f32.vlgmr.msra.gmra.mrb[34].mxu0 %v3405_v13  ;;  %3955 = vmatmul.mubr.f32.vlgmr.msra.gmra.mrb[36].mxu1 %v3407_v2  ;;  %v5243_v13 = vpack.c.bf16 %v3572_v25, %v3571_v7  ;;  %v3555_v2 = vld [vmem:[#allocation17 + $0x450] sm:$0xff]  ;;  %v3399_v17 = vadd.f32 %v6811_v35, %v2813_v61  ;;  %v3409_v7 = vmax.f32 %v6794_v53, 0.0  ;;  %v5321_v25 = vpack.c.bf16 %v3642_v24, %v3641_v4 }
0x173b   : > { %5226 = vmatpush3.bf16.msra.mxu0 %v5225_v1  ;;  %4024 = vmatprep.mubr.f32.mxu0 %v3410_v54  ;;  %v5273_v1 = vpack.c.bf16 %v3586_v6, %v3585_v8  ;;  %v3573_v54 = vld [vmem:[#allocation17 + $0x4e0] sm:$0xff]  ;;  %v3627_v8 = vld [vmem:[#allocation17 + $0x690] sm:$0xff]  ;;  %v3660_v6 = vld [vmem:[#allocation17 + $0x798] sm:$0xff]  ;;  %v3414_v35 = vmax.f32 %v3328_v42, 0.0  ;;  %v5293_v53 = vpack.c.bf16 %v3612_v10, %v3611_v9  ;;  %v5303_v57 = vpack.c.bf16 %v3634_v11, %v3633_v49 }
0x173c   : > { %5258 = vmatpush3.bf16.msra.mxu1 %v5257_v15  ;;  %4094 = vmatprep.mubr.f32.mxu1 %v3412_v31  ;;  %v3556_v15 = vld [vmem:[#allocation17 + $0x458] sm:$0xff]  ;;  %v5323_v16 = vpack.c.bf16 %v3660_v6, %v3659_v43  ;;  %v3619_v42 = vld [vmem:[#allocation17 + $0x650] sm:$0xff]  ;;  %v3637_v43 = vld [vmem:[#allocation17 + $0x6e0] sm:$0xff] }
0x173d   : > { %5228 = vmatprep.subr.bf16.mxu0 %v5227_v14  ;;  %5260 = vmatprep.subr.bf16.mxu1 %v5259_v28  ;;  %v3574_v14 = vld [vmem:[#allocation17 + $0x4e8] sm:$0xff]  ;;  %v3605_v28 = vld [vmem:[#allocation17 + $0x5e0] sm:$0xff]  ;;  %v5245_v30 = vpack.c.bf16 %v3556_v15, %v3555_v2 }
0x173e   : > { %v5247_v31 = vpack.c.bf16 %v3574_v14, %v3573_v54  ;;  %v3629_v2 = vld [vmem:[#allocation17 + $0x6a0] sm:$0xff]  ;;  %v3630_v15 = vld [vmem:[#allocation17 + $0x6a8] sm:$0xff]  ;;  %v3416_v54 = vmax.f32 %v3399_v17, 0.0 }
0x173f   : > { %5230 = vmatpush3.bf16.msra.mxu0 %v5229_v38  ;;  %v3589_v38 = vld [vmem:[#allocation17 + $0x560] sm:$0xff]  ;;  %v3638_v6 = vld [vmem:[#allocation17 + $0x6e8] sm:$0xff] }
0x1740   : > { %5262 = vmatpush3.bf16.msra.mxu1 %v5261_v39  ;;  %5232 = vmatprep.subr.bf16.mxu0 %v5231_v40  ;;  %v5279_v39 = vpack.c.bf16 %v3606_v29, %v3605_v28  ;;  %v3590_v40 = vld [vmem:[#allocation17 + $0x568] sm:$0xff]  ;;  %v5295_v28 = vpack.c.bf16 %v3630_v15, %v3629_v2  ;;  %v3613_v29 = vld [vmem:[#allocation17 + $0x620] sm:$0xff] }
0x1741   : > { %5264 = vmatprep.subr.bf16.mxu1 %v5263_v46  ;;  %v3608_v46 = vld [vmem:[#allocation17 + $0x5f8] sm:$0xff]  ;;  %v5281_v21 = vpack.c.bf16 %v3590_v40, %v3589_v38  ;;  %v3663_v38 = vld [vmem:[#allocation17 + $0x7b0] sm:$0xff]  ;;  %v3654_v15 = vld [vmem:[#allocation17 + $0x768] sm:$0xff] }
0x1743   : > { %5234 = vmatpush3.bf16.msra.mxu0 %v5233_v50  ;;  %v3591_v50 = vld [vmem:[#allocation17 + $0x570] sm:$0xff] }
0x1744   : > { %5266 = vmatpush3.bf16.msra.mxu1 %v5265_v51  ;;  %5236 = vmatprep.subr.bf16.mxu0 %v5235_v52  ;;  %v5283_v51 = vpack.c.bf16 %v3608_v46, %v3607_v45  ;;  %v3592_v52 = vld [vmem:[#allocation17 + $0x578] sm:$0xff]  ;;  %v3615_v45 = vld [vmem:[#allocation17 + $0x630] sm:$0xff] }
0x1745   : > { %5268 = vmatprep.subr.bf16.mxu1 %v5267_v59  ;;  %v3657_v59 = vld [vmem:[#allocation17 + $0x780] sm:$0xff]  ;;  %v5285_v23 = vpack.c.bf16 %v3592_v52, %v3591_v50  ;;  %v3616_v46 = vld [vmem:[#allocation17 + $0x638] sm:$0xff] }
0x1746   : > { %v3665_v50 = vld [vmem:[#allocation17 + $0x7c0] sm:$0xff]  ;;  %v5301_v52 = vpack.c.bf16 %v3616_v46, %v3615_v45 }
0x1747   : > { %5238 = vmatpush3.bf16.msra.mxu0 %v5237_v63  ;;  %v3609_v63 = vld [vmem:[#allocation17 + $0x600] sm:$0xff] }
0x1748   : > { %5270 = vmatpush3.bf16.msra.mxu1 %v5269_v0  ;;  %5240 = vmatprep.subr.bf16.mxu0 %v5239_v3  ;;  %v3610_v0 = vld [vmem:[#allocation17 + $0x608] sm:$0xff]  ;;  %v5319_v3 = vpack.c.bf16 %v3658_v60, %v3657_v59  ;;  %v3649_v60 = vld [vmem:[#allocation17 + $0x740] sm:$0xff] }
0x1749   : > { %5272 = vmatprep.subr.bf16.mxu1 %v5271_v5  ;;  %v3628_v5 = vld [vmem:[#allocation17 + $0x698] sm:$0xff]  ;;  %v5289_v19 = vpack.c.bf16 %v3610_v0, %v3609_v63  ;;  %v3618_v59 = vld [vmem:[#allocation17 + $0x648] sm:$0xff]  ;;  %v3667_v63 = vld [vmem:[#allocation17 + $0x7d0] sm:$0xff] }
0x174a   : > { %v5291_v34 = vpack.c.bf16 %v3628_v5, %v3627_v8  ;;  %v3668_v0 = vld [vmem:[#allocation17 + $0x7d8] sm:$0xff]  ;;  %v3651_v5 = vld [vmem:[#allocation17 + $0x750] sm:$0xff] }
0x174b   : > { %5242 = vmatpush3.bf16.msra.mxu0 %v5241_v12  ;;  %v3643_v12 = vld [vmem:[#allocation17 + $0x710] sm:$0xff]  ;;  %v3620_v8 = vld [vmem:[#allocation17 + $0x658] sm:$0xff]  ;;  %v5339_v17 = vpack.c.bf16 %v3668_v0, %v3667_v63 }
0x174c   : > { %5274 = vmatpush3.bf16.msra.mxu1 %v5273_v1  ;;  %5244 = vmatprep.subr.bf16.mxu0 %v5243_v13  ;;  %v3411_v1 = vmax.f32 %v6796_v22, 0.0  ;;  %v3644_v13 = vld [vmem:[#allocation17 + $0x718] sm:$0xff]  ;;  %v3614_v22 = vld [vmem:[#allocation17 + $0x628] sm:$0xff]  ;;  %v5309_v9 = vpack.c.bf16 %v3620_v8, %v3619_v42 }
0x174d   : > { %5276 = vmatprep.subr.bf16.mxu1 %v5275_v26  ;;  %v3661_v26 = vld [vmem:[#allocation17 + $0x7a0] sm:$0xff]  ;;  %v5325_v14 = vpack.c.bf16 %v3644_v13, %v3643_v12  ;;  %v5297_v40 = vpack.c.bf16 %v3614_v22, %v3613_v29  ;;  %v5311_v12 = vpack.c.bf16 %v3638_v6, %v3637_v43  ;;  %v3624_v29 = vld [vmem:[#allocation17 + $0x678] sm:$0xff] }
0x174e   : > { %v3653_v13 = vld [vmem:[#allocation17 + $0x760] sm:$0xff] }
0x174f   : > { %5246 = vmatpush3.bf16.msra.mxu0 %v5245_v30  ;;  %v3645_v30 = vld [vmem:[#allocation17 + $0x720] sm:$0xff] }
0x1750   : > { %5278 = vmatpush3.bf16.msra.mxu1 %v5277_v55  ;;  %5248 = vmatprep.subr.bf16.mxu0 %v5247_v31  ;;  %v5327_v55 = vpack.c.bf16 %v3662_v27, %v3661_v26  ;;  %v3646_v31 = vld [vmem:[#allocation17 + $0x728] sm:$0xff]  ;;  %v3671_v26 = vld [vmem:[#allocation17 + $0x7f0] sm:$0xff]  ;;  %v3672_v27 = vld [vmem:[#allocation17 + $0x7f8] sm:$0xff] }
0x1751   : > { %5280 = vmatprep.subr.bf16.mxu1 %v5279_v39  ;;  %v3664_v39 = vld [vmem:[#allocation17 + $0x7b8] sm:$0xff]  ;;  %v5329_v41 = vpack.c.bf16 %v3646_v31, %v3645_v30  ;;  %v5347_v22 = vpack.c.bf16 %v3672_v27, %v3671_v26  ;;  %v3655_v30 = vld [vmem:[#allocation17 + $0x770] sm:$0xff] }
0x1753   : > { %5250 = vmatpush3.bf16.msra.mxu0 %v5249_v20  ;;  %v3647_v20 = vld [vmem:[#allocation17 + $0x730] sm:$0xff] }
0x1754   : > { %5282 = vmatpush3.bf16.msra.mxu1 %v5281_v21  ;;  %5252 = vmatprep.subr.bf16.mxu0 %v5251_v48  ;;  %v5331_v21 = vpack.c.bf16 %v3664_v39, %v3663_v38  ;;  %v3648_v48 = vld [vmem:[#allocation17 + $0x738] sm:$0xff]  ;;  %v3415_v38 = vmax.f32 %v6807_v33, 0.0 }
0x1755   : > { %5284 = vmatprep.subr.bf16.mxu1 %v5283_v51  ;;  %v3666_v51 = vld [vmem:[#allocation17 + $0x7c8] sm:$0xff]  ;;  %v5333_v56 = vpack.c.bf16 %v3648_v48, %v3647_v20 }
0x1756   : > { %v5335_v61 = vpack.c.bf16 %v3666_v51, %v3665_v50 }
0x1757   : > { %5254 = vmatpush3.bf16.msra.mxu0 %v5253_v18  ;;  %v3650_v18 = vld [vmem:[#allocation17 + $0x748] sm:$0xff] }
0x1758   : > { %5286 = vmatpush3.bf16.msra.mxu1 %v5285_v23  ;;  %5288 = vmatprep.subr.bf16.mxu0 %v5287_v62  ;;  %v3635_v23 = vld [vmem:[#allocation17 + $0x6d0] sm:$0xff]  ;;  %v3636_v62 = vld [vmem:[#allocation17 + $0x6d8] sm:$0xff]  ;;  %v5337_v4 = vpack.c.bf16 %v3650_v18, %v3649_v60 }
0x1759   : > { %5320 = vmatprep.subr.bf16.mxu1 %v5319_v3  ;;  %v5305_v3 = vpack.c.bf16 %v3618_v59, %v3617_v58  ;;  %v5307_v24 = vpack.c.bf16 %v3636_v62, %v3635_v23 }
0x175a   : > { %4025 = vmatmul.mubr.f32.vlgmr.msra.gmra.mrb[36].mxu0 %v3409_v7  ;;  %v3669_v7 = vld [vmem:[#allocation17 + $0x7e0] sm:$0xff] }
0x175b   : > { %4095 = vmatmul.mubr.f32.vlgmr.msra.gmra.mrb[38].mxu1 %v3411_v1  ;;  %5290 = vmatpush3.bf16.msra.mxu0 %v5289_v19  ;;  %v3652_v19 = vld [vmem:[#allocation17 + $0x758] sm:$0xff]  ;;  %v3621_v1 = vld [vmem:[#allocation17 + $0x660] sm:$0xff] }
0x175c   : > { %4164 = vmatprep.mubr.f32.mxu0 %v3414_v35  ;;  %5322 = vmatpush3.bf16.msra.mxu1 %v5321_v25  ;;  %v3670_v25 = vld [vmem:[#allocation17 + $0x7e8] sm:$0xff]  ;;  %v5341_v10 = vpack.c.bf16 %v3652_v19, %v3651_v5  ;;  %v3639_v35 = vld [vmem:[#allocation17 + $0x6f0] sm:$0xff] }
0x175d   : > { %4234 = vmatprep.mubr.f32.mxu1 %v3416_v54  ;;  %5292 = vmatprep.subr.bf16.mxu0 %v5291_v34  ;;  %v3622_v34 = vld [vmem:[#allocation17 + $0x668] sm:$0xff]  ;;  %v5343_v2 = vpack.c.bf16 %v3670_v25, %v3669_v7 }
0x175e   : > { %5324 = vmatprep.subr.bf16.mxu1 %v5323_v16  ;;  %v3640_v16 = vld [vmem:[#allocation17 + $0x6f8] sm:$0xff]  ;;  %v5313_v54 = vpack.c.bf16 %v3622_v34, %v3621_v1 }
0x175f   : > { %5294 = vmatpush3.bf16.msra.mxu0 %v5293_v53  ;;  %v5345_v53 = vpack.c.bf16 %v3654_v15, %v3653_v13 }
0x1760   : > { %5326 = vmatpush3.bf16.msra.mxu1 %v5325_v14  ;;  %5296 = vmatprep.subr.bf16.mxu0 %v5295_v28  ;;  %v5315_v14 = vpack.c.bf16 %v3640_v16, %v3639_v35  ;;  %v3623_v28 = vld [vmem:[#allocation17 + $0x670] sm:$0xff] }
0x1761   : > { %5328 = vmatprep.subr.bf16.mxu1 %v5327_v55  ;;  %v3656_v55 = vld [vmem:[#allocation17 + $0x778] sm:$0xff]  ;;  %v5317_v31 = vpack.c.bf16 %v3624_v29, %v3623_v28 }
0x1762   : > { %v5349_v36 = vpack.c.bf16 %v3656_v55, %v3655_v30 }
0x1763   : > { %5298 = vmatpush3.bf16.msra.mxu0 %v5297_v40 }
0x1764   : > { %5330 = vmatpush3.bf16.msra.mxu1 %v5329_v41  ;;  %5300 = vmatprep.subr.bf16.mxu0 %v5299_v44  ;;  %v4554_v41 = vld [vmem:[#allocation19] ss:$0 sm:$0xff] }
0x1765   : > { %5332 = vmatprep.subr.bf16.mxu1 %v5331_v21 }
0x1767   : > { %5302 = vmatpush3.bf16.msra.mxu0 %v5301_v52 }
0x1768   : > { %5334 = vmatpush3.bf16.msra.mxu1 %v5333_v56  ;;  %5304 = vmatprep.subr.bf16.mxu0 %v5303_v57 }
0x1769   : > { %5336 = vmatprep.subr.bf16.mxu1 %v5335_v61 }
0x176b   : > { %5306 = vmatpush3.bf16.msra.mxu0 %v5305_v3 }
0x176c   : > { %5338 = vmatpush3.bf16.msra.mxu1 %v5337_v4  ;;  %5308 = vmatprep.subr.bf16.mxu0 %v5307_v24 }
0x176d   : > { %5340 = vmatprep.subr.bf16.mxu1 %v5339_v17 }
0x176f   : > { %5310 = vmatpush3.bf16.msra.mxu0 %v5309_v9 }
0x1770   : > { %5342 = vmatpush3.bf16.msra.mxu1 %v5341_v10  ;;  %5312 = vmatprep.subr.bf16.mxu0 %v5311_v12 }
0x1771   : > { %5344 = vmatprep.subr.bf16.mxu1 %v5343_v2  ;;  %v4556_v2 = vld [vmem:[#allocation22] ss:$0 sm:$0xff] }
0x1773   : > { %5314 = vmatpush3.bf16.msra.mxu0 %v5313_v54 }
0x1774   : > { %5346 = vmatpush3.bf16.msra.mxu1 %v5345_v53  ;;  %5316 = vmatprep.subr.bf16.mxu0 %v5315_v14 }
0x1775   : > { %5348 = vmatprep.subr.bf16.mxu1 %v5347_v22 }
0x1777   : > { %5318 = vmatpush3.bf16.msra.mxu0 %v5317_v31 }
0x1778   : > { %5350 = vmatpush3.bf16.msra.mxu1 %v5349_v36 }
0x177a   : > { %4165 = vmatmul.mubr.f32.vlgmr.msra.gmra.mrb[38].mxu0 %v3413_v37 }
0x177b   : > { %4235 = vmatmul.mubr.f32.vlgmr.msra.gmra.mrb[40].mxu1 %v3415_v38 }
0x17ed   : > { %v4646_v39 = vpop.f32.mrb[32].mxu0  ;;  %v4681_v40 = vpop.f32.mrb[34].mxu1 }
0x17ee   : > { %v4647_v44 = vpop.f32.mrb[33].mxu0  ;;  %v4682_v45 = vpop.f32.mrb[35].mxu1 }
0x17ef   : > { %v4648_v46 = vadd.f32 %v4647_v44, %v4646_v39  ;;  %v4683_v20 = vadd.f32 %v4682_v45, %v4681_v40 }
0x17f1   : > { %v3747_v21 = vadd.f32 %v4648_v46, %v4554_v41 }
0x17f3   : > { %v3817_v48 = vadd.f32 %v4683_v20, %v3747_v21 }
0x180d   : > { %v4716_v49 = vpop.f32.mrb[34].mxu0  ;;  %v4751_v11 = vpop.f32.mrb[36].mxu1 }
0x180e   : > { %v4717_v50 = vpop.f32.mrb[35].mxu0  ;;  %v4752_v51 = vpop.f32.mrb[37].mxu1 }
0x180f   : > { %v4718_v52 = vadd.f32 %v4717_v50, %v4716_v49  ;;  %v4753_v32 = vadd.f32 %v4752_v51, %v4751_v11 }
0x1811   : > { %v3887_v56 = vadd.f32 %v4718_v52, %v3817_v48 }
0x1813   : > { %v3957_v57 = vadd.f32 %v4753_v32, %v3887_v56 }
0x182d   : > { %v4786_v33 = vpop.f32.mrb[36].mxu0 }
0x182e   : > { %v4821_v58 = vpop.f32.mrb[38].mxu1  ;;  %v4787_v59 = vpop.f32.mrb[37].mxu0 }
0x182f   : > { %v4788_v60 = vadd.f32 %v4787_v59, %v4786_v33  ;;  %v4822_v61 = vpop.f32.mrb[39].mxu1 }
0x1830   : > { %v4823_v18 = vadd.f32 %v4822_v61, %v4821_v58 }
0x1831   : > { %v4027_v23 = vadd.f32 %v4788_v60, %v3957_v57 }
0x1833   : > { %v4097_v62 = vadd.f32 %v4823_v18, %v4027_v23 }
0x184d   : > { %v4856_v63 = vpop.f32.mrb[38].mxu0 }
0x184e   : > { %v4891_v0 = vpop.f32.mrb[40].mxu1  ;;  %v4857_v3 = vpop.f32.mrb[39].mxu0 }
0x184f   : > { %v4858_v4 = vadd.f32 %v4857_v3, %v4856_v63  ;;  %v4892_v24 = vpop.f32.mrb[41].mxu1 }
0x1850   : > { %v4893_v42 = vadd.f32 %v4892_v24, %v4891_v0 }
0x1851   : > { %v4167_v8 = vadd.f32 %v4858_v4, %v4097_v62 }
0x1853   : > { %v4237_v5 = vadd.f32 %v4893_v42, %v4167_v8 }
0x1855   : > { %v4240_v17 = vadd.f32 %v4237_v5, %v6724_v47  ;;  %v4555_v47 = vld [vmem:[#allocation20] ss:$0 sm:$0xff] }
0x1857   : > { %v4241_v19 = vsel %vm626_vm1, %v4240_v17, 0.0 }
0x1858   : > { %4242 = vadd.xlane.f32.xlu1 %v4241_v19 }
0x18e5   : > { %v4243_v43 = vpop.xlane.xlu1 %4242 }
0x18e6   : > { %v4244_v6 = vmul.f32 0.03125, %v4243_v43 }
0x18e8   : > { %v4245_v7 = vsub.f32 %v4240_v17, %v4244_v6 }
0x18ea   : > { %v4246_v25 = vmul.f32 %v4245_v7, %v4245_v7 }
0x18ec   : > { %v4247_v9 = vsel %vm626_vm1, %v4246_v25, 0.0 }
0x18ed   : > { %4248 = vadd.xlane.f32.xlu1 %v4247_v9 }
0x197a   : > { %v4249_v10 = vpop.xlane.xlu1 %4248 }
0x197b   : > { %v4250_v12 = vmul.f32 0.03125, %v4249_v10 }
0x197d   : > { %v4251_v1 = vadd.f32 1e-05, %v4250_v12 }
0x197f   : > { %5581 = vrsqrt.f32 %v4251_v1 }
0x1989   : > { %v5582_v34 = vpop.eup %5581 }
0x198a   : > { %v4253_v13 = vmul.f32 %v5582_v34, %v4245_v7 }
0x198c   : > { %v4261_v15 = vmul.f32 %v4555_v47, %v4253_v13 }
0x198e   : > { %v4269_v35 = vadd.f32 %v4556_v2, %v4261_v15 }
0x1990   : > { %4270 = vst.msk [vmem:[%s613_s14] sm:$0xff] %vm626_vm1, %v4269_v35 }
0x1991   : > { %5962 = shalt.err (!%p5959_p9)
}
0x1992   : > { %s5963_s21 = scalar_lea.hbm %s6848_s24, 128  ;;  %s5967_s29 = scalar_lea.hbm %s6953_s30, 256 }
0x1993   : > { %p5964_p7 = scmp.ne.s32.totalorder %s6848_s24, %s5963_s21  ;;  %p5968_p1 = scmp.lt.u32.totalorder %s6848_s24, %s6953_s30 }
0x1994   : > { %p5969_p13 = scmp.lt.u32.totalorder %s5967_s29, %s5963_s21  ;;  %p5971_p2 = scmp.lt.u32.totalorder %s5963_s21, %s6848_s24 }
0x1995   : > { %p5965_p4 = pnand %p5964_p7, %p6954_p3 }
0x1996   : > { %p5970_p0 = por %p5969_p13, %p5968_p1 }
0x1997   : > { %p5966_p12 = pneg %p5965_p4 }
0x1998   : > { %p5972_p6 = por %p5971_p2, %p5970_p0 }
0x199a   : > { %p5973_p10 = pnand %p5972_p6, %p5966_p12 }
0x199c   : > { %5976 = shalt.err (!%p5973_p10)
}
0x199d   : > { %5401 = dma.vmem_to_hbm [thread:$0]  (%p6954_p3), %s6850_s15, 128, %s6848_s24, %s4272_s20  }
0x199e PF: > { %s6955_s2 = sld [smem:[#allocation32_spill]]  ;;  %p6956_p11 = scmp.ne.s32.totalorder %s6935_s0, 0 }
0x199f   : > { %p6957_p8 = scmp.ge.s32.totalorder %s6039_s28, 2 }
0x19a1   : > { %p5445_p5 = pnand %p6957_p8, %p6956_p11 }
0x19a4   : > { %s4297_s23 = sand.u32 1, %s6955_s2  }
0x19a5   : > { %s4298_s13 = scalar_lea.sflag [#allocation4], %s4297_s23 }
0x19a6   : > { %6022 = dma.done.wait (!%p5445_p5), %s4298_s13, 128  }
0x19a7   : > { %6024 = vsyncadd (!%p5445_p5), %s4298_s13, 4294967168  ;;  %s6958_s21 = smov %s6461_s25  ;;  %p32_p9 = scmp.ge.s32.totalorder %s6449_s18, 4  }
0x19a8   : > { %s6959_s25 = smov %s6031_s26  ;;  %s6960_s26 = smov %s6035_s27 }
0x19a9   : > { %s6961_s27 = smov %s6958_s21  ;;  %s6962_s28 = smov %s6449_s18 }
0x19aa   :  { %34 = sbr.rel (!%p32_p9) target bundleno = 16 (0x10), region = 165 }
0x19b1   :  { %4303 = vsyncpa [#allocation3], 1 }
0x19b2   :  { %4305 = vsyncpa [#allocation3 + $0x1], 1 }
0x19b3   :  { %4306 = vsyncpa [#allocation6], 1 }
0x19b4   :  { %4307 = vsyncpa [#allocation9], 1 }
0x19b5   :  { %4308 = vsyncpa [#allocation12], 1 }
0x19b6   :  { %4309 = vsyncpa [#allocation15], 1 }
0x19b7   :  { %4310 = vsyncpa [#allocation18], 1 }
0x19b8   :  { %4311 = vsyncpa [#allocation21], 1 }
0x19b9   :  { %4312 = vsyncpa [#allocation4], 1 }
0x19ba   :  { %4314 = vsyncpa [#allocation4 + $0x1], 1 }

</bundles_post_ra>
